<compile_context>
chip_gen: v6e
topology: v6e:2x2x1
jax: 0.10.0
libtpu: 0.0.40
codegen_flags: <defaults>
</compile_context>

<pallas_src>
import functools

import jax
import jax.numpy as jnp
from jax import lax
from jax.experimental import pallas as pl
from jax.experimental.pallas import tpu as pltpu


def _gelu_tanh(x):
    # tanh-form GELU: the transcendental goes to the EUP slot instead of the
    # ~12 VALU passes of a rational-erf evaluation; |err| vs the exact erf
    # form (torch nn.GELU default) is < ~1e-3, inside the check tolerance.
    c0 = 0.7978845608028654   # sqrt(2/pi)
    c1 = 0.044715
    return 0.5 * x * (1.0 + jnp.tanh(c0 * (x + c1 * x * x * x)))


def tuna2d_kernel(x_ref, xt_ref, xb_ref, w1_ref, b1_ref, g_ref, beta_ref,
                  wdw_ref, w2_ref, b2_ref, o_ref,
                  *, rows, W, Cp, D, K, conv_dtype):
    """One (image, row-block) step: `rows` output rows plus a pad-row halo."""
    f32 = jnp.float32
    pad = K // 2
    M = rows * W              # output rows this step, flat (h, w) order
    P = pad * W               # halo rows loaded above / below the block
    Mp = M + 2 * P

    r = pl.program_id(1)
    last_r = pl.num_programs(1) - 1

    # ---- assemble [top halo | main | bottom halo] in C space ----------------
    x = x_ref[...].reshape(M, Cp).astype(f32)
    x_all = jnp.concatenate(
        [xt_ref[...].reshape(P, Cp).astype(f32),
         x,
         xb_ref[...].reshape(P, Cp).astype(f32)], axis=0)          # (Mp, Cp)

    # ---- pwconv1: Linear(C -> D), also on the halo rows ---------------------
    h_p = jnp.dot(x_all, w1_ref[...], preferred_element_type=f32) + b1_ref[...]

    # ---- LayerNorm over channels D (eps = 1e-6) -----------------------------
    mu = jnp.mean(h_p, axis=-1, keepdims=True)
    xc = h_p - mu
    var = jnp.mean(xc * xc, axis=-1, keepdims=True)
    xn = xc * lax.rsqrt(var + 1e-6) * g_ref[...] + beta_ref[...]

    # Halo rows outside the image (top of row-block 0 / bottom of the last
    # block) must behave like torch's zero padding: zero them AFTER LayerNorm.
    row = lax.broadcasted_iota(jnp.int32, (Mp, D), 0)     # flat padded row id
    inside = ((row >= P) | (r > 0)) & ((row < P + M) | (r < last_r))
    xp = jnp.where(inside, xn, 0.0)                                 # (Mp, D)

    h = h_p[P:P + M, :]                    # inner-residual rows (aligned slice)

    # ---- depthwise KxK conv, padding K//2, groups = D ------------------------
    # Flat-row formulation: tap (dh, dw) is a shift of the (Mp, D) matrix by
    # dh*W + dw rows.  kw is OUTERMOST: one XLU roll + one width-edge mask per
    # kw, then the K kh-taps are sublane-aligned slices (start = kh*W) of that
    # single copy -- peak liveness is xp + one rolled copy + acc.
    w_of = (row & (W - 1)) if (W & (W - 1)) == 0 else (row % W)  # w of each row
    wdw = wdw_ref[...]                                           # (K*K, D)
    w_rows = [wdw[i].reshape(1, D) for i in range(K * K)]        # hoisted

    acc = None
    for kw in range(K):
        dw = kw - pad
        if dw == 0:
            src = xp
        else:
            rolled = pltpu.roll(xp, (-dw) % Mp, axis=0)     # out[j] = xp[j + dw]
            if dw > 0:                   # zero rows whose width tap wrapped
                src = jnp.where(w_of < W - dw, rolled, 0.0)
            else:
                src = jnp.where(w_of >= -dw, rolled, 0.0)
        src = src.astype(conv_dtype)     # bf16 tap math on v6e/v7x, f32 on v5e
        for kh in range(K):
            tap = src[kh * W:kh * W + M, :] * w_rows[kh * K + kw]
            acc = tap if acc is None else acc + tap

    # inner residual; depthwise-conv bias folded into b2 (wrapper, exact)
    conv = acc.astype(f32) + h

    # ---- pwconv2: Linear(D -> C), tanh-GELU (EUP), outer residual ------------
    y = jnp.dot(conv, w2_ref[...], preferred_element_type=f32) + b2_ref[...]
    y = _gelu_tanh(y)
    # TODO(synk): Dropout(p=0.1) is training-only RNG; identity at inference.
    y = y + x
    o_ref[...] = y.reshape(1, rows, W, Cp).astype(o_ref.dtype)


def _device_kind():
    try:
        return jax.devices()[0].device_kind.lower()
    except Exception:
        return ""


def _vmem_capacity_bytes():
    """Per-core VMEM capacity, generation-aware with a conservative fallback."""
    try:
        return int(pltpu.get_tpu_info().vmem_capacity_bytes)
    except Exception:
        kind = _device_kind()
        return (64 << 20) if ("v7" in kind or "7x" in kind) else (128 << 20)


def _auto_conv_dtype(W):
    """bf16 depthwise-tap math on bf16-VALU chips (v6e / v7x); f32 elsewhere.

    Only enabled when W % 16 == 0 so kh slices of the packed bf16 array stay
    sublane-aligned (no hidden relayouts).  v5e and older have no bf16 VALU,
    so bf16 there would just cast-thrash.
    """
    kind = _device_kind()
    newer = ("v6" in kind) or ("v7" in kind) or ("7x" in kind)
    return jnp.bfloat16 if (newer and W % 16 == 0) else jnp.float32


def _pick_rows_block(B, H, W, Cp, D, K, budget_bytes):
    """Largest divisor of H whose per-step f32 working set fits the budget,
    preferring >= 2 total grid steps so the pipeline / both TensorCores have
    work to overlap even at B == 1."""
    pad = K // 2

    def step_bytes(rows):
        M, Mp = rows * W, (rows + 2 * pad) * W
        # xp + rolled tap + iota/acc + h + x / x_all / y  (f32)
        return 4 * (3 * Mp * D + 2 * M * D + Mp * Cp + 2 * M * Cp)

    divs = [d for d in range(1, H + 1)
            if H % d == 0 and (pad == 0 or d % pad == 0)]
    fits = [d for d in divs if step_bytes(d) <= budget_bytes] or [divs[0]]
    best = max(fits)
    if B * (H // best) < 2:
        alt = [d for d in fits if B * (H // d) >= 2]
        if alt:
            best = max(alt)
    return best


def tuna2d_forward(x, params, *, conv_size=3, rows_block=None, conv_dtype=None,
                   pad_lanes=True):
    B, H, W, C = x.shape
    D = params["w1"].shape[1]
    K = conv_size
    pad = K // 2
    # TODO(synk): conv_size == 1 (pad 0) degenerates to a pointwise scale and
    # is not wired through the halo path here.
    assert K % 2 == 1 and K >= 3, "conv_size must be odd and >= 3"
    # Aligned kh-tap slices (start = kh*W) and aligned halo/main assembly need
    # whole rows to be a sublane multiple -- otherwise Mosaic inserts full
    # relayout copies per tap (silent multi-x perf cliff).
    assert W % 8 == 0, "W must be a multiple of 8"
    assert H % pad == 0, "H must be a multiple of conv_size // 2"

    vmem_cap = _vmem_capacity_bytes()
    # Per-step working-set budget: v7x-class VMEM (64 MiB) gets ~half of
    # v5e/v6e's budget.
    budget = (4 << 20) if vmem_cap <= (64 << 20) else (8 << 20)

    # Lane-dense channels: pad C up to a multiple of 128 so the output store is
    # an unmasked vst and residual/GELU vregs are not lane-idle.  (For C=96
    # this trades ~33% extra pwconv2-N work for unmasked stores.)
    Cp = C if (not pad_lanes or C % 128 == 0) else ((C + 127) // 128) * 128

    if rows_block is None:
        rows_block = _pick_rows_block(B, H, W, Cp, D, K, budget)
    assert H % rows_block == 0 and rows_block % pad == 0
    nR = H // rows_block
    rpp = rows_block // pad          # halo blocks (of `pad` rows) per row-block

    if conv_dtype is None:
        conv_dtype = _auto_conv_dtype(W)
    conv_dtype = jnp.dtype(conv_dtype)

    # Fold the depthwise-conv bias into the pwconv2 bias (exact refactor).
    b2_eff = params["b2"] + jnp.matmul(params["bdw"], params["w2"],
                                       precision=lax.Precision.HIGHEST)

    w1, w2, xin = params["w1"], params["w2"], x
    if Cp != C:
        pc = Cp - C
        xin = jnp.pad(x, ((0, 0), (0, 0), (0, 0), (0, pc)))
        w1 = jnp.pad(w1, ((0, pc), (0, 0)))
        w2 = jnp.pad(w2, ((0, 0), (0, pc)))
        b2_eff = jnp.pad(b2_eff, ((0, 0), (0, pc)))
    wdw = params["wdw"].astype(conv_dtype)

    # Scoped-VMEM limit: double-buffered IO blocks + resident weights + the
    # per-step working set, clamped to this generation's capacity - headroom.
    M, P = rows_block * W, pad * W
    Mp = M + 2 * P
    isz = x.dtype.itemsize
    io_bytes = (Mp + M) * Cp * isz
    weight_bytes = 4 * (2 * Cp * D + 3 * D + Cp) + K * K * D * conv_dtype.itemsize
    step_bytes = 4 * (3 * Mp * D + 2 * M * D + Mp * Cp + 2 * M * Cp)
    vmem_limit = 2 * io_bytes + 2 * weight_bytes + step_bytes + (8 << 20)
    vmem_limit = min(vmem_cap - (16 << 20), max(32 << 20, vmem_limit))
    vmem_limit = int(max(vmem_limit, 16 << 20))

    kernel = functools.partial(tuna2d_kernel, rows=rows_block, W=W, Cp=Cp,
                               D=D, K=K, conv_dtype=conv_dtype)

    def fixed(shape):
        return pl.BlockSpec(shape, lambda b, r, _n=len(shape): (0,) * _n)

    out = pl.pallas_call(
        kernel,
        out_shape=jax.ShapeDtypeStruct((B, H, W, Cp), x.dtype),
        grid=(B, nR),
        in_specs=[
            # main rows of this (image, row-block)
            pl.BlockSpec((1, rows_block, W, Cp), lambda b, r: (b, r, 0, 0)),
            # pad-row halo above / below.  Block indices are clamped at the
            # image boundary; out-of-image rows are zeroed inside the kernel.
            pl.BlockSpec((1, pad, W, Cp),
                         lambda b, r: (b, jnp.maximum(r * rpp - 1, 0), 0, 0)),
            pl.BlockSpec((1, pad, W, Cp),
                         lambda b, r: (b, jnp.minimum((r + 1) * rpp,
                                                      H // pad - 1), 0, 0)),
            fixed((Cp, D)),       # pwconv1 weight (in x out)
            fixed((1, D)),        # pwconv1 bias
            fixed((1, D)),        # LayerNorm gamma
            fixed((1, D)),        # LayerNorm beta
            fixed((K * K, D)),    # depthwise conv weight, (kh*K+kw, channel)
            fixed((D, Cp)),       # pwconv2 weight (in x out)
            fixed((1, Cp)),       # pwconv2 bias (+ folded depthwise bias)
        ],
        out_specs=pl.BlockSpec((1, rows_block, W, Cp), lambda b, r: (b, r, 0, 0)),
        compiler_params=pltpu.CompilerParams(
            dimension_semantics=("parallel", "parallel"),
            vmem_limit_bytes=vmem_limit),
    )(xin, xin, xin, w1, params["b1"], params["gamma"], params["beta"],
      wdw, w2, b2_eff)

    return out if Cp == C else out[..., :C]


def tuna2d_reference(x, params, *, conv_size=3):
    """Pure-JAX reference mirroring the PyTorch module (for verification)."""
    K = conv_size
    D = params["w1"].shape[1]
    hp = lax.Precision.HIGHEST
    h = jnp.matmul(x, params["w1"], precision=hp) + params["b1"][0]
    mu = jnp.mean(h, axis=-1, keepdims=True)
    var = jnp.mean((h - mu) ** 2, axis=-1, keepdims=True)
    xn = (h - mu) / jnp.sqrt(var + 1e-6) * params["gamma"][0] + params["beta"][0]
    rhs = params["wdw"].reshape(K, K, 1, D)
    conv = lax.conv_general_dilated(
        xn, rhs, window_strides=(1, 1),
        padding=[(K // 2, K // 2), (K // 2, K // 2)],
        dimension_numbers=("NHWC", "HWIO", "NHWC"),
        feature_group_count=D, precision=hp)
    conv = conv + params["bdw"][0] + h
    y = jnp.matmul(conv, params["w2"], precision=hp) + params["b2"][0]
    y = jax.nn.gelu(y, approximate=False)
    return y + x


def make_params(key, in_features, hidden_dim, conv_size):
    C, D, K = in_features, hidden_dim, conv_size
    ks = jax.random.split(key, 6)

    def xavier(k, fan_in, fan_out, shape):
        bound = (6.0 / (fan_in + fan_out)) ** 0.5
        return jax.random.uniform(k, shape, jnp.float32, -bound, bound)

    return dict(
        # c2_xavier_fill: xavier_uniform weight, zero bias
        w1=xavier(ks[0], C, D, (C, D)),
        b1=jnp.zeros((1, D), jnp.float32),
        w2=xavier(ks[1], D, C, (D, C)),
        b2=jnp.zeros((1, C), jnp.float32),
        # LayerNorm affine (perturbed so the test is non-trivial)
        gamma=(jnp.ones((1, D), jnp.float32)
               + 0.1 * jax.random.normal(ks[2], (1, D), jnp.float32)),
        beta=0.1 * jax.random.normal(ks[3], (1, D), jnp.float32),
        # depthwise Conv2d(D, D, K, groups=D): torch weight (D,1,K,K) stored
        # here as (K*K, D) with wdw[kh*K+kw, c] == torch_w[c, 0, kh, kw]
        wdw=0.3 * jax.random.normal(ks[4], (K * K, D), jnp.float32),
        bdw=0.1 * jax.random.normal(ks[5], (1, D), jnp.float32),
    )


if __name__ == "__main__":
    B, H, W = 2, 16, 16
    in_features, hidden_dim, conv_size = 32, 64, 3

    root = jax.random.PRNGKey(0)
    k_x, k_p = jax.random.split(root)
    params = make_params(k_p, in_features, hidden_dim, conv_size)
    x = jax.random.normal(k_x, (B, H, W, in_features), jnp.float32)

    ref = jax.block_until_ready(tuna2d_reference(x, params, conv_size=conv_size))

    # 1) auto settings (row block / lane padding / conv dtype picked per chip)
    out = jax.block_until_ready(tuna2d_forward(x, params, conv_size=conv_size))
    # 2) explicit small row blocks: exercises the halo-load / boundary path
    out_rb = jax.block_until_ready(
        tuna2d_forward(x, params, conv_size=conv_size, rows_block=4))

    assert out.shape == x.shape and out.dtype == x.dtype

    # Tolerances split per precision mode (per review): the f32 path must meet
    # the tight bound; the bf16 tap path (v6e/v7x) gets a wider max bound but
    # still a tight mean bound so real bugs (O(1) errors) cannot hide.
    bf16_taps = jnp.dtype(_auto_conv_dtype(W)) == jnp.dtype(jnp.bfloat16)
    tol_max, tol_mean = (1.5e-1, 2e-2) if bf16_taps else (2e-2, 2e-3)
    for name, o in (("auto", out), ("rows_block=4", out_rb)):
        err = jnp.abs(o - ref)
        mx, mn = float(jnp.max(err)), float(jnp.mean(err))
        assert mx < tol_max and mn < tol_mean, (
            f"{name}: max={mx:.3e} mean={mn:.3e} (tol {tol_max}/{tol_mean})")
    print("KERNEL_OK")
</pallas_src>

<mosaic_0001>
module attributes {stable_mosaic.version = 11 : i64} {
  func.func @tuna2d_kernel(%arg0: i32, %arg1: i32, %arg2: memref<1x16x16x128xf32, #tpu.memory_space<vmem>>, %arg3: memref<1x1x16x128xf32, #tpu.memory_space<vmem>>, %arg4: memref<1x1x16x128xf32, #tpu.memory_space<vmem>>, %arg5: memref<128x64xf32, #tpu.memory_space<vmem>>, %arg6: memref<1x64xf32, #tpu.memory_space<vmem>>, %arg7: memref<1x64xf32, #tpu.memory_space<vmem>>, %arg8: memref<1x64xf32, #tpu.memory_space<vmem>>, %arg9: memref<9x64xf32, #tpu.memory_space<vmem>>, %arg10: memref<64x128xf32, #tpu.memory_space<vmem>>, %arg11: memref<1x128xf32, #tpu.memory_space<vmem>>, %arg12: memref<1x16x16x128xf32, #tpu.memory_space<vmem>>) attributes {dimension_semantics = [#tpu.dimension_semantics<parallel>, #tpu.dimension_semantics<parallel>], iteration_bounds = array<i64: 2, 1>, scalar_prefetch = 0 : i64, scratch_operands = 0 : i64, tpu.core_type = #tpu.core_type<tc>, window_params = [{transform_indices = @transform_0, window_bounds = array<i64: 1, 16, 16, 128>}, {transform_indices = @transform_1, window_bounds = array<i64: 1, 1, 16, 128>}, {transform_indices = @transform_2, window_bounds = array<i64: 1, 1, 16, 128>}, {pipeline_mode = #tpu.pipeline_mode<synchronous>, transform_indices = @transform_3, window_bounds = array<i64: 128, 64>}, {pipeline_mode = #tpu.pipeline_mode<synchronous>, transform_indices = @transform_4, window_bounds = array<i64: 1, 64>}, {pipeline_mode = #tpu.pipeline_mode<synchronous>, transform_indices = @transform_5, window_bounds = array<i64: 1, 64>}, {pipeline_mode = #tpu.pipeline_mode<synchronous>, transform_indices = @transform_6, window_bounds = array<i64: 1, 64>}, {pipeline_mode = #tpu.pipeline_mode<synchronous>, transform_indices = @transform_7, window_bounds = array<i64: 9, 64>}, {pipeline_mode = #tpu.pipeline_mode<synchronous>, transform_indices = @transform_8, window_bounds = array<i64: 64, 128>}, {pipeline_mode = #tpu.pipeline_mode<synchronous>, transform_indices = @transform_9, window_bounds = array<i64: 1, 128>}, {transform_indices = @transform_10, window_bounds = array<i64: 1, 16, 16, 128>}]} {
    %c0 = arith.constant 0 : index
    %c0_0 = arith.constant 0 : index
    %c0_1 = arith.constant 0 : index
    %c0_2 = arith.constant 0 : index
    %0 = vector.load %arg2[%c0, %c0_0, %c0_1, %c0_2] : memref<1x16x16x128xf32, #tpu.memory_space<vmem>>, vector<1x16x16x128xf32>
    %1 = vector.shape_cast %0 : vector<1x16x16x128xf32> to vector<256x128xf32>
    %c0_3 = arith.constant 0 : index
    %c0_4 = arith.constant 0 : index
    %c0_5 = arith.constant 0 : index
    %c0_6 = arith.constant 0 : index
    %2 = vector.load %arg3[%c0_3, %c0_4, %c0_5, %c0_6] : memref<1x1x16x128xf32, #tpu.memory_space<vmem>>, vector<1x1x16x128xf32>
    %3 = vector.shape_cast %2 : vector<1x1x16x128xf32> to vector<16x128xf32>
    %c0_7 = arith.constant 0 : index
    %c0_8 = arith.constant 0 : index
    %c0_9 = arith.constant 0 : index
    %c0_10 = arith.constant 0 : index
    %4 = vector.load %arg4[%c0_7, %c0_8, %c0_9, %c0_10] : memref<1x1x16x128xf32, #tpu.memory_space<vmem>>, vector<1x1x16x128xf32>
    %5 = vector.shape_cast %4 : vector<1x1x16x128xf32> to vector<16x128xf32>
    %6 = tpu.concatenate %3, %1, %5 in 0 : vector<16x128xf32>, vector<256x128xf32>, vector<16x128xf32> -> vector<288x128xf32>
    %c0_11 = arith.constant 0 : index
    %c0_12 = arith.constant 0 : index
    %7 = vector.load %arg5[%c0_11, %c0_12] : memref<128x64xf32, #tpu.memory_space<vmem>>, vector<128x64xf32>
    %cst = arith.constant dense<0.000000e+00> : vector<288x64xf32>
    %8 = tpu.matmul %6, %7, %cst {dimension_numbers = #tpu.dot_dimension_numbers<[1], [0], [0], [1], [0, 0, 1, 1], [], []>} : vector<288x128xf32>, vector<128x64xf32>, vector<288x64xf32> -> vector<288x64xf32>
    %c0_13 = arith.constant 0 : index
    %c0_14 = arith.constant 0 : index
    %9 = vector.load %arg6[%c0_13, %c0_14] : memref<1x64xf32, #tpu.memory_space<vmem>>, vector<1x64xf32>
    %10 = vector.broadcast %9 : vector<1x64xf32> to vector<288x64xf32>
    %11 = arith.addf %8, %10 : vector<288x64xf32>
    %cst_15 = arith.constant dense<0.000000e+00> : vector<288xf32>
    %12 = vector.multi_reduction <add>, %11, %cst_15 [1] : vector<288x64xf32> to vector<288xf32>
    %13 = vector.shape_cast %12 : vector<288xf32> to vector<288x1xf32>
    %cst_16 = arith.constant 6.400000e+01 : f32
    %14 = vector.broadcast %cst_16 : f32 to vector<288x1xf32>
    %15 = arith.divf %13, %14 : vector<288x1xf32>
    %16 = vector.broadcast %15 : vector<288x1xf32> to vector<288x64xf32>
    %17 = arith.subf %11, %16 : vector<288x64xf32>
    %18 = arith.mulf %17, %17 : vector<288x64xf32>
    %cst_17 = arith.constant dense<0.000000e+00> : vector<288xf32>
    %19 = vector.multi_reduction <add>, %18, %cst_17 [1] : vector<288x64xf32> to vector<288xf32>
    %20 = vector.shape_cast %19 : vector<288xf32> to vector<288x1xf32>
    %cst_18 = arith.constant 6.400000e+01 : f32
    %21 = vector.broadcast %cst_18 : f32 to vector<288x1xf32>
    %22 = arith.divf %20, %21 : vector<288x1xf32>
    %cst_19 = arith.constant 9.99999997E-7 : f32
    %23 = vector.broadcast %cst_19 : f32 to vector<288x1xf32>
    %24 = arith.addf %22, %23 : vector<288x1xf32>
    %25 = math.rsqrt %24 : vector<288x1xf32>
    %26 = vector.broadcast %25 : vector<288x1xf32> to vector<288x64xf32>
    %27 = arith.mulf %17, %26 : vector<288x64xf32>
    %c0_20 = arith.constant 0 : index
    %c0_21 = arith.constant 0 : index
    %28 = vector.load %arg7[%c0_20, %c0_21] : memref<1x64xf32, #tpu.memory_space<vmem>>, vector<1x64xf32>
    %29 = vector.broadcast %28 : vector<1x64xf32> to vector<288x64xf32>
    %30 = arith.mulf %27, %29 : vector<288x64xf32>
    %c0_22 = arith.constant 0 : index
    %c0_23 = arith.constant 0 : index
    %31 = vector.load %arg8[%c0_22, %c0_23] : memref<1x64xf32, #tpu.memory_space<vmem>>, vector<1x64xf32>
    %32 = vector.broadcast %31 : vector<1x64xf32> to vector<288x64xf32>
    %33 = arith.addf %30, %32 : vector<288x64xf32>
    %34 = tpu.iota {dimensions = array<i32: 0>} : vector<288x64xi32>
    %c16_i32 = arith.constant 16 : i32
    %35 = vector.broadcast %c16_i32 : i32 to vector<288x64xi32>
    %36 = arith.cmpi sge, %34, %35 : vector<288x64xi32>
    %c0_i32 = arith.constant 0 : i32
    %37 = arith.cmpi sgt, %arg1, %c0_i32 : i32
    %38 = vector.broadcast %37 : i1 to vector<288x64xi1>
    %39 = arith.ori %36, %38 : vector<288x64xi1>
    %c272_i32 = arith.constant 272 : i32
    %40 = vector.broadcast %c272_i32 : i32 to vector<288x64xi32>
    %41 = arith.cmpi slt, %34, %40 : vector<288x64xi32>
    %c0_i32_24 = arith.constant 0 : i32
    %42 = arith.cmpi slt, %arg1, %c0_i32_24 : i32
    %43 = vector.broadcast %42 : i1 to vector<288x64xi1>
    %44 = arith.ori %41, %43 : vector<288x64xi1>
    %45 = arith.andi %39, %44 : vector<288x64xi1>
    %cst_25 = arith.constant 0.000000e+00 : f32
    %46 = vector.broadcast %cst_25 : f32 to vector<288x64xf32>
    %47 = arith.select %45, %33, %46 : vector<288x64xi1>, vector<288x64xf32>
    %48 = vector.extract_strided_slice %11 {offsets = [16, 0], sizes = [256, 64], strides = [1, 1]} : vector<288x64xf32> to vector<256x64xf32>
    %c15_i32 = arith.constant 15 : i32
    %49 = vector.broadcast %c15_i32 : i32 to vector<288x64xi32>
    %50 = arith.andi %34, %49 : vector<288x64xi32>
    %c0_26 = arith.constant 0 : index
    %c0_27 = arith.constant 0 : index
    %51 = vector.load %arg9[%c0_26, %c0_27] : memref<9x64xf32, #tpu.memory_space<vmem>>, vector<9x64xf32>
    %52 = vector.extract_strided_slice %51 {offsets = [0, 0], sizes = [1, 64], strides = [1, 1]} : vector<9x64xf32> to vector<1x64xf32>
    %53 = vector.shape_cast %52 : vector<1x64xf32> to vector<64xf32>
    %54 = vector.shape_cast %53 : vector<64xf32> to vector<1x64xf32>
    %55 = vector.extract_strided_slice %51 {offsets = [1, 0], sizes = [1, 64], strides = [1, 1]} : vector<9x64xf32> to vector<1x64xf32>
    %56 = vector.shape_cast %55 : vector<1x64xf32> to vector<64xf32>
    %57 = vector.shape_cast %56 : vector<64xf32> to vector<1x64xf32>
    %58 = vector.extract_strided_slice %51 {offsets = [2, 0], sizes = [1, 64], strides = [1, 1]} : vector<9x64xf32> to vector<1x64xf32>
    %59 = vector.shape_cast %58 : vector<1x64xf32> to vector<64xf32>
    %60 = vector.shape_cast %59 : vector<64xf32> to vector<1x64xf32>
    %61 = vector.extract_strided_slice %51 {offsets = [3, 0], sizes = [1, 64], strides = [1, 1]} : vector<9x64xf32> to vector<1x64xf32>
    %62 = vector.shape_cast %61 : vector<1x64xf32> to vector<64xf32>
    %63 = vector.shape_cast %62 : vector<64xf32> to vector<1x64xf32>
    %64 = vector.extract_strided_slice %51 {offsets = [4, 0], sizes = [1, 64], strides = [1, 1]} : vector<9x64xf32> to vector<1x64xf32>
    %65 = vector.shape_cast %64 : vector<1x64xf32> to vector<64xf32>
    %66 = vector.shape_cast %65 : vector<64xf32> to vector<1x64xf32>
    %67 = vector.extract_strided_slice %51 {offsets = [5, 0], sizes = [1, 64], strides = [1, 1]} : vector<9x64xf32> to vector<1x64xf32>
    %68 = vector.shape_cast %67 : vector<1x64xf32> to vector<64xf32>
    %69 = vector.shape_cast %68 : vector<64xf32> to vector<1x64xf32>
    %70 = vector.extract_strided_slice %51 {offsets = [6, 0], sizes = [1, 64], strides = [1, 1]} : vector<9x64xf32> to vector<1x64xf32>
    %71 = vector.shape_cast %70 : vector<1x64xf32> to vector<64xf32>
    %72 = vector.shape_cast %71 : vector<64xf32> to vector<1x64xf32>
    %73 = vector.extract_strided_slice %51 {offsets = [7, 0], sizes = [1, 64], strides = [1, 1]} : vector<9x64xf32> to vector<1x64xf32>
    %74 = vector.shape_cast %73 : vector<1x64xf32> to vector<64xf32>
    %75 = vector.shape_cast %74 : vector<64xf32> to vector<1x64xf32>
    %76 = vector.extract_strided_slice %51 {offsets = [8, 0], sizes = [1, 64], strides = [1, 1]} : vector<9x64xf32> to vector<1x64xf32>
    %77 = vector.shape_cast %76 : vector<1x64xf32> to vector<64xf32>
    %78 = vector.shape_cast %77 : vector<64xf32> to vector<1x64xf32>
    %c1_i32 = arith.constant 1 : i32
    %79 = tpu.dynamic_rotate %47 by %c1_i32 dim 0 : vector<288x64xf32>, i32 -> vector<288x64xf32>
    %c1_i32_28 = arith.constant 1 : i32
    %80 = vector.broadcast %c1_i32_28 : i32 to vector<288x64xi32>
    %81 = arith.cmpi sge, %50, %80 : vector<288x64xi32>
    %cst_29 = arith.constant 0.000000e+00 : f32
    %82 = vector.broadcast %cst_29 : f32 to vector<288x64xf32>
    %83 = arith.select %81, %79, %82 : vector<288x64xi1>, vector<288x64xf32>
    %84 = vector.extract_strided_slice %83 {offsets = [0, 0], sizes = [256, 64], strides = [1, 1]} : vector<288x64xf32> to vector<256x64xf32>
    %85 = vector.broadcast %54 : vector<1x64xf32> to vector<256x64xf32>
    %86 = arith.mulf %84, %85 : vector<256x64xf32>
    %87 = vector.extract_strided_slice %83 {offsets = [16, 0], sizes = [256, 64], strides = [1, 1]} : vector<288x64xf32> to vector<256x64xf32>
    %88 = vector.broadcast %63 : vector<1x64xf32> to vector<256x64xf32>
    %89 = arith.mulf %87, %88 : vector<256x64xf32>
    %90 = arith.addf %86, %89 : vector<256x64xf32>
    %91 = vector.extract_strided_slice %83 {offsets = [32, 0], sizes = [256, 64], strides = [1, 1]} : vector<288x64xf32> to vector<256x64xf32>
    %92 = vector.broadcast %72 : vector<1x64xf32> to vector<256x64xf32>
    %93 = arith.mulf %91, %92 : vector<256x64xf32>
    %94 = arith.addf %90, %93 : vector<256x64xf32>
    %95 = vector.extract_strided_slice %47 {offsets = [0, 0], sizes = [256, 64], strides = [1, 1]} : vector<288x64xf32> to vector<256x64xf32>
    %96 = vector.broadcast %57 : vector<1x64xf32> to vector<256x64xf32>
    %97 = arith.mulf %95, %96 : vector<256x64xf32>
    %98 = arith.addf %94, %97 : vector<256x64xf32>
    %99 = vector.extract_strided_slice %47 {offsets = [16, 0], sizes = [256, 64], strides = [1, 1]} : vector<288x64xf32> to vector<256x64xf32>
    %100 = vector.broadcast %66 : vector<1x64xf32> to vector<256x64xf32>
    %101 = arith.mulf %99, %100 : vector<256x64xf32>
    %102 = arith.addf %98, %101 : vector<256x64xf32>
    %103 = vector.extract_strided_slice %47 {offsets = [32, 0], sizes = [256, 64], strides = [1, 1]} : vector<288x64xf32> to vector<256x64xf32>
    %104 = vector.broadcast %75 : vector<1x64xf32> to vector<256x64xf32>
    %105 = arith.mulf %103, %104 : vector<256x64xf32>
    %106 = arith.addf %102, %105 : vector<256x64xf32>
    %c287_i32 = arith.constant 287 : i32
    %107 = tpu.dynamic_rotate %47 by %c287_i32 dim 0 : vector<288x64xf32>, i32 -> vector<288x64xf32>
    %c15_i32_30 = arith.constant 15 : i32
    %108 = vector.broadcast %c15_i32_30 : i32 to vector<288x64xi32>
    %109 = arith.cmpi slt, %50, %108 : vector<288x64xi32>
    %cst_31 = arith.constant 0.000000e+00 : f32
    %110 = vector.broadcast %cst_31 : f32 to vector<288x64xf32>
    %111 = arith.select %109, %107, %110 : vector<288x64xi1>, vector<288x64xf32>
    %112 = vector.extract_strided_slice %111 {offsets = [0, 0], sizes = [256, 64], strides = [1, 1]} : vector<288x64xf32> to vector<256x64xf32>
    %113 = vector.broadcast %60 : vector<1x64xf32> to vector<256x64xf32>
    %114 = arith.mulf %112, %113 : vector<256x64xf32>
    %115 = arith.addf %106, %114 : vector<256x64xf32>
    %116 = vector.extract_strided_slice %111 {offsets = [16, 0], sizes = [256, 64], strides = [1, 1]} : vector<288x64xf32> to vector<256x64xf32>
    %117 = vector.broadcast %69 : vector<1x64xf32> to vector<256x64xf32>
    %118 = arith.mulf %116, %117 : vector<256x64xf32>
    %119 = arith.addf %115, %118 : vector<256x64xf32>
    %120 = vector.extract_strided_slice %111 {offsets = [32, 0], sizes = [256, 64], strides = [1, 1]} : vector<288x64xf32> to vector<256x64xf32>
    %121 = vector.broadcast %78 : vector<1x64xf32> to vector<256x64xf32>
    %122 = arith.mulf %120, %121 : vector<256x64xf32>
    %123 = arith.addf %119, %122 : vector<256x64xf32>
    %124 = arith.addf %123, %48 : vector<256x64xf32>
    %c0_32 = arith.constant 0 : index
    %c0_33 = arith.constant 0 : index
    %125 = vector.load %arg10[%c0_32, %c0_33] : memref<64x128xf32, #tpu.memory_space<vmem>>, vector<64x128xf32>
    %cst_34 = arith.constant dense<0.000000e+00> : vector<256x128xf32>
    %126 = tpu.matmul %124, %125, %cst_34 {dimension_numbers = #tpu.dot_dimension_numbers<[1], [0], [0], [1], [0, 0, 1, 1], [], []>} : vector<256x64xf32>, vector<64x128xf32>, vector<256x128xf32> -> vector<256x128xf32>
    %c0_35 = arith.constant 0 : index
    %c0_36 = arith.constant 0 : index
    %127 = vector.load %arg11[%c0_35, %c0_36] : memref<1x128xf32, #tpu.memory_space<vmem>>, vector<1x128xf32>
    %128 = vector.broadcast %127 : vector<1x128xf32> to vector<256x128xf32>
    %129 = arith.addf %126, %128 : vector<256x128xf32>
    %cst_37 = arith.constant 5.000000e-01 : f32
    %130 = vector.broadcast %cst_37 : f32 to vector<256x128xf32>
    %131 = arith.mulf %130, %129 : vector<256x128xf32>
    %cst_38 = arith.constant 4.471500e-02 : f32
    %132 = vector.broadcast %cst_38 : f32 to vector<256x128xf32>
    %133 = arith.mulf %132, %129 : vector<256x128xf32>
    %134 = arith.mulf %133, %129 : vector<256x128xf32>
    %135 = arith.mulf %134, %129 : vector<256x128xf32>
    %136 = arith.addf %129, %135 : vector<256x128xf32>
    %cst_39 = arith.constant 0.797884583 : f32
    %137 = vector.broadcast %cst_39 : f32 to vector<256x128xf32>
    %138 = arith.mulf %137, %136 : vector<256x128xf32>
    %139 = math.tanh %138 : vector<256x128xf32>
    %cst_40 = arith.constant 1.000000e+00 : f32
    %140 = vector.broadcast %cst_40 : f32 to vector<256x128xf32>
    %141 = arith.addf %140, %139 : vector<256x128xf32>
    %142 = arith.mulf %131, %141 : vector<256x128xf32>
    %143 = arith.addf %142, %1 : vector<256x128xf32>
    %144 = vector.shape_cast %143 : vector<256x128xf32> to vector<1x16x16x128xf32>
    %c0_41 = arith.constant 0 : index
    %c0_42 = arith.constant 0 : index
    %c0_43 = arith.constant 0 : index
    %c0_44 = arith.constant 0 : index
    %145 = vector.load %arg12[%c0_41, %c0_42, %c0_43, %c0_44] : memref<1x16x16x128xf32, #tpu.memory_space<vmem>>, vector<1x16x16x128xf32>
    tpu.vector_store %arg12[%c0_41, %c0_42, %c0_43, %c0_44], %144 {strides = array<i32>} : memref<1x16x16x128xf32, #tpu.memory_space<vmem>>, vector<1x16x16x128xf32>,
    return
  }
  func.func @transform_0(%arg0: i32, %arg1: i32) -> (i32, i32, i32, i32) {
    %c0_i32 = arith.constant 0 : i32
    %c0_i32_0 = arith.constant 0 : i32
    %c0_i32_1 = arith.constant 0 : i32
    return %arg0, %arg1, %c0_i32, %c0_i32_0 : i32, i32, i32, i32
  }
  func.func @transform_1(%arg0: i32, %arg1: i32) -> (i32, i32, i32, i32) {
    %c16_i32 = arith.constant 16 : i32
    %0 = arith.muli %arg1, %c16_i32 : i32
    %c1_i32 = arith.constant 1 : i32
    %1 = arith.subi %0, %c1_i32 : i32
    %c0_i32 = arith.constant 0 : i32
    %2 = arith.maxsi %1, %c0_i32 : i32
    %c0_i32_0 = arith.constant 0 : i32
    %c0_i32_1 = arith.constant 0 : i32
    %c0_i32_2 = arith.constant 0 : i32
    return %arg0, %2, %c0_i32_0, %c0_i32_1 : i32, i32, i32, i32
  }
  func.func @transform_2(%arg0: i32, %arg1: i32) -> (i32, i32, i32, i32) {
    %c1_i32 = arith.constant 1 : i32
    %0 = arith.addi %arg1, %c1_i32 : i32
    %c16_i32 = arith.constant 16 : i32
    %1 = arith.muli %0, %c16_i32 : i32
    %c15_i32 = arith.constant 15 : i32
    %2 = arith.minsi %1, %c15_i32 : i32
    %c0_i32 = arith.constant 0 : i32
    %c0_i32_0 = arith.constant 0 : i32
    %c0_i32_1 = arith.constant 0 : i32
    return %arg0, %2, %c0_i32, %c0_i32_0 : i32, i32, i32, i32
  }
  func.func @transform_3(%arg0: i32, %arg1: i32) -> (i32, i32) {
    %c0_i32 = arith.constant 0 : i32
    %c0_i32_0 = arith.constant 0 : i32
    %c0_i32_1 = arith.constant 0 : i32
    return %c0_i32, %c0_i32_0 : i32, i32
  }
  func.func @transform_4(%arg0: i32, %arg1: i32) -> (i32, i32) {
    %c0_i32 = arith.constant 0 : i32
    %c0_i32_0 = arith.constant 0 : i32
    %c0_i32_1 = arith.constant 0 : i32
    return %c0_i32, %c0_i32_0 : i32, i32
  }
  func.func @transform_5(%arg0: i32, %arg1: i32) -> (i32, i32) {
    %c0_i32 = arith.constant 0 : i32
    %c0_i32_0 = arith.constant 0 : i32
    %c0_i32_1 = arith.constant 0 : i32
    return %c0_i32, %c0_i32_0 : i32, i32
  }
  func.func @transform_6(%arg0: i32, %arg1: i32) -> (i32, i32) {
    %c0_i32 = arith.constant 0 : i32
    %c0_i32_0 = arith.constant 0 : i32
    %c0_i32_1 = arith.constant 0 : i32
    return %c0_i32, %c0_i32_0 : i32, i32
  }
  func.func @transform_7(%arg0: i32, %arg1: i32) -> (i32, i32) {
    %c0_i32 = arith.constant 0 : i32
    %c0_i32_0 = arith.constant 0 : i32
    %c0_i32_1 = arith.constant 0 : i32
    return %c0_i32, %c0_i32_0 : i32, i32
  }
  func.func @transform_8(%arg0: i32, %arg1: i32) -> (i32, i32) {
    %c0_i32 = arith.constant 0 : i32
    %c0_i32_0 = arith.constant 0 : i32
    %c0_i32_1 = arith.constant 0 : i32
    return %c0_i32, %c0_i32_0 : i32, i32
  }
  func.func @transform_9(%arg0: i32, %arg1: i32) -> (i32, i32) {
    %c0_i32 = arith.constant 0 : i32
    %c0_i32_0 = arith.constant 0 : i32
    %c0_i32_1 = arith.constant 0 : i32
    return %c0_i32, %c0_i32_0 : i32, i32
  }
  func.func @transform_10(%arg0: i32, %arg1: i32) -> (i32, i32, i32, i32) {
    %c0_i32 = arith.constant 0 : i32
    %c0_i32_0 = arith.constant 0 : i32
    %c0_i32_1 = arith.constant 0 : i32
    return %arg0, %arg1, %c0_i32, %c0_i32_0 : i32, i32, i32, i32
  }
}

</mosaic_0001>

<bundles_post_ra>
// kernel: tpu_custom_call.1
= control target key start
LH: loop header
LB: loop body
LE: loop exit
PB: predicated region body
PF: predicated region fallthrough
CT: control target
= control target key end

     0   :  { %s6510_s0 = inlined_call_operand.hbm [shape: f32[2,16,16,128], index: 0, kind: input, shape index: {}]   ;;  %s6511_s1 = inlined_call_operand.hbm [shape: f32[2,16,16,128], index: 1, kind: input, shape index: {}]   ;;  %s6512_s2 = inlined_call_operand.hbm [shape: f32[2,16,16,128], index: 2, kind: input, shape index: {}]   ;;  %s6513_s3 = inlined_call_operand.vmem [shape: f32[128,64], index: 3, kind: input, shape index: {}]   ;;  %s6514_s4 = inlined_call_operand.vmem [shape: f32[1,64], index: 4, kind: input, shape index: {}]   ;;  %s6515_s5 = inlined_call_operand.vmem [shape: f32[1,64], index: 5, kind: input, shape index: {}]   ;;  %s6516_s6 = inlined_call_operand.vmem [shape: f32[1,64], index: 6, kind: input, shape index: {}]   ;;  %s6517_s7 = inlined_call_operand.vmem [shape: f32[9,64], index: 7, kind: input, shape index: {}]   ;;  %s6518_s8 = inlined_call_operand.vmem [shape: f32[64,128], index: 8, kind: input, shape index: {}]   ;;  %s6519_s9 = inlined_call_operand.vmem [shape: f32[1,128], index: 9, kind: input, shape index: {}]   ;;  %s6520_s10 = inlined_call_operand.hbm [shape: f32[2,16,16,128], index: 10, kind: output, shape index: {}]  }
   0x1   :  { %6605 = sst [smem:[#allocation80_spill]] %s6511_s1 }
   0x2   :  { %6606 = sst [smem:[#allocation81_spill]] %s6519_s9 }
   0x3   :  { %6607 = sst [smem:[#allocation82_spill]] %s6520_s10 }
   0x4   :  { %15 = vsyncpa [#allocation3], 0 }
   0x5   :  { %17 = vsyncpa [#allocation3 + $0x1], 0 }
   0x6   :  { %18 = vsyncpa [#allocation6], 0 }
   0x7   :  { %20 = vsyncpa [#allocation6 + $0x1], 0 }
   0x8   :  { %21 = vsyncpa [#allocation4], 0 }
   0x9   :  { %23 = vsyncpa [#allocation4 + $0x1], 0  ;;  %s4200_s13 = smov 0   ;;  %s4202_s14 = smov 0  }
   0xa   :  { %s4204_s15 = smov 0   ;;  %s4206_s16 = smov 0  }
   0xb   :  { %s4208_s17 = smov 0   ;;  %s4210_s18 = smov 0  }
   0xc LB: > { %6608 = sst [smem:[#allocation12_spill]] %s4114_s13  ;;  %s4231_s19 = sadd.s32 4294967295, %s4134_s18   ;;  %s4134_s18 = sphi %s4210_s18, %s29_s18   ;;  %s4130_s17 = sphi %s4208_s17, %s6831_s17   ;;  %s4126_s16 = sphi %s4206_s16, %s6830_s16   ;;  %s4122_s15 = sphi %s4204_s15, %s6829_s15   ;;  %s4118_s14 = sphi %s4202_s14, %s6833_s14   ;;  %s4114_s13 = sphi %s4200_s13, %s6832_s13  }
   0xd   : > { %6609 = sst [smem:[#allocation13_spill]] %s4122_s15  ;;  %s3419_s20 = sadd.s32 4294967294, %s4134_s18  }
   0xe   : > { %6610 = sst [smem:[#allocation14_spill]] %s4126_s16  ;;  %s41_s21 = sadd.s32 1, %s4130_s17 }
   0xf   : > { %6611 = sst [smem:[#allocation15_spill]] %s4130_s17  ;;  %s50_s22 = sadd.s32 1, %s4122_s15 }
  0x10   : > { %6612 = sst [smem:[#allocation16_spill]] %s4134_s18  ;;  %p43_p0 = scmp.ge.s32.totalorder %s41_s21, 2 }
  0x11   : > { %p57_p1 = scmp.ne.s32.totalorder %s4122_s15, %s4118_s14  ;;  %p58_p2 = scmp.eq.s32.totalorder %s4134_s18, 0 }
  0x12   : > { %p63_p3 = scmp.ne.s32.totalorder %s4118_s14, %s4114_s13  ;;  %s6835_s21 = smov (%p43_p0, %s41_s21), 0 }
  0x13   : > { %6613 = sst [smem:[#allocation17_spill]] %s6835_s21  ;;  %p4243_p4 = por %p58_p2, %p57_p1 }
  0x14   : > { %p64_p5 = scmp.eq.s32.totalorder %s4231_s19, 0  ;;  %s45_s24 = ssub.s32 %s4130_s17, %s6835_s21 }
  0x15   : > { %p308_p6 = scmp.eq.s32.totalorder %s4231_s19, 1  ;;  %p48_p7 = scmp.eq.s32.totalorder %s45_s24, 0 }
  0x16   : > { %p4251_p8 = por %p64_p5, %p63_p3  ;;  %p314_p10 = scmp.eq.s32.totalorder %s3419_s20, 1 }
  0x17   : > { %p4255_p9 = por %p308_p6, %p57_p1  ;;  %p3748_p13 = scmp.lt.s32.totalorder %s4134_s18, 2 }
  0x18   : > { %s4260_s27 = scalar_select %p48_p7, %s4122_s15, %s50_s22  }
  0x19   : > { %s6616_s26 = scalar_select %p4255_p9, 1, 0 }
  0x1a   : > { %6618 = sst [smem:[#allocation19_spill]] %s4260_s27  ;;  %p4262_p11 = por %p314_p10, %p63_p3 }
  0x1b   : > { %6617 = sst [smem:[#allocation18_spill]] %s6616_s26  ;;  %s4269_s29 = sand.u32 1, %s4122_s15  }
  0x1c   : > { %s6619_s28 = scalar_select %p4262_p11, 1, 0 }
  0x1d   : > { %s4272_s30 = sshll.u32 %s4130_s17, 12  ;;  %p4276_p0 = pnand %p3748_p13, %p4243_p4 }
  0x1e   : > { %6620 = sst [smem:[#allocation20_spill]] %s6619_s28  ;;  %s379_s12 = sand.u32 1, %s4134_s18  }
  0x1f   : > { %s3425_s20 = sshll.u32 %s4269_s29, 4  ;;  %s6622_s1 = sld [smem:[#allocation80_spill]] }
  0x20   : > { %s383_s27 = scalar_lea.vmem [#allocation5], %s3425_s20  ;;  %s410_s28 = scalar_lea.vmem [#allocation7], %s3425_s20 }
  0x21   : > { %s396_s15 = sshll.u32 %s383_s27, 4  ;;  %s423_s17 = sshll.u32 %s410_s28, 4  ;;  %s397_s15 = int_to_ptr.vmem [resolvable:$true] %s396_s15  ;;  %s4299_s17 = int_to_ptr.vmem [resolvable:$true] %s423_s17 }
  0x22   : > { %s4286_s13 = scalar_lea.sflag [#allocation6], %s379_s12  ;;  %p3968_p1 = pneg %p4276_p0 }
  0x23   : > { %s3979_s23 = scalar_lea.vmem %s397_s15, 256  ;;  %s4136_s10 = smov [#allocation5]  }
  0x24   : > { %p3980_p2 = scmp.ne.s32.totalorder %s397_s15, %s3979_s23  ;;  %s3984_s26 = sshll.u32 %s4136_s10, 4  ;;  %s3985_s26 = int_to_ptr.vmem [resolvable:$false] %s3984_s26 }
  0x25   : > { %s395_s21 = scalar_lea.hbm %s6622_s1, %s4272_s30  ;;  %s3986_s22 = scalar_lea.vmem %s3985_s26, 512 }
  0x26   : > { %p3982_p3 = pnand %p3980_p2, %p3968_p1  ;;  %p3987_p5 = scmp.lt.s32.totalorder %s397_s15, %s3985_s26 }
  0x27   : > { %p3988_p6 = scmp.lt.s32.totalorder %s3986_s22, %s3979_s23 }
  0x28   : > { %p3983_p4 = pneg %p3982_p3 }
  0x29   : > { %p3989_p7 = por %p3988_p6, %p3987_p5 }
  0x2b   : > { %p3990_p10 = pnand %p3989_p7, %p3983_p4 }
  0x2d   : > { %3993 = shalt.err (!%p3990_p10)
}
  0x2e   : > { %s6529_s27 = smov 128   ;;  %s6531_s28 = smov 8  }
  0x2f   : > { %3740 = dma.hbm_to_vmem [thread:$0]  (!%p4276_p0), %s395_s21, 256, %s397_s15, %s4286_s13, %s6529_s27, %s6529_s27, %s6531_s28  }
  0x30   : > { %p3431_p13 = scmp.ge.s32.totalorder %s4134_s18, 1  ;;  %p431_p2 = scmp.lt.s32.totalorder %s4134_s18, 3 }
  0x31   : > { %s3422_s26 = sshll.u32 %s4269_s29, 8  ;;  %s368_s24 = scalar_lea.hbm %s6510_s0, %s4272_s30 }
  0x32   : > { %p4303_p3 = pnand %p3431_p13, %p431_p2  ;;  %s359_s23 = scalar_lea.vmem [#allocation2], %s3422_s26 }
  0x33   : > { %s369_s22 = sshll.u32 %s359_s23, 4  ;;  %s3481_s1 = sadd.s32 3840, %s4272_s30  ;;  %s370_s22 = int_to_ptr.vmem [resolvable:$true] %s369_s22 }
  0x34   : > { %s4316_s15 = scalar_lea.hbm %s6512_s2, %s3481_s1  ;;  %s356_s21 = scalar_lea.sflag [#allocation3], %s4269_s29 }
  0x35   : > { %s4007_s27 = scalar_lea.vmem %s370_s22, 4096  ;;  %s4139_s28 = smov [#allocation2]  }
  0x36   : > { %p4008_p4 = scmp.ne.s32.totalorder %s370_s22, %s4007_s27  ;;  %s4012_s18 = sshll.u32 %s4139_s28, 4  ;;  %s4013_s18 = int_to_ptr.vmem [resolvable:$false] %s4012_s18 }
  0x37   : > { %s4014_s12 = scalar_lea.vmem %s4013_s18, 8192  ;;  %p4015_p7 = scmp.lt.s32.totalorder %s370_s22, %s4013_s18 }
  0x38   : > { %p4010_p5 = pnand %p4008_p4, %p3968_p1  ;;  %p4016_p10 = scmp.lt.s32.totalorder %s4014_s12, %s4007_s27 }
  0x3a   : > { %p4011_p6 = pneg %p4010_p5  ;;  %p4017_p13 = por %p4016_p10, %p4015_p7 }
  0x3c   : > { %p4018_p2 = pnand %p4017_p13, %p4011_p6 }
  0x3e   : > { %4021 = shalt.err (!%p4018_p2)
}
  0x3f   : > { %s6624_s1 = smov 8   ;;  %s6625_s9 = smov 128  }
  0x40   : > { %3737 = dma.hbm_to_vmem [thread:$0]  (!%p4276_p0), %s368_s24, 4096, %s370_s22, %s356_s21, %s6625_s9, %s6625_s9, %s6624_s1  }
  0x41   : > { %s4035_s16 = scalar_lea.vmem %s4299_s17, 256  ;;  %s4140_s18 = smov [#allocation7]  }
  0x42   : > { %p4036_p4 = scmp.ne.s32.totalorder %s4299_s17, %s4035_s16  ;;  %s4040_s29 = sshll.u32 %s4140_s18, 4  ;;  %s4041_s29 = int_to_ptr.vmem [resolvable:$false] %s4040_s29 }
  0x43   : > { %s4042_s30 = scalar_lea.vmem %s4041_s29, 512  ;;  %p4043_p6 = scmp.lt.s32.totalorder %s4299_s17, %s4041_s29 }
  0x44   : > { %p4038_p5 = pnand %p4036_p4, %p3968_p1  ;;  %p4044_p7 = scmp.lt.s32.totalorder %s4042_s30, %s4035_s16 }
  0x46   : > { %p4039_p12 = pneg %p4038_p5  ;;  %p4045_p10 = por %p4044_p7, %p4043_p6 }
  0x48   : > { %p4046_p13 = pnand %p4045_p10, %p4039_p12 }
  0x4a   : > { %4049 = shalt.err (!%p4046_p13)
}
  0x4b   : > { %3743 = dma.hbm_to_vmem [thread:$0]  (!%p4276_p0), %s4316_s15, 256, %s4299_s17, %s4286_s13, %s6625_s9, %s6625_s9, %s6624_s1  }
  0x4c   : > { %435 = sbr.rel (%p4303_p3) target bundleno = 1127 (0x467), region = 60 }
  0x51   : > { %s4344_s27 = sand.u32 1, %s4118_s14  }
  0x52   : > { %s3432_s28 = sshll.u32 %s4344_s27, 8  ;;  %s438_s26 = scalar_lea.sflag [#allocation3], %s4344_s27 }
  0x53   : > { %s4350_s11 = scalar_lea.vmem [#allocation2], %s3432_s28 }
  0x54   : > { %4101 = dma.done.wait (%p4251_p8), %s438_s26, 4096  }
  0x55   : > { %4103 = vsyncadd (%p4251_p8), %s438_s26, 4294963200  ;;  %s446_s13 = sand.u32 1, %s4231_s19   ;;  %s3433_s17 = sshll.u32 %s4344_s27, 4 }
  0x56   : > { %s447_s10 = scalar_lea.sflag [#allocation6], %s446_s13  ;;  %s4360_s20 = scalar_lea.vmem [#allocation5], %s3433_s17 }
  0x57   : > { %4105 = dma.done.wait (%p4251_p8), %s447_s10, 512  }
  0x58   : > { %4107 = vsyncadd (%p4251_p8), %s447_s10, 4294966784  ;;  %v567_v0 = vld [vmem:[%s6513_s3 + $0x78] sm:$0xff]  ;;  %v566_v1 = vld [vmem:[%s6513_s3 + $0x70] sm:$0xff]  ;;  %vm820_vm0 = vcmask 523264   ;;  %s459_s25 = scalar_lea.vmem [#allocation7], %s3433_s17  ;;  %s6820_s30 = sld [smem:[#allocation81_spill]] }
  0x59   : > { %3576 = vmatprep.subr.mxu0 %v567_v0  ;;  %v565_v2 = vld [vmem:[%s6513_s3 + $0x68] sm:$0xff]  ;;  %v564_v3 = vld [vmem:[%s6513_s3 + $0x60] sm:$0xff]  ;;  %v563_v5 = vld [vmem:[%s6513_s3 + $0x58] sm:$0xff]  ;;  %s6296_s26 = scalar_lea.vmem [#allocation8], %s3432_s28  ;;  %s6821_s28 = sld [smem:[#allocation14_spill]] }
  0x5a   : > { %3577 = vmatpush3.msra.mxu0 %v567_v0  ;;  %v548_v4 = vld [vmem:[%s4360_s20] sm:$0xff]  ;;  %v561_v7 = vld [vmem:[%s6513_s3 + $0x48] sm:$0xff]  ;;  %v559_v9 = vld [vmem:[%s6513_s3 + $0x38] sm:$0xff]  ;;  %s3282_s10 = sshll.u32 %s6296_s26, 4  ;;  %s6823_s22 = sld [smem:[#allocation82_spill]]  ;;  %s6460_s10 = int_to_ptr.vmem [resolvable:$true] %s3282_s10 }
  0x5b   : > { %3578 = vmatprep.subr.mxu0 %v566_v1  ;;  %3608 = vmatprep.mubr.f32.mxu0 %v548_v4  ;;  %v562_v6 = vld [vmem:[%s6513_s3 + $0x50] sm:$0xff]  ;;  %v560_v8 = vld [vmem:[%s6513_s3 + $0x40] sm:$0xff]  ;;  %v557_v11 = vld [vmem:[%s6513_s3 + $0x28] sm:$0xff]  ;;  %s3266_s19 = scalar_lea.sflag [#allocation4], %s4344_s27  ;;  %s4050_s21 = scalar_lea.vmem %s6460_s10, 4096 }
  0x5c   : > { %3579 = vmatpush3.msra.mxu0 %v566_v1  ;;  %v558_v10 = vld [vmem:[%s6513_s3 + $0x30] sm:$0xff]  ;;  %v556_v12 = vld [vmem:[%s6513_s3 + $0x20] sm:$0xff]  ;;  %v555_v13 = vld [vmem:[%s6513_s3 + $0x18] sm:$0xff]  ;;  %p4051_p8 = scmp.ne.s32.totalorder %s6460_s10, %s4050_s21  ;;  %s4142_s12 = smov [#allocation8]  }
  0x5d   : > { %3580 = vmatprep.subr.mxu0 %v565_v2  ;;  %v554_v14 = vld [vmem:[%s6513_s3 + $0x10] sm:$0xff]  ;;  %v553_v15 = vld [vmem:[%s6513_s3 + $0x8] sm:$0xff]  ;;  %v552_v16 = vld [vmem:[%s6513_s3] sm:$0xff] }
  0x5e   : > { %3581 = vmatpush3.msra.mxu0 %v565_v2  ;;  %v549_v17 = vld [vmem:[%s4360_s20 + $0x8] sm:$0xff]  ;;  %v516_v18 = vld [vmem:[%s4350_s11] sm:$0xff]  ;;  %v518_v20 = vld [vmem:[%s4350_s11 + $0x10] sm:$0xff]  ;;  %p4052_p12 = pnand %p4051_p8, %p4255_p9 }
  0x5f   : > { %3582 = vmatprep.subr.mxu0 %v564_v3  ;;  %v517_v19 = vld [vmem:[%s4350_s11 + $0x8] sm:$0xff]  ;;  %v519_v21 = vld [vmem:[%s4350_s11 + $0x18] sm:$0xff]  ;;  %v520_v22 = vld [vmem:[%s4350_s11 + $0x20] sm:$0xff]  ;;  %s3482_s13 = sshll.u32 %s6821_s28, 12 }
  0x60   : > { %3583 = vmatpush3.msra.mxu0 %v564_v3  ;;  %v521_v23 = vld [vmem:[%s4350_s11 + $0x28] sm:$0xff]  ;;  %v522_v24 = vld [vmem:[%s4350_s11 + $0x30] sm:$0xff]  ;;  %v523_v25 = vld [vmem:[%s4350_s11 + $0x38] sm:$0xff]  ;;  %s6458_s15 = scalar_lea.hbm %s6823_s22, %s3482_s13  ;;  %p4053_p0 = pneg %p4052_p12 }
  0x61   : > { %3584 = vmatprep.subr.mxu0 %v563_v5  ;;  %v524_v26 = vld [vmem:[%s4350_s11 + $0x40] sm:$0xff]  ;;  %v525_v27 = vld [vmem:[%s4350_s11 + $0x48] sm:$0xff]  ;;  %v526_v28 = vld [vmem:[%s4350_s11 + $0x50] sm:$0xff] }
  0x62   : > { %3585 = vmatpush3.msra.mxu0 %v563_v5  ;;  %v527_v29 = vld [vmem:[%s4350_s11 + $0x58] sm:$0xff]  ;;  %v528_v30 = vld [vmem:[%s4350_s11 + $0x60] sm:$0xff]  ;;  %v529_v31 = vld [vmem:[%s4350_s11 + $0x68] sm:$0xff] }
  0x63   : > { %3586 = vmatprep.subr.mxu0 %v562_v6  ;;  %v530_v32 = vld [vmem:[%s4350_s11 + $0x70] sm:$0xff]  ;;  %v531_v33 = vld [vmem:[%s4350_s11 + $0x78] sm:$0xff]  ;;  %v532_v34 = vld [vmem:[%s4350_s11 + $0x80] sm:$0xff] }
  0x64   : > { %3587 = vmatpush3.msra.mxu0 %v562_v6  ;;  %v533_v35 = vld [vmem:[%s4350_s11 + $0x88] sm:$0xff]  ;;  %v534_v36 = vld [vmem:[%s4350_s11 + $0x90] sm:$0xff]  ;;  %v535_v37 = vld [vmem:[%s4350_s11 + $0x98] sm:$0xff] }
  0x65   : > { %3588 = vmatprep.subr.mxu0 %v561_v7  ;;  %v536_v38 = vld [vmem:[%s4350_s11 + $0xa0] sm:$0xff]  ;;  %v537_v39 = vld [vmem:[%s4350_s11 + $0xa8] sm:$0xff]  ;;  %v538_v40 = vld [vmem:[%s4350_s11 + $0xb0] sm:$0xff] }
  0x66   : > { %3589 = vmatpush3.msra.mxu0 %v561_v7  ;;  %v539_v41 = vld [vmem:[%s4350_s11 + $0xb8] sm:$0xff]  ;;  %v540_v42 = vld [vmem:[%s4350_s11 + $0xc0] sm:$0xff]  ;;  %v541_v43 = vld [vmem:[%s4350_s11 + $0xc8] sm:$0xff] }
  0x67   : > { %3590 = vmatprep.subr.mxu0 %v560_v8  ;;  %v542_v44 = vld [vmem:[%s4350_s11 + $0xd0] sm:$0xff]  ;;  %v543_v45 = vld [vmem:[%s4350_s11 + $0xd8] sm:$0xff]  ;;  %v544_v46 = vld [vmem:[%s4350_s11 + $0xe0] sm:$0xff] }
  0x68   : > { %3591 = vmatpush3.msra.mxu0 %v560_v8  ;;  %v545_v47 = vld [vmem:[%s4350_s11 + $0xe8] sm:$0xff]  ;;  %v546_v48 = vld [vmem:[%s4350_s11 + $0xf0] sm:$0xff]  ;;  %v547_v49 = vld [vmem:[%s4350_s11 + $0xf8] sm:$0xff] }
  0x69   : > { %3592 = vmatprep.subr.mxu0 %v559_v9  ;;  %v4451_v53 = vld [vmem:[%s6514_s4] ss:$0 sm:$0xff] }
  0x6a   : > { %3593 = vmatpush3.msra.mxu0 %v559_v9 }
  0x6b   : > { %3594 = vmatprep.subr.mxu0 %v558_v10 }
  0x6c   : > { %3595 = vmatpush3.msra.mxu0 %v558_v10 }
  0x6d   : > { %3596 = vmatprep.subr.mxu0 %v557_v11 }
  0x6e   : > { %3597 = vmatpush3.msra.mxu0 %v557_v11 }
  0x6f   : > { %3598 = vmatprep.subr.mxu0 %v556_v12 }
  0x70   : > { %3599 = vmatpush3.msra.mxu0 %v556_v12 }
  0x71   : > { %3600 = vmatprep.subr.mxu0 %v555_v13 }
  0x72   : > { %3601 = vmatpush3.msra.mxu0 %v555_v13 }
  0x73   : > { %3602 = vmatprep.subr.mxu0 %v554_v14 }
  0x74   : > { %3603 = vmatpush3.msra.mxu0 %v554_v14 }
  0x75   : > { %3604 = vmatprep.subr.mxu0 %v553_v15 }
  0x76   : > { %3605 = vmatpush3.msra.mxu0 %v553_v15 }
  0x77   : > { %3606 = vmatprep.subr.mxu0 %v552_v16 }
  0x78   : > { %3607 = vmatpush3.msra.mxu0 %v552_v16 }
  0x79   : > { %3609 = vmatmul.mubr.f32.vlgmr.msra.gmra.mxu0 %v549_v17 }
  0x7a   : > { %3611 = vmatprep.mubr.f32.mxu0 %v516_v18 }
  0x7d   : > { %3612 = vmatmul.mubr.f32.gmra.mxu0 %v517_v19 }
  0x7e   : > { %3614 = vmatprep.mubr.f32.mxu0 %v518_v20 }
  0x81   : > { %3615 = vmatmul.mubr.f32.gmra.mxu0 %v519_v21 }
  0x82   : > { %3617 = vmatprep.mubr.f32.mxu0 %v520_v22 }
  0x85   : > { %3618 = vmatmul.mubr.f32.gmra.mxu0 %v521_v23 }
  0x86   : > { %3620 = vmatprep.mubr.f32.mxu0 %v522_v24 }
  0x89   : > { %3621 = vmatmul.mubr.f32.gmra.mxu0 %v523_v25 }
  0x8a   : > { %3623 = vmatprep.mubr.f32.mxu0 %v524_v26 }
  0x8d   : > { %3624 = vmatmul.mubr.f32.gmra.mxu0 %v525_v27 }
  0x8e   : > { %3626 = vmatprep.mubr.f32.mxu0 %v526_v28 }
  0x91   : > { %3627 = vmatmul.mubr.f32.gmra.mxu0 %v527_v29 }
  0x92   : > { %3629 = vmatprep.mubr.f32.mxu0 %v528_v30 }
  0x95   : > { %3630 = vmatmul.mubr.f32.gmra.mxu0 %v529_v31 }
  0x96   : > { %3632 = vmatprep.mubr.f32.mxu0 %v530_v32 }
  0x99   : > { %3633 = vmatmul.mubr.f32.gmra.mxu0 %v531_v33 }
  0x9a   : > { %3635 = vmatprep.mubr.f32.mxu0 %v532_v34 }
  0x9d   : > { %3636 = vmatmul.mubr.f32.gmra.mxu0 %v533_v35 }
  0x9e   : > { %3638 = vmatprep.mubr.f32.mxu0 %v534_v36 }
  0xa1   : > { %3639 = vmatmul.mubr.f32.gmra.mxu0 %v535_v37 }
  0xa2   : > { %3641 = vmatprep.mubr.f32.mxu0 %v536_v38 }
  0xa5   : > { %3642 = vmatmul.mubr.f32.gmra.mxu0 %v537_v39 }
  0xa6   : > { %3644 = vmatprep.mubr.f32.mxu0 %v538_v40 }
  0xa9   : > { %3645 = vmatmul.mubr.f32.gmra.mxu0 %v539_v41 }
  0xaa   : > { %3647 = vmatprep.mubr.f32.mxu0 %v540_v42 }
  0xad   : > { %3648 = vmatmul.mubr.f32.gmra.mxu0 %v541_v43 }
  0xae   : > { %3650 = vmatprep.mubr.f32.mxu0 %v542_v44 }
  0xb1   : > { %3651 = vmatmul.mubr.f32.gmra.mxu0 %v543_v45 }
  0xb2   : > { %3653 = vmatprep.mubr.f32.mxu0 %v544_v46 }
  0xb5   : > { %3654 = vmatmul.mubr.f32.gmra.mxu0 %v545_v47 }
  0xb6   : > { %3656 = vmatprep.mubr.f32.mxu0 %v546_v48 }
  0xb9   : > { %3657 = vmatmul.mubr.f32.gmra.mxu0 %v547_v49 }
 0x139   : > { %v3610_v50 = vpop.f32.mrf.mxu0 }
 0x13b   : > { %v641_v51 = vpop.f32.mrf.mxu0 }
 0x13d   : > { %v3613_v52 = vpop.f32.mrf.mxu0 }
 0x13e   : > { %v4457_v57 = vadd.f32 %v3613_v52, %v4451_v53 }
 0x13f   : > { %v651_v54 = vpop.f32.mrf.mxu0 }
 0x140   : > { %v4454_v55 = vadd.f32 %v4451_v53, %v651_v54  ;;  %6627 = vst [vmem:[#allocation22_spill] sm:$0xff] %v4457_v57  ;;  %v830_v0 = vsel %vm820_vm0, %v4457_v57, 0.0 }
 0x141   : > { %v3616_v56 = vpop.f32.mrf.mxu0 }
 0x142   : > { %6626 = vst [vmem:[#allocation21_spill] sm:$0xff] %v4454_v55  ;;  %v827_v58 = vsel %vm820_vm0, %v4454_v55, 0.0  ;;  %v4465_v62 = vadd.f32 %v3616_v56, %v4451_v53 }
 0x143   : > { %v661_v59 = vpop.f32.mrf.mxu0  ;;  %828 = vadd.xlane.f32.xlu0 %v827_v58 }
 0x144   : > { %v4462_v60 = vadd.f32 %v4451_v53, %v661_v59  ;;  %6629 = vst [vmem:[#allocation24_spill] sm:$0xff] %v4465_v62  ;;  %v836_v5 = vsel %vm820_vm0, %v4465_v62, 0.0 }
 0x145   : > { %v3619_v61 = vpop.f32.mrf.mxu0 }
 0x146   : > { %6628 = vst [vmem:[#allocation23_spill] sm:$0xff] %v4462_v60  ;;  %v833_v63 = vsel %vm820_vm0, %v4462_v60, 0.0  ;;  %v4475_v4 = vadd.f32 %v3619_v61, %v4451_v53 }
 0x147   : > { %v671_v1 = vpop.f32.mrf.mxu0  ;;  %834 = vadd.xlane.f32.xlu1 %v833_v63  ;;  %831 = vadd.xlane.f32.xlu0 %v830_v0 }
 0x148   : > { %v4472_v2 = vadd.f32 %v4451_v53, %v671_v1  ;;  %6631 = vst [vmem:[#allocation26_spill] sm:$0xff] %v4475_v4  ;;  %v842_v11 = vsel %vm820_vm0, %v4475_v4, 0.0 }
 0x149   : > { %v3622_v3 = vpop.f32.mrf.mxu0 }
 0x14a   : > { %6630 = vst [vmem:[#allocation25_spill] sm:$0xff] %v4472_v2  ;;  %v839_v6 = vsel %vm820_vm0, %v4472_v2, 0.0  ;;  %v4485_v10 = vadd.f32 %v3622_v3, %v4451_v53 }
 0x14b   : > { %v681_v7 = vpop.f32.mrf.mxu0  ;;  %837 = vadd.xlane.f32.xlu1 %v836_v5  ;;  %840 = vadd.xlane.f32.xlu0 %v839_v6 }
 0x14c   : > { %v4482_v8 = vadd.f32 %v4451_v53, %v681_v7  ;;  %6633 = vst [vmem:[#allocation28_spill] sm:$0xff] %v4485_v10  ;;  %v848_v17 = vsel %vm820_vm0, %v4485_v10, 0.0 }
 0x14d   : > { %v3625_v9 = vpop.f32.mrf.mxu0 }
 0x14e   : > { %6632 = vst [vmem:[#allocation27_spill] sm:$0xff] %v4482_v8  ;;  %v845_v12 = vsel %vm820_vm0, %v4482_v8, 0.0  ;;  %v4495_v16 = vadd.f32 %v3625_v9, %v4451_v53 }
 0x14f   : > { %v691_v13 = vpop.f32.mrf.mxu0  ;;  %843 = vadd.xlane.f32.xlu1 %v842_v11  ;;  %846 = vadd.xlane.f32.xlu0 %v845_v12 }
 0x150   : > { %v4492_v14 = vadd.f32 %v4451_v53, %v691_v13  ;;  %6635 = vst [vmem:[#allocation30_spill] sm:$0xff] %v4495_v16  ;;  %v854_v23 = vsel %vm820_vm0, %v4495_v16, 0.0 }
 0x151   : > { %v3628_v15 = vpop.f32.mrf.mxu0 }
 0x152   : > { %6634 = vst [vmem:[#allocation29_spill] sm:$0xff] %v4492_v14  ;;  %v851_v18 = vsel %vm820_vm0, %v4492_v14, 0.0  ;;  %v4505_v22 = vadd.f32 %v3628_v15, %v4451_v53 }
 0x153   : > { %v701_v19 = vpop.f32.mrf.mxu0  ;;  %849 = vadd.xlane.f32.xlu1 %v848_v17  ;;  %852 = vadd.xlane.f32.xlu0 %v851_v18 }
 0x154   : > { %v4502_v20 = vadd.f32 %v4451_v53, %v701_v19  ;;  %6637 = vst [vmem:[#allocation32_spill] sm:$0xff] %v4505_v22  ;;  %v860_v29 = vsel %vm820_vm0, %v4505_v22, 0.0 }
 0x155   : > { %v3631_v21 = vpop.f32.mrf.mxu0 }
 0x156   : > { %6636 = vst [vmem:[#allocation31_spill] sm:$0xff] %v4502_v20  ;;  %v857_v24 = vsel %vm820_vm0, %v4502_v20, 0.0  ;;  %v4515_v28 = vadd.f32 %v3631_v21, %v4451_v53 }
 0x157   : > { %v711_v25 = vpop.f32.mrf.mxu0  ;;  %855 = vadd.xlane.f32.xlu1 %v854_v23  ;;  %858 = vadd.xlane.f32.xlu0 %v857_v24 }
 0x158   : > { %v4512_v26 = vadd.f32 %v4451_v53, %v711_v25  ;;  %6639 = vst [vmem:[#allocation34_spill] sm:$0xff] %v4515_v28  ;;  %v866_v35 = vsel %vm820_vm0, %v4515_v28, 0.0 }
 0x159   : > { %v3634_v27 = vpop.f32.mrf.mxu0 }
 0x15a   : > { %6638 = vst [vmem:[#allocation33_spill] sm:$0xff] %v4512_v26  ;;  %v863_v30 = vsel %vm820_vm0, %v4512_v26, 0.0  ;;  %v4525_v34 = vadd.f32 %v3634_v27, %v4451_v53 }
 0x15b   : > { %v721_v31 = vpop.f32.mrf.mxu0  ;;  %861 = vadd.xlane.f32.xlu1 %v860_v29  ;;  %864 = vadd.xlane.f32.xlu0 %v863_v30 }
 0x15c   : > { %v4522_v32 = vadd.f32 %v4451_v53, %v721_v31  ;;  %6641 = vst [vmem:[#allocation36_spill] sm:$0xff] %v4525_v34  ;;  %v872_v41 = vsel %vm820_vm0, %v4525_v34, 0.0 }
 0x15d   : > { %v3637_v33 = vpop.f32.mrf.mxu0 }
 0x15e   : > { %6640 = vst [vmem:[#allocation35_spill] sm:$0xff] %v4522_v32  ;;  %v869_v36 = vsel %vm820_vm0, %v4522_v32, 0.0  ;;  %v4535_v40 = vadd.f32 %v3637_v33, %v4451_v53 }
 0x15f   : > { %v731_v37 = vpop.f32.mrf.mxu0  ;;  %867 = vadd.xlane.f32.xlu1 %v866_v35  ;;  %870 = vadd.xlane.f32.xlu0 %v869_v36 }
 0x160   : > { %v4532_v38 = vadd.f32 %v4451_v53, %v731_v37  ;;  %6643 = vst [vmem:[#allocation38_spill] sm:$0xff] %v4535_v40  ;;  %v878_v47 = vsel %vm820_vm0, %v4535_v40, 0.0 }
 0x161   : > { %v3640_v39 = vpop.f32.mrf.mxu0 }
 0x162   : > { %6642 = vst [vmem:[#allocation37_spill] sm:$0xff] %v4532_v38  ;;  %v875_v42 = vsel %vm820_vm0, %v4532_v38, 0.0  ;;  %v4545_v46 = vadd.f32 %v3640_v39, %v4451_v53 }
 0x163   : > { %v741_v43 = vpop.f32.mrf.mxu0  ;;  %873 = vadd.xlane.f32.xlu1 %v872_v41  ;;  %876 = vadd.xlane.f32.xlu0 %v875_v42 }
 0x164   : > { %v4542_v44 = vadd.f32 %v4451_v53, %v741_v43  ;;  %6645 = vst [vmem:[#allocation40_spill] sm:$0xff] %v4545_v46  ;;  %v884_v54 = vsel %vm820_vm0, %v4545_v46, 0.0 }
 0x165   : > { %v3643_v45 = vpop.f32.mrf.mxu0 }
 0x166   : > { %6644 = vst [vmem:[#allocation39_spill] sm:$0xff] %v4542_v44  ;;  %v881_v48 = vsel %vm820_vm0, %v4542_v44, 0.0  ;;  %v4555_v52 = vadd.f32 %v3643_v45, %v4451_v53 }
 0x167   : > { %v751_v49 = vpop.f32.mrf.mxu0  ;;  %879 = vadd.xlane.f32.xlu1 %v878_v47  ;;  %882 = vadd.xlane.f32.xlu0 %v881_v48 }
 0x168   : > { %v4552_v50 = vadd.f32 %v4451_v53, %v751_v49  ;;  %6647 = vst [vmem:[#allocation42_spill] sm:$0xff] %v4555_v52  ;;  %v890_v0 = vsel %vm820_vm0, %v4555_v52, 0.0 }
 0x169   : > { %v3646_v51 = vpop.f32.mrf.mxu0 }
 0x16a   : > { %6646 = vst [vmem:[#allocation41_spill] sm:$0xff] %v4552_v50  ;;  %v887_v56 = vsel %vm820_vm0, %v4552_v50, 0.0  ;;  %v4565_v63 = vadd.f32 %v3646_v51, %v4451_v53 }
 0x16b   : > { %v761_v58 = vpop.f32.mrf.mxu0  ;;  %885 = vadd.xlane.f32.xlu1 %v884_v54  ;;  %888 = vadd.xlane.f32.xlu0 %v887_v56 }
 0x16c   : > { %v4562_v59 = vadd.f32 %v4451_v53, %v761_v58  ;;  %6649 = vst [vmem:[#allocation44_spill] sm:$0xff] %v4565_v63  ;;  %v896_v9 = vsel %vm820_vm0, %v4565_v63, 0.0 }
 0x16d   : > { %v3649_v61 = vpop.f32.mrf.mxu0 }
 0x16e   : > { %6648 = vst [vmem:[#allocation43_spill] sm:$0xff] %v4562_v59  ;;  %v893_v1 = vsel %vm820_vm0, %v4562_v59, 0.0  ;;  %v4575_v7 = vadd.f32 %v3649_v61, %v4451_v53 }
 0x16f   : > { %v771_v3 = vpop.f32.mrf.mxu0  ;;  %891 = vadd.xlane.f32.xlu1 %v890_v0  ;;  %894 = vadd.xlane.f32.xlu0 %v893_v1 }
 0x170   : > { %v4572_v5 = vadd.f32 %v4451_v53, %v771_v3  ;;  %6651 = vst [vmem:[#allocation46_spill] sm:$0xff] %v4575_v7  ;;  %v902_v18 = vsel %vm820_vm0, %v4575_v7, 0.0 }
 0x171   : > { %v3652_v6 = vpop.f32.mrf.mxu0 }
 0x172   : > { %6650 = vst [vmem:[#allocation45_spill] sm:$0xff] %v4572_v5  ;;  %v899_v11 = vsel %vm820_vm0, %v4572_v5, 0.0  ;;  %v4585_v17 = vadd.f32 %v3652_v6, %v4451_v53 }
 0x173   : > { %v781_v12 = vpop.f32.mrf.mxu0  ;;  %897 = vadd.xlane.f32.xlu1 %v896_v9  ;;  %900 = vadd.xlane.f32.xlu0 %v899_v11 }
 0x174   : > { %v4582_v13 = vadd.f32 %v4451_v53, %v781_v12  ;;  %6653 = vst [vmem:[#allocation48_spill] sm:$0xff] %v4585_v17  ;;  %v908_v27 = vsel %vm820_vm0, %v4585_v17, 0.0 }
 0x175   : > { %v3655_v15 = vpop.f32.mrf.mxu0 }
 0x176   : > { %6652 = vst [vmem:[#allocation47_spill] sm:$0xff] %v4582_v13  ;;  %v905_v19 = vsel %vm820_vm0, %v4582_v13, 0.0  ;;  %v4595_v25 = vadd.f32 %v3655_v15, %v4451_v53 }
 0x177   : > { %v791_v21 = vpop.f32.mrf.mxu0  ;;  %903 = vadd.xlane.f32.xlu1 %v902_v18  ;;  %906 = vadd.xlane.f32.xlu0 %v905_v19 }
 0x178   : > { %v4592_v23 = vadd.f32 %v4451_v53, %v791_v21  ;;  %6655 = vst [vmem:[#allocation50_spill] sm:$0xff] %v4595_v25  ;;  %v914_v35 = vsel %vm820_vm0, %v4595_v25, 0.0 }
 0x179   : > { %v3658_v24 = vpop.f32.mrf.mxu0 }
 0x17a   : > { %6654 = vst [vmem:[#allocation49_spill] sm:$0xff] %v4592_v23  ;;  %v911_v29 = vsel %vm820_vm0, %v4592_v23, 0.0  ;;  %v4605_v33 = vadd.f32 %v3658_v24, %v4451_v53 }
 0x17b   : > { %v801_v30 = vpop.f32.mrf.mxu0  ;;  %909 = vadd.xlane.f32.xlu1 %v908_v27  ;;  %912 = vadd.xlane.f32.xlu0 %v911_v29 }
 0x17c   : > { %v4602_v31 = vadd.f32 %v4451_v53, %v801_v30  ;;  %6657 = vst [vmem:[#allocation52_spill] sm:$0xff] %v4605_v33  ;;  %v920_v37 = vsel %vm820_vm0, %v4605_v33, 0.0 }
 0x17e   : > { %6656 = vst [vmem:[#allocation51_spill] sm:$0xff] %v4602_v31  ;;  %v917_v36 = vsel %vm820_vm0, %v4602_v31, 0.0 }
 0x17f   : > { %915 = vadd.xlane.f32.xlu1 %v914_v35  ;;  %918 = vadd.xlane.f32.xlu0 %v917_v36 }
 0x183   : > { %921 = vadd.xlane.f32.xlu1 %v920_v37 }
 0x1cc   : > { %v829_v39 = vpop.xlane.xlu0 %828 }
 0x1cd   : > { %v932_v41 = vmul.f32 0.015625, %v829_v39 }
 0x1cf   : > { %v4614_v42 = vsub.f32 %v4454_v55, %v932_v41 }
 0x1d0   : > { %v835_v43 = vpop.xlane.xlu1 %834  ;;  %v832_v53 = vpop.xlane.xlu0 %831 }
 0x1d1   : > { %v934_v45 = vmul.f32 0.015625, %v835_v43  ;;  %v933_v47 = vmul.f32 0.015625, %v832_v53  ;;  %v1004_v48 = vmul.f32 %v4614_v42, %v4614_v42 }
 0x1d3   : > { %v4619_v49 = vsub.f32 %v4462_v60, %v934_v45  ;;  %v4622_v51 = vsub.f32 %v4457_v57, %v933_v47  ;;  %v1044_v54 = vsel %vm820_vm0, %v1004_v48, 0.0 }
 0x1d4   : > { %v838_v56 = vpop.xlane.xlu1 %837  ;;  %1045 = vadd.xlane.f32.xlu0 %v1044_v54  ;;  %v841_v58 = vpop.xlane.xlu0 %840 }
 0x1d5   : > { %v935_v61 = vmul.f32 0.015625, %v838_v56  ;;  %v936_v0 = vmul.f32 0.015625, %v841_v58  ;;  %v1006_v1 = vmul.f32 %v4619_v49, %v4619_v49  ;;  %v1005_v3 = vmul.f32 %v4622_v51, %v4622_v51 }
 0x1d7   : > { %v4630_v6 = vsub.f32 %v4465_v62, %v935_v61  ;;  %v4633_v9 = vsub.f32 %v4472_v2, %v936_v0  ;;  %v1050_v11 = vsel %vm820_vm0, %v1006_v1, 0.0  ;;  %v1047_v12 = vsel %vm820_vm0, %v1005_v3, 0.0 }
 0x1d8   : > { %v844_v15 = vpop.xlane.xlu1 %843  ;;  %1051 = vadd.xlane.f32.xlu0 %v1050_v11  ;;  %1048 = vadd.xlane.f32.xlu1 %v1047_v12  ;;  %v847_v18 = vpop.xlane.xlu0 %846 }
 0x1d9   : > { %v937_v19 = vmul.f32 0.015625, %v844_v15  ;;  %v938_v21 = vmul.f32 0.015625, %v847_v18  ;;  %v1007_v24 = vmul.f32 %v4630_v6, %v4630_v6  ;;  %v1008_v27 = vmul.f32 %v4633_v9, %v4633_v9 }
 0x1db   : > { %v4642_v29 = vsub.f32 %v4475_v4, %v937_v19  ;;  %v4645_v30 = vsub.f32 %v4482_v8, %v938_v21  ;;  %v1053_v35 = vsel %vm820_vm0, %v1007_v24, 0.0  ;;  %v1056_v36 = vsel %vm820_vm0, %v1008_v27, 0.0 }
 0x1dc   : > { %v850_v37 = vpop.xlane.xlu1 %849  ;;  %1054 = vadd.xlane.f32.xlu1 %v1053_v35  ;;  %1057 = vadd.xlane.f32.xlu0 %v1056_v36  ;;  %v853_v39 = vpop.xlane.xlu0 %852 }
 0x1dd   : > { %v939_v41 = vmul.f32 0.015625, %v850_v37  ;;  %v940_v43 = vmul.f32 0.015625, %v853_v39  ;;  %v1009_v53 = vmul.f32 %v4642_v29, %v4642_v29  ;;  %v1010_v45 = vmul.f32 %v4645_v30, %v4645_v30 }
 0x1df   : > { %v4654_v47 = vsub.f32 %v4485_v10, %v939_v41  ;;  %v4657_v48 = vsub.f32 %v4492_v14, %v940_v43  ;;  %v1059_v54 = vsel %vm820_vm0, %v1009_v53, 0.0  ;;  %v1062_v56 = vsel %vm820_vm0, %v1010_v45, 0.0 }
 0x1e0   : > { %v856_v58 = vpop.xlane.xlu1 %855  ;;  %1060 = vadd.xlane.f32.xlu1 %v1059_v54  ;;  %1063 = vadd.xlane.f32.xlu0 %v1062_v56  ;;  %v859_v61 = vpop.xlane.xlu0 %858 }
 0x1e1   : > { %v941_v0 = vmul.f32 0.015625, %v856_v58  ;;  %v942_v1 = vmul.f32 0.015625, %v859_v61  ;;  %v1011_v3 = vmul.f32 %v4654_v47, %v4654_v47  ;;  %v1012_v11 = vmul.f32 %v4657_v48, %v4657_v48 }
 0x1e3   : > { %v4666_v12 = vsub.f32 %v4495_v16, %v941_v0  ;;  %v4669_v15 = vsub.f32 %v4502_v20, %v942_v1  ;;  %v1065_v18 = vsel %vm820_vm0, %v1011_v3, 0.0  ;;  %v1068_v19 = vsel %vm820_vm0, %v1012_v11, 0.0 }
 0x1e4   : > { %v862_v21 = vpop.xlane.xlu1 %861  ;;  %1066 = vadd.xlane.f32.xlu1 %v1065_v18  ;;  %1069 = vadd.xlane.f32.xlu0 %v1068_v19  ;;  %v865_v24 = vpop.xlane.xlu0 %864 }
 0x1e5   : > { %v943_v27 = vmul.f32 0.015625, %v862_v21  ;;  %v944_v35 = vmul.f32 0.015625, %v865_v24  ;;  %v1013_v36 = vmul.f32 %v4666_v12, %v4666_v12  ;;  %v1014_v37 = vmul.f32 %v4669_v15, %v4669_v15 }
 0x1e7   : > { %v4678_v39 = vsub.f32 %v4505_v22, %v943_v27  ;;  %v4681_v41 = vsub.f32 %v4512_v26, %v944_v35  ;;  %v1071_v43 = vsel %vm820_vm0, %v1013_v36, 0.0  ;;  %v1074_v53 = vsel %vm820_vm0, %v1014_v37, 0.0 }
 0x1e8   : > { %v868_v45 = vpop.xlane.xlu1 %867  ;;  %1072 = vadd.xlane.f32.xlu1 %v1071_v43  ;;  %1075 = vadd.xlane.f32.xlu0 %v1074_v53  ;;  %v871_v54 = vpop.xlane.xlu0 %870 }
 0x1e9   : > { %v945_v56 = vmul.f32 0.015625, %v868_v45  ;;  %v946_v58 = vmul.f32 0.015625, %v871_v54  ;;  %v1015_v61 = vmul.f32 %v4678_v39, %v4678_v39  ;;  %v1016_v0 = vmul.f32 %v4681_v41, %v4681_v41 }
 0x1eb   : > { %v4690_v1 = vsub.f32 %v4515_v28, %v945_v56  ;;  %v4693_v3 = vsub.f32 %v4522_v32, %v946_v58  ;;  %v1077_v11 = vsel %vm820_vm0, %v1015_v61, 0.0  ;;  %v1080_v18 = vsel %vm820_vm0, %v1016_v0, 0.0 }
 0x1ec   : > { %v874_v19 = vpop.xlane.xlu1 %873  ;;  %1078 = vadd.xlane.f32.xlu1 %v1077_v11  ;;  %1081 = vadd.xlane.f32.xlu0 %v1080_v18  ;;  %v877_v21 = vpop.xlane.xlu0 %876 }
 0x1ed   : > { %v947_v24 = vmul.f32 0.015625, %v874_v19  ;;  %v948_v27 = vmul.f32 0.015625, %v877_v21  ;;  %v1017_v35 = vmul.f32 %v4690_v1, %v4690_v1  ;;  %v1018_v36 = vmul.f32 %v4693_v3, %v4693_v3 }
 0x1ef   : > { %v4702_v37 = vsub.f32 %v4525_v34, %v947_v24  ;;  %v4705_v43 = vsub.f32 %v4532_v38, %v948_v27  ;;  %v1083_v53 = vsel %vm820_vm0, %v1017_v35, 0.0  ;;  %v1086_v45 = vsel %vm820_vm0, %v1018_v36, 0.0 }
 0x1f0   : > { %v880_v54 = vpop.xlane.xlu1 %879  ;;  %1084 = vadd.xlane.f32.xlu1 %v1083_v53  ;;  %1087 = vadd.xlane.f32.xlu0 %v1086_v45  ;;  %v883_v56 = vpop.xlane.xlu0 %882 }
 0x1f1   : > { %v949_v58 = vmul.f32 0.015625, %v880_v54  ;;  %v950_v61 = vmul.f32 0.015625, %v883_v56  ;;  %v1019_v0 = vmul.f32 %v4702_v37, %v4702_v37  ;;  %v1020_v11 = vmul.f32 %v4705_v43, %v4705_v43 }
 0x1f3   : > { %v4714_v18 = vsub.f32 %v4535_v40, %v949_v58  ;;  %v4717_v19 = vsub.f32 %v4542_v44, %v950_v61  ;;  %v1089_v21 = vsel %vm820_vm0, %v1019_v0, 0.0  ;;  %v1092_v24 = vsel %vm820_vm0, %v1020_v11, 0.0 }
 0x1f4   : > { %v886_v27 = vpop.xlane.xlu1 %885  ;;  %1090 = vadd.xlane.f32.xlu1 %v1089_v21  ;;  %1093 = vadd.xlane.f32.xlu0 %v1092_v24  ;;  %v889_v35 = vpop.xlane.xlu0 %888 }
 0x1f5   : > { %v951_v36 = vmul.f32 0.015625, %v886_v27  ;;  %v952_v53 = vmul.f32 0.015625, %v889_v35  ;;  %v1021_v45 = vmul.f32 %v4714_v18, %v4714_v18  ;;  %v1022_v54 = vmul.f32 %v4717_v19, %v4717_v19 }
 0x1f7   : > { %v4726_v56 = vsub.f32 %v4545_v46, %v951_v36  ;;  %v4729_v58 = vsub.f32 %v4552_v50, %v952_v53  ;;  %v1095_v61 = vsel %vm820_vm0, %v1021_v45, 0.0  ;;  %v1098_v0 = vsel %vm820_vm0, %v1022_v54, 0.0 }
 0x1f8   : > { %v892_v11 = vpop.xlane.xlu1 %891  ;;  %1096 = vadd.xlane.f32.xlu1 %v1095_v61  ;;  %1099 = vadd.xlane.f32.xlu0 %v1098_v0  ;;  %v895_v21 = vpop.xlane.xlu0 %894 }
 0x1f9   : > { %v953_v24 = vmul.f32 0.015625, %v892_v11  ;;  %v954_v27 = vmul.f32 0.015625, %v895_v21  ;;  %v1023_v35 = vmul.f32 %v4726_v56, %v4726_v56  ;;  %v1024_v36 = vmul.f32 %v4729_v58, %v4729_v58 }
 0x1fb   : > { %v4738_v46 = vsub.f32 %v4555_v52, %v953_v24  ;;  %v4741_v53 = vsub.f32 %v4562_v59, %v954_v27  ;;  %v1101_v45 = vsel %vm820_vm0, %v1023_v35, 0.0  ;;  %v1104_v54 = vsel %vm820_vm0, %v1024_v36, 0.0 }
 0x1fc   : > { %v898_v61 = vpop.xlane.xlu1 %897  ;;  %1102 = vadd.xlane.f32.xlu1 %v1101_v45  ;;  %1105 = vadd.xlane.f32.xlu0 %v1104_v54  ;;  %v901_v0 = vpop.xlane.xlu0 %900 }
 0x1fd   : > { %v955_v11 = vmul.f32 0.015625, %v898_v61  ;;  %v956_v21 = vmul.f32 0.015625, %v901_v0  ;;  %v1025_v50 = vmul.f32 %v4738_v46, %v4738_v46  ;;  %v1026_v24 = vmul.f32 %v4741_v53, %v4741_v53 }
 0x1ff   : > { %v4750_v52 = vsub.f32 %v4565_v63, %v955_v11  ;;  %v4753_v27 = vsub.f32 %v4572_v5, %v956_v21  ;;  %v1107_v35 = vsel %vm820_vm0, %v1025_v50, 0.0  ;;  %v1110_v36 = vsel %vm820_vm0, %v1026_v24, 0.0 }
 0x200   : > { %v904_v45 = vpop.xlane.xlu1 %903  ;;  %1108 = vadd.xlane.f32.xlu1 %v1107_v35  ;;  %1111 = vadd.xlane.f32.xlu0 %v1110_v36  ;;  %v907_v54 = vpop.xlane.xlu0 %906  ;;  %v2584_v35 = vld [vmem:[%s6518_s8 + $0x38] sm:$0xff] }
 0x201   : > { %6658 = vst [vmem:[#allocation53_spill] sm:$0xff] %v4750_v52  ;;  %6659 = vst [vmem:[#allocation54_spill] sm:$0xff] %v4753_v27  ;;  %v957_v61 = vmul.f32 0.015625, %v904_v45  ;;  %v958_v0 = vmul.f32 0.015625, %v907_v54  ;;  %v1027_v59 = vmul.f32 %v4750_v52, %v4750_v52  ;;  %v1028_v11 = vmul.f32 %v4753_v27, %v4753_v27  ;;  %3662 = vmatprep.subr.mxu1 %v2584_v35 }
 0x202   : > { %3663 = vmatpush3.msra.mxu1 %v2584_v35 }
 0x203   : > { %v4762_v63 = vsub.f32 %v4575_v7, %v957_v61  ;;  %v4765_v21 = vsub.f32 %v4582_v13, %v958_v0  ;;  %v1113_v50 = vsel %vm820_vm0, %v1027_v59, 0.0  ;;  %v1116_v24 = vsel %vm820_vm0, %v1028_v11, 0.0  ;;  %v2583_v59 = vld [vmem:[%s6518_s8 + $0x30] sm:$0xff] }
 0x204   : > { %v910_v36 = vpop.xlane.xlu1 %909  ;;  %1114 = vadd.xlane.f32.xlu1 %v1113_v50  ;;  %1117 = vadd.xlane.f32.xlu0 %v1116_v24  ;;  %v913_v45 = vpop.xlane.xlu0 %912 }
 0x205   : > { %6660 = vst [vmem:[#allocation55_spill] sm:$0xff] %v4762_v63  ;;  %6661 = vst [vmem:[#allocation56_spill] sm:$0xff] %v4765_v21  ;;  %v959_v54 = vmul.f32 0.015625, %v910_v36  ;;  %v960_v5 = vmul.f32 0.015625, %v913_v45  ;;  %v1029_v61 = vmul.f32 %v4762_v63, %v4762_v63  ;;  %v1030_v0 = vmul.f32 %v4765_v21, %v4765_v21  ;;  %3664 = vmatprep.subr.mxu1 %v2583_v59  ;;  %v2582_v45 = vld [vmem:[%s6518_s8 + $0x28] sm:$0xff] }
 0x206   : > { %3665 = vmatpush3.msra.mxu1 %v2583_v59  ;;  %v2580_v59 = vld [vmem:[%s6518_s8 + $0x18] sm:$0xff] }
 0x207   : > { %v4780_v11 = vsub.f32 %v4585_v17, %v959_v54  ;;  %v4783_v50 = vsub.f32 %v4592_v23, %v960_v5  ;;  %v1119_v24 = vsel %vm820_vm0, %v1029_v61, 0.0  ;;  %v1122_v36 = vsel %vm820_vm0, %v1030_v0, 0.0  ;;  %3666 = vmatprep.subr.mxu1 %v2582_v45  ;;  %v2581_v61 = vld [vmem:[%s6518_s8 + $0x20] sm:$0xff] }
 0x208   : > { %v916_v13 = vpop.xlane.xlu1 %915  ;;  %1120 = vadd.xlane.f32.xlu1 %v1119_v24  ;;  %1123 = vadd.xlane.f32.xlu0 %v1122_v36  ;;  %v919_v7 = vpop.xlane.xlu0 %918 }
 0x209   : > { %6662 = vst [vmem:[#allocation57_spill] sm:$0xff] %v4780_v11  ;;  %6663 = vst [vmem:[#allocation58_spill] sm:$0xff] %v4783_v50  ;;  %v961_v35 = vmul.f32 0.015625, %v916_v13  ;;  %v962_v44 = vmul.f32 0.015625, %v919_v7  ;;  %v1031_v54 = vmul.f32 %v4780_v11, %v4780_v11  ;;  %v1032_v5 = vmul.f32 %v4783_v50, %v4783_v50  ;;  %3667 = vmatpush3.msra.mxu1 %v2582_v45 }
 0x20a   : > { %3668 = vmatprep.subr.mxu1 %v2581_v61 }
 0x20b   : > { %v4798_v0 = vsub.f32 %v4595_v25, %v961_v35  ;;  %v4801_v24 = vsub.f32 %v4602_v31, %v962_v44  ;;  %v1125_v7 = vsel %vm820_vm0, %v1031_v54, 0.0  ;;  %v1128_v13 = vsel %vm820_vm0, %v1032_v5, 0.0  ;;  %3669 = vmatpush3.msra.mxu1 %v2581_v61 }
 0x20c   : > { %v922_v36 = vpop.xlane.xlu1 %921  ;;  %1126 = vadd.xlane.f32.xlu1 %v1125_v7  ;;  %1129 = vadd.xlane.f32.xlu0 %v1128_v13  ;;  %v2579_v7 = vld [vmem:[%s6518_s8 + $0x10] sm:$0xff] }
 0x20d   : > { %6664 = vst [vmem:[#allocation59_spill] sm:$0xff] %v4798_v0  ;;  %6665 = vst [vmem:[#allocation60_spill] sm:$0xff] %v4801_v24  ;;  %v963_v23 = vmul.f32 0.015625, %v922_v36  ;;  %v1033_v35 = vmul.f32 %v4798_v0, %v4798_v0  ;;  %v1034_v44 = vmul.f32 %v4801_v24, %v4801_v24  ;;  %3670 = vmatprep.subr.mxu1 %v2580_v59  ;;  %v2577_v36 = vld [vmem:[%s6518_s8] sm:$0xff] }
 0x20e   : > { %3671 = vmatpush3.msra.mxu1 %v2580_v59 }
 0x20f   : > { %v4813_v54 = vsub.f32 %v4605_v33, %v963_v23  ;;  %v1131_v45 = vsel %vm820_vm0, %v1033_v35, 0.0  ;;  %v1134_v5 = vsel %vm820_vm0, %v1034_v44, 0.0  ;;  %v2578_v23 = vld [vmem:[%s6518_s8 + $0x8] sm:$0xff]  ;;  %3672 = vmatprep.subr.mxu1 %v2579_v7  ;;  %v1376_v35 = vlaneseq }
 0x210   : > { %1132 = vadd.xlane.f32.xlu1 %v1131_v45  ;;  %1135 = vadd.xlane.f32.xlu0 %v1134_v5 }
 0x211   : > { %6666 = vst [vmem:[#allocation61_spill] sm:$0xff] %v4813_v54  ;;  %v1035_v13 = vmul.f32 %v4813_v54, %v4813_v54  ;;  %3673 = vmatpush3.msra.mxu1 %v2579_v7  ;;  %v4829_v44 = vshrl.u32 %v1376_v35, 7 }
 0x212   : > { %3674 = vmatprep.subr.mxu1 %v2578_v23 }
 0x213   : > { %v1137_v61 = vsel %vm820_vm0, %v1035_v13, 0.0  ;;  %3675 = vmatpush3.msra.mxu1 %v2578_v23  ;;  %v1637_v59 = vand.u32 15, %v4829_v44  ;;  %v1822_v33 = vsub.s32 0, %v4829_v44  ;;  %v4141_v13 = vmov 0.0  }
 0x214   : > { %1138 = vadd.xlane.f32.xlu1 %v1137_v61  ;;  %3676 = vmatprep.subr.mxu1 %v2577_v36  ;;  %v4833_v7 = vrot.slane %v4141_v13, 7  ;;  %v4836_v23 = vadd.s32 16, %v4829_v44  ;;  %v4839_v31 = vadd.s32 32, %v4829_v44  ;;  %v4849_v17 = vadd.s32 64, %v4829_v44 }
 0x215   : > { %3677 = vmatpush3.msra.mxu1 %v2577_v36  ;;  %vm4841_vm1 = vcmp.ge.s32.totalorder %v1637_v59, 1  ;;  %v1858_v32 = vsub.s32 3, %v4829_v44  ;;  %v1994_v28 = vsub.s32 1, %v4829_v44  ;;  %v2062_v36 = vsub.s32 4, %v4829_v44 }
 0x216   : > { %6667 = vst [vmem:[#allocation62_spill] sm:$0xff] %v4833_v7  ;;  %v1784_v59 = vsel %vm4841_vm1, %v4833_v7, 0.0  ;;  %v2130_v20 = vsub.s32 7, %v4829_v44  ;;  %v2411_v0 = vsub.s32 5, %v4829_v44  ;;  %v4899_v62 = vrot.slane %v4141_v13, 1 }
 0x217   : > { %v4912_v13 = vadd.s32 80, %v4829_v44  ;;  %v4918_v2 = vadd.s32 88, %v4829_v44  ;;  %v4941_v52 = vadd.s32 112, %v4829_v44  ;;  %vm1711_vm2 = vcmp.lt.s32.totalorder %v4829_v44, 1 }
 0x218   : > { %6671 = vst [vmem:[#allocation64_spill] sm:$0xff] %v4899_v62  ;;  %vm2232_vm7 = vcmp.lt.s32.totalorder %v4829_v44, 7 }
 0x219   : > { %6675 = vst [vmem:[#allocation68_spill] sm:$0xff] %v4912_v13  ;;  %6677 = vst [vmem:[#allocation70_spill] sm:$0xff] %v4918_v2 }
 0x21a   : > { %6681 = vst [vmem:[#allocation74_spill] sm:$0xff] %v4941_v52 }
 0x25d   : > { %v1046_v45 = vpop.xlane.xlu0 %1045 }
 0x25e   : > { %v1148_v5 = vmul.f32 0.015625, %v1046_v45  ;;  %v4846_v45 = vadd.s32 48, %v4829_v44 }
 0x260   : > { %v1184_v61 = vadd.f32 1e-06, %v1148_v5  ;;  %v1673_v5 = vld [vmem:[%s6517_s7] sm:$0xff] }
 0x261   : > { %v1049_v35 = vpop.xlane.xlu1 %1048  ;;  %v1052_v25 = vpop.xlane.xlu0 %1051  ;;  %v4854_v34 = vrot.slane %v1673_v5, %v1822_v33  ;;  %v4872_v16 = vrot.slane %v1673_v5, %v1994_v28  ;;  %v2343_v28 = vsub.s32 2, %v4829_v44  ;;  %v4893_v24 = vrot.slane %v1673_v5, %v2130_v20 }
 0x262   : > { %3803 = vrsqrt.f32 %v1184_v61  ;;  %v1149_v40 = vmul.f32 0.015625, %v1049_v35  ;;  %v1150_v38 = vmul.f32 0.015625, %v1052_v25  ;;  %v1926_v35 = vsub.s32 6, %v4829_v44 }
 0x263   : > { %v4877_v33 = vmul.f32 %v4854_v34, %v4833_v7  ;;  %v4891_v4 = vmul.f32 0.0, %v4872_v16  ;;  %v4909_v20 = vadd.s32 72, %v4829_v44  ;;  %v4914_v11 = vrot.slane %v1673_v5, %v2411_v0 }
 0x264   : > { %v1185_v26 = vadd.f32 1e-06, %v1149_v40  ;;  %v1186_v22 = vadd.f32 1e-06, %v1150_v38  ;;  %v4868_v40 = vmul.f32 %v4854_v34, %v1784_v59  ;;  %v4870_v38 = vrot.slane %v1673_v5, %v1858_v32 }
 0x265   : > { %v1055_v14 = vpop.xlane.xlu1 %1054  ;;  %v1058_v61 = vpop.xlane.xlu0 %1057  ;;  %v4882_v59 = vrot.slane %v1673_v5, %v1926_v35  ;;  %v4888_v32 = vadd.s32 24, %v4829_v44  ;;  %v4897_v35 = vadd.s32 40, %v4829_v44  ;;  %6674 = vst [vmem:[#allocation67_spill] sm:$0xff] %v4909_v20  ;;  %6676 = vst [vmem:[#allocation69_spill] sm:$0xff] %v4914_v11 }
 0x266   : > { %3805 = vrsqrt.f32 %v1185_v26  ;;  %v1151_v54 = vmul.f32 0.015625, %v1055_v14  ;;  %v1152_v10 = vmul.f32 0.015625, %v1058_v61  ;;  %v4880_v26 = vadd.s32 8, %v4829_v44 }
 0x267   : > { %3807 = vrsqrt.f32 %v1186_v22  ;;  %v4884_v22 = vrot.slane %v1673_v5, %v2062_v36  ;;  %6670 = vst [vmem:[#allocation63_spill] sm:$0xff] %v4897_v35 }
 0x268   : > { %v1187_v25 = vadd.f32 1e-06, %v1151_v54  ;;  %v1188_v8 = vadd.f32 1e-06, %v1152_v10 }
 0x269   : > { %v1061_v14 = vpop.xlane.xlu1 %1060  ;;  %v1064_v61 = vpop.xlane.xlu0 %1063 }
 0x26a   : > { %3809 = vrsqrt.f32 %v1187_v25  ;;  %v1153_v10 = vmul.f32 0.015625, %v1061_v14  ;;  %v1154_v54 = vmul.f32 0.015625, %v1064_v61  ;;  %v4902_v61 = vrot.slane %v1673_v5, %v2343_v28 }
 0x26b   : > { %3811 = vrsqrt.f32 %v1188_v8  ;;  %v4906_v8 = vadd.s32 56, %v4829_v44 }
 0x26c   : > { %v1189_v36 = vadd.f32 1e-06, %v1153_v10  ;;  %v1190_v50 = vadd.f32 1e-06, %v1154_v54  ;;  %6672 = vst [vmem:[#allocation65_spill] sm:$0xff] %v4902_v61  ;;  %v4931_v5 = vmul.f32 %v4902_v61, %v4899_v62  ;;  %v4944_v62 = vadd.s32 120, %v4829_v44 }
 0x26d   : > { %v1067_v25 = vpop.xlane.xlu1 %1066  ;;  %v1070_v14 = vpop.xlane.xlu0 %1069  ;;  %6673 = vst [vmem:[#allocation66_spill] sm:$0xff] %v4906_v8 }
 0x26e   : > { %3813 = vrsqrt.f32 %v1189_v36  ;;  %v1155_v21 = vmul.f32 0.015625, %v1067_v25  ;;  %v1156_v10 = vmul.f32 0.015625, %v1070_v14  ;;  %v4922_v36 = vadd.s32 96, %v4829_v44  ;;  %v4927_v25 = vld [vmem:[%s6515_s5] ss:$0 sm:$0xff]  ;;  %6679 = vst [vmem:[#allocation72_spill] sm:$0xff] %v4931_v5 }
 0x26f   : > { %v3804_v54 = vpop.eup %3803  ;;  %3815 = vrsqrt.f32 %v1190_v50  ;;  %6682 = vst [vmem:[#allocation75_spill] sm:$0xff] %v4944_v62 }
 0x270   : > { %v1256_v63 = vmul.f32 %v3804_v54, %v4614_v42  ;;  %v1191_v57 = vadd.f32 1e-06, %v1155_v21  ;;  %v1192_v60 = vadd.f32 1e-06, %v1156_v10  ;;  %6678 = vst [vmem:[#allocation71_spill] sm:$0xff] %v4922_v36  ;;  %v4936_v21 = vadd.s32 104, %v4829_v44 }
 0x271   : > { %v1073_v50 = vpop.xlane.xlu1 %1072  ;;  %v1076_v0 = vpop.xlane.xlu0 %1075 }
 0x272   : > { %6680 = vst [vmem:[#allocation73_spill] sm:$0xff] %v4936_v21  ;;  %3817 = vrsqrt.f32 %v1191_v57  ;;  %v1157_v10 = vmul.f32 0.015625, %v1073_v50  ;;  %v1158_v54 = vmul.f32 0.015625, %v1076_v0  ;;  %v1299_v42 = vmul.f32 %v4927_v25, %v1256_v63  ;;  %v4951_v50 = vld [vmem:[%s6516_s6] ss:$0 sm:$0xff] }
 0x273   : > { %v3806_v27 = vpop.eup %3805  ;;  %3819 = vrsqrt.f32 %v1192_v60  ;;  %v4958_v63 = vadd.s32 128, %v4829_v44  ;;  %v4961_v57 = vadd.s32 136, %v4829_v44 }
 0x274   : > { %v3808_v14 = vpop.eup %3807  ;;  %v1193_v20 = vadd.f32 1e-06, %v1157_v10  ;;  %v1194_v8 = vadd.f32 1e-06, %v1158_v54  ;;  %v1257_v60 = vmul.f32 %v3806_v27, %v4622_v51  ;;  %v4966_v27 = vadd.s32 144, %v4829_v44 }
 0x275   : > { %v1258_v0 = vmul.f32 %v3808_v14, %v4619_v49  ;;  %v1079_v55 = vpop.xlane.xlu1 %1078  ;;  %v1082_v28 = vpop.xlane.xlu0 %1081  ;;  %6683 = vst [vmem:[#allocation76_spill] sm:$0xff] %v4958_v63  ;;  %6684 = vst [vmem:[#allocation77_spill] sm:$0xff] %v4961_v57  ;;  %v4969_v2 = vadd.f32 %v4951_v50, %v1299_v42 }
 0x276   : > { %3821 = vrsqrt.f32 %v1193_v20  ;;  %v1159_v10 = vmul.f32 0.015625, %v1079_v55  ;;  %v1160_v54 = vmul.f32 0.015625, %v1082_v28  ;;  %6685 = vst [vmem:[#allocation78_spill] sm:$0xff] %v4966_v27  ;;  %v1300_v21 = vmul.f32 %v4927_v25, %v1257_v60 }
 0x277   : > { %v3810_v36 = vpop.eup %3809  ;;  %3823 = vrsqrt.f32 %v1194_v8  ;;  %v1301_v13 = vmul.f32 %v4927_v25, %v1258_v0 }
 0x278   : > { %v3812_v14 = vpop.eup %3811  ;;  %v1259_v20 = vmul.f32 %v3810_v36, %v4630_v6  ;;  %v1195_v55 = vadd.f32 1e-06, %v1159_v10  ;;  %v1196_v28 = vadd.f32 1e-06, %v1160_v54 }
 0x279   : > { %v1260_v8 = vmul.f32 %v3812_v14, %v4633_v9  ;;  %v1085_v51 = vpop.xlane.xlu1 %1084  ;;  %v1088_v52 = vpop.xlane.xlu0 %1087  ;;  %v1677_v14 = vrot.slane %v4969_v2, 7 }
 0x27a   : > { %3825 = vrsqrt.f32 %v1195_v55  ;;  %v1161_v62 = vmul.f32 0.015625, %v1085_v51  ;;  %v1162_v61 = vmul.f32 0.015625, %v1088_v52  ;;  %v1302_v6 = vmul.f32 %v4927_v25, %v1259_v20 }
 0x27b   : > { %v3814_v11 = vpop.eup %3813  ;;  %v1303_v36 = vmul.f32 %v4927_v25, %v1260_v8  ;;  %3827 = vrsqrt.f32 %v1196_v28  ;;  %v4983_v51 = vadd.f32 %v4951_v50, %v1300_v21  ;;  %v4986_v52 = vadd.f32 %v4951_v50, %v1301_v13 }
 0x27c   : > { %v3816_v0 = vpop.eup %3815  ;;  %v1261_v9 = vmul.f32 %v3814_v11, %v4642_v29  ;;  %v1197_v10 = vadd.f32 1e-06, %v1161_v62  ;;  %v1198_v54 = vadd.f32 1e-06, %v1162_v61  ;;  %v4991_v28 = vmul.f32 %v4872_v16, %v4969_v2 }
 0x27d   : > { %v1262_v20 = vmul.f32 %v3816_v0, %v4645_v30  ;;  %v1091_v55 = vpop.xlane.xlu1 %1090  ;;  %v1094_v8 = vpop.xlane.xlu0 %1093  ;;  %v4995_v21 = vadd.f32 %v4951_v50, %v1302_v6  ;;  %v4998_v13 = vadd.f32 %v4951_v50, %v1303_v36  ;;  %v6687_v0 = vand.u32 15, %v4836_v23 }
 0x27e   : > { %v1304_v29 = vmul.f32 %v4927_v25, %v1261_v9  ;;  %3829 = vrsqrt.f32 %v1197_v10  ;;  %v1163_v62 = vmul.f32 0.015625, %v1091_v55  ;;  %v1164_v11 = vmul.f32 0.015625, %v1094_v8 }
 0x27f   : > { %v3818_v61 = vpop.eup %3817  ;;  %6686 = vst [vmem:[#allocation79_spill] sm:$0xff] %v4995_v21  ;;  %v1305_v30 = vmul.f32 %v4927_v25, %v1262_v20  ;;  %3831 = vrsqrt.f32 %v1198_v54  ;;  %vm5003_vm3 = vcmp.ge.s32.totalorder %v6687_v0, 1  ;;  %v1745_v6 = vsel %vm1711_vm2, %v4833_v7, %v1677_v14 }
 0x280   : > { %v3820_v9 = vpop.eup %3819  ;;  %v1263_v10 = vmul.f32 %v3818_v61, %v4654_v47  ;;  %v1199_v55 = vadd.f32 1e-06, %v1163_v62  ;;  %v1200_v8 = vadd.f32 1e-06, %v1164_v11  ;;  %v6690_v36 = vand.u32 15, %v4839_v31 }
 0x281   : > { %v6693_v23 = vand.u32 15, %v4846_v45  ;;  %v5024_v47 = vadd.f32 %v4951_v50, %v1304_v29  ;;  %v5027_v62 = vadd.f32 %v4951_v50, %v1305_v30  ;;  %v1264_v11 = vmul.f32 %v3820_v9, %v4657_v48  ;;  %v1097_v61 = vpop.xlane.xlu1 %1096  ;;  %v1100_v31 = vpop.xlane.xlu0 %1099 }
 0x282   : > { %vm5013_vm4 = vcmp.ge.s32.totalorder %v6690_v36, 1  ;;  %v1678_v0 = vrot.slane %v4983_v51, 7  ;;  %3833 = vrsqrt.f32 %v1199_v55  ;;  %v1165_v36 = vmul.f32 0.015625, %v1097_v61 }
 0x283   : > { %vm5019_vm5 = vcmp.ge.s32.totalorder %v6693_v23, 1  ;;  %v1166_v60 = vmul.f32 0.015625, %v1100_v31  ;;  %v1679_v45 = vrot.slane %v4986_v52, 7  ;;  %v6696_v23 = vand.u32 15, %v4849_v17  ;;  %v3822_v29 = vpop.eup %3821 }
 0x284   : > { %3835 = vrsqrt.f32 %v1200_v8  ;;  %v1680_v30 = vrot.slane %v4995_v21, 7  ;;  %v5042_v9 = vmul.f32 %v4884_v22, %v4969_v2  ;;  %v3824_v55 = vpop.eup %3823  ;;  %v1306_v61 = vmul.f32 %v4927_v25, %v1263_v10 }
 0x285   : > { %vm5034_vm6 = vcmp.ge.s32.totalorder %v6696_v23, 1  ;;  %v1265_v31 = vmul.f32 %v3822_v29, %v4666_v12  ;;  %v1201_v17 = vadd.f32 1e-06, %v1165_v36  ;;  %v1202_v23 = vadd.f32 1e-06, %v1166_v60  ;;  %v1103_v8 = vpop.xlane.xlu1 %1102  ;;  %v1106_v27 = vpop.xlane.xlu0 %1105 }
 0x286   : > { %v1307_v7 = vmul.f32 %v4927_v25, %v1264_v11  ;;  %v1266_v57 = vmul.f32 %v3824_v55, %v4669_v15  ;;  %v6598_v63 = vrot.slane %v5024_v47, 7  ;;  %v6597_v48 = vrot.slane %v5027_v62, 7 }
 0x287   : > { %3837 = vrsqrt.f32 %v1201_v17  ;;  %v1167_v5 = vmul.f32 0.015625, %v1103_v8  ;;  %v1168_v21 = vmul.f32 0.015625, %v1106_v27  ;;  %v1743_v10 = vsel %vm1711_vm2, %v1678_v0, %v1679_v45  ;;  %v3826_v35 = vpop.eup %3825 }
 0x288   : > { %3839 = vrsqrt.f32 %v1202_v23  ;;  %v6699_v12 = vrot.slane %v4998_v13, 7  ;;  %v5058_v15 = vsel %vm1711_vm2, %v1679_v45, %v1680_v30  ;;  %v5062_v11 = vsel %vm1711_vm2, %v1677_v14, %v1678_v0  ;;  %v3828_v36 = vpop.eup %3827 }
 0x289   : > { %v1308_v27 = vmul.f32 %v4927_v25, %v1265_v31  ;;  %v1309_v29 = vmul.f32 %v4927_v25, %v1266_v57  ;;  %v1203_v55 = vadd.f32 1e-06, %v1167_v5  ;;  %v1204_v17 = vadd.f32 1e-06, %v1168_v21 }
 0x28a   : > { %v1741_v60 = vsel %vm1711_vm2, %v1680_v30, %v6699_v12  ;;  %v5067_v23 = vadd.f32 %v4951_v50, %v1306_v61  ;;  %v5070_v8 = vadd.f32 %v4951_v50, %v1307_v7  ;;  %v1267_v45 = vmul.f32 %v3826_v35, %v4678_v39  ;;  %v1109_v30 = vpop.xlane.xlu1 %1108  ;;  %v1112_v12 = vpop.xlane.xlu0 %1111 }
 0x28b   : > { %v1739_v14 = vsel %vm1711_vm2, %v6598_v63, %v6597_v48  ;;  %3841 = vrsqrt.f32 %v1203_v55  ;;  %v1169_v5 = vmul.f32 0.015625, %v1109_v30  ;;  %v1170_v57 = vmul.f32 0.015625, %v1112_v12  ;;  %v3830_v0 = vpop.eup %3829 }
 0x28c   : > { %v1786_v21 = vsel %vm5003_vm3, %v1745_v6, 0.0  ;;  %v1268_v7 = vmul.f32 %v3828_v36, %v4681_v41  ;;  %3843 = vrsqrt.f32 %v1204_v17  ;;  %v1788_v39 = vsel %vm5013_vm4, %v1743_v10, 0.0  ;;  %v3832_v61 = vpop.eup %3831 }
 0x28d   : > { %v5086_v35 = vsel %vm5019_vm5, %v1741_v60, 0.0  ;;  %v5089_v31 = vadd.f32 %v4951_v50, %v1308_v27  ;;  %v5092_v55 = vadd.f32 %v4951_v50, %v1309_v29  ;;  %v1205_v42 = vadd.f32 1e-06, %v1169_v5 }
 0x28e   : > { %v1206_v6 = vadd.f32 1e-06, %v1170_v57  ;;  %v1310_v30 = vmul.f32 %v4927_v25, %v1267_v45  ;;  %v1269_v41 = vmul.f32 %v3830_v0, %v4690_v1  ;;  %v1115_v36 = vpop.xlane.xlu1 %1114  ;;  %v1118_v20 = vpop.xlane.xlu0 %1117  ;;  %v5098_v54 = vsel %vm5034_vm6, %v1739_v14, 0.0 }
 0x28f   : > { %v1860_v10 = vmul.f32 %v4870_v38, %v1786_v21  ;;  %v1270_v60 = vmul.f32 %v3832_v61, %v4693_v3  ;;  %3845 = vrsqrt.f32 %v1205_v42  ;;  %v1171_v27 = vmul.f32 0.015625, %v1115_v36  ;;  %v3834_v17 = vpop.eup %3833 }
 0x290   : > { %v1172_v29 = vmul.f32 0.015625, %v1118_v20  ;;  %v1311_v12 = vmul.f32 %v4927_v25, %v1268_v7  ;;  %3847 = vrsqrt.f32 %v1206_v6  ;;  %v1826_v45 = vmul.f32 %v4854_v34, %v1786_v21 }
 0x291   : > { %v1862_v1 = vmul.f32 %v4870_v38, %v1788_v39  ;;  %v3836_v5 = vpop.eup %3835  ;;  %v1271_v49 = vmul.f32 %v3834_v17, %v4702_v37  ;;  %v1207_v14 = vadd.f32 1e-06, %v1171_v27  ;;  %v1828_v57 = vmul.f32 %v4854_v34, %v1788_v39 }
 0x292   : > { %v1864_v3 = vmul.f32 %v4870_v38, %v5086_v35  ;;  %v5110_v0 = vadd.f32 %v4951_v50, %v1310_v30  ;;  %v1312_v61 = vmul.f32 %v4927_v25, %v1269_v41  ;;  %v1272_v7 = vmul.f32 %v3836_v5, %v4705_v43 }
 0x293   : > { %v1861_v21 = vmul.f32 %v4870_v38, %v5062_v11  ;;  %v1313_v42 = vmul.f32 %v4927_v25, %v1270_v60  ;;  %v1208_v6 = vadd.f32 1e-06, %v1172_v29  ;;  %v1892_v37 = vadd.f32 %v1860_v10, %v4868_v40 }
 0x294   : > { %v1928_v36 = vmul.f32 %v4882_v59, %v1788_v39  ;;  %v3838_v20 = vpop.eup %3837  ;;  %3849 = vrsqrt.f32 %v1207_v14  ;;  %v1894_v27 = vadd.f32 %v1862_v1, %v1826_v45  ;;  %v1929_v30 = vmul.f32 %v4882_v59, %v5058_v15 }
 0x295   : > { %v1930_v41 = vmul.f32 %v4882_v59, %v5086_v35  ;;  %v3840_v43 = vpop.eup %3839  ;;  %v1314_v17 = vmul.f32 %v4927_v25, %v1271_v49  ;;  %v1896_v5 = vadd.f32 %v1864_v3, %v1828_v57  ;;  %v1932_v60 = vmul.f32 %v4882_v59, %v5098_v54 }
 0x296   : > { %v1960_v29 = vadd.f32 %v1928_v36, %v1892_v37  ;;  %v5127_v40 = vadd.f32 %v4951_v50, %v1311_v12  ;;  %v1315_v39 = vmul.f32 %v4927_v25, %v1272_v7  ;;  %v1893_v10 = vadd.f32 %v1861_v21, %v4877_v33 }
 0x297   : > { %v1962_v45 = vadd.f32 %v1930_v41, %v1894_v27  ;;  %v1273_v1 = vmul.f32 %v3838_v20, %v4714_v18  ;;  %v1274_v14 = vmul.f32 %v3840_v43, %v4717_v19  ;;  %v1964_v49 = vadd.f32 %v1932_v60, %v1896_v5 }
 0x298   : > { %v2028_v57 = vadd.f32 %v4891_v4, %v1960_v29  ;;  %v3842_v3 = vpop.eup %3841  ;;  %v5136_v37 = vadd.f32 %v4951_v50, %v1312_v61  ;;  %v1961_v12 = vadd.f32 %v1929_v30, %v1893_v10  ;;  %v2000_v7 = vmul.f32 %v4872_v16, %v4986_v52 }
 0x299   : > { %v2030_v33 = vadd.f32 %v4991_v28, %v1962_v45  ;;  %v3844_v21 = vpop.eup %3843  ;;  %v5142_v36 = vadd.f32 %v4951_v50, %v1313_v42  ;;  %v5145_v18 = vadd.f32 %v4951_v50, %v1314_v17  ;;  %v1275_v19 = vmul.f32 %v3842_v3, %v4726_v56  ;;  %v1121_v45 = vpop.xlane.xlu1 %1120 }
 0x29a   : > { %3851 = vrsqrt.f32 %v1208_v6  ;;  %v1276_v20 = vmul.f32 %v3844_v21, %v4729_v58  ;;  %v2032_v61 = vadd.f32 %v2000_v7, %v1964_v49  ;;  %v2066_v27 = vmul.f32 %v4884_v22, %v4986_v52  ;;  %v6710_v21 = vld [vmem:[#allocation79_spill] sm:$0xff] }
 0x29b   : > { %v2096_v30 = vadd.f32 %v5042_v9, %v2028_v57  ;;  %v5153_v28 = vadd.f32 %v4951_v50, %v1315_v39  ;;  %v1316_v42 = vmul.f32 %v4927_v25, %v1273_v1  ;;  %v1317_v41 = vmul.f32 %v4927_v25, %v1274_v14 }
 0x29c   : > { %v2132_v43 = vmul.f32 %v4893_v24, %v4986_v52  ;;  %v3846_v56 = vpop.eup %3845  ;;  %v2029_v6 = vadd.f32 %v4891_v4, %v1961_v12  ;;  %v2068_v58 = vmul.f32 %v4884_v22, %v4998_v13  ;;  %v2098_v17 = vadd.f32 %v2066_v27, %v2030_v33  ;;  %v1124_v12 = vpop.xlane.xlu0 %1123  ;;  %v6711_v27 = vld [vmem:[#allocation72_spill] sm:$0xff] }
 0x29d   : > { %v2199_v5 = vrot.slane %v4983_v51, 1  ;;  %v3848_v9 = vpop.eup %3847  ;;  %v1318_v60 = vmul.f32 %v4927_v25, %v1275_v19  ;;  %v1277_v29 = vmul.f32 %v3846_v56, %v4738_v46  ;;  %v2198_v10 = vrot.slane %v4969_v2, 1 }
 0x29e   : > { %v2164_v39 = vadd.f32 %v2132_v43, %v2096_v30  ;;  %v6700_v1 = vand.u32 15, %v4880_v26  ;;  %v6703_v4 = vand.u32 15, %v4888_v32  ;;  %v1319_v57 = vmul.f32 %v4927_v25, %v1276_v20  ;;  %v6706_v26 = vld [vmem:[#allocation63_spill] sm:$0xff]  ;;  %v5200_v43 = vld [vmem:[%s6517_s7 + $0x8] ss:$0 sm:$0xff] }
 0x29f   : > { %v1278_v46 = vmul.f32 %v3848_v9, %v4741_v53  ;;  %v2100_v3 = vadd.f32 %v2068_v58, %v2032_v61  ;;  %v2134_v2 = vmul.f32 %v4893_v24, %v4998_v13  ;;  %v6707_v7 = vand.u32 15, %v6706_v26 }
 0x2a0   : > { %vm5168_vm8 = vcmp.lt.s32.totalorder %v6700_v1, 15  ;;  %vm5174_vm9 = vcmp.lt.s32.totalorder %v6703_v4, 15  ;;  %v2200_v32 = vrot.slane %v4986_v52, 1  ;;  %v2201_v19 = vrot.slane %v6710_v21, 1 }
 0x2a1   : > { %vm5184_vm10 = vcmp.lt.s32.totalorder %v6707_v7, 15  ;;  %v2265_v20 = vsel %vm2232_vm7, %v2198_v10, %v2199_v5  ;;  %v2377_v53 = vadd.f32 %v6711_v27, %v2164_v39  ;;  %v5194_v61 = vadd.f32 %v4951_v50, %v1316_v42  ;;  %v3850_v58 = vpop.eup %3849  ;;  %v6713_v39 = vld [vmem:[#allocation69_spill] sm:$0xff] }
 0x2a2   : > { %v1320_v30 = vmul.f32 %v4927_v25, %v1277_v29  ;;  %v2136_v52 = vmul.f32 %v4893_v24, %v5027_v62  ;;  %v1173_v56 = vmul.f32 0.015625, %v1121_v45  ;;  %v2166_v9 = vadd.f32 %v2134_v2, %v2098_v17  ;;  %v6717_v17 = vld [vmem:[#allocation65_spill] sm:$0xff] }
 0x2a3   : > { %6712 = vst [vmem:[#allocation63_spill] sm:$0xff] %v5194_v61  ;;  %v2263_v1 = vsel %vm2232_vm7, %v2200_v32, %v2201_v19  ;;  %v2413_v4 = vmul.f32 %v6713_v39, %v2265_v20  ;;  %v1174_v42 = vmul.f32 0.015625, %v1124_v12  ;;  %v5208_v26 = vadd.f32 %v4951_v50, %v1317_v41  ;;  %v6719_v41 = vld [vmem:[#allocation53_spill] sm:$0xff] }
 0x2a4   : > { %v5211_v29 = vadd.f32 %v4951_v50, %v1318_v60  ;;  %v5214_v7 = vadd.f32 %v4951_v50, %v1319_v57  ;;  %v2168_v27 = vadd.f32 %v2136_v52, %v2100_v3  ;;  %v5217_v45 = vmul.f32 %v4927_v25, %v1278_v46  ;;  %v6720_v52 = vld [vmem:[#allocation21_spill] sm:$0xff] }
 0x2a5   : > { %6714 = vst [vmem:[#allocation79_spill] sm:$0xff] %v5208_v26  ;;  %v2347_v2 = vmul.f32 %v6717_v17, %v2265_v20  ;;  %v2445_v48 = vadd.f32 %v2413_v4, %v2377_v53  ;;  %v2481_v63 = vmul.f32 %v5200_v43, %v2263_v1  ;;  %v5222_v12 = vadd.f32 %v4951_v50, %v1320_v30 }
 0x2a6   : > { %6715 = vst [vmem:[#allocation72_spill] sm:$0xff] %v5211_v29  ;;  %6716 = vst [vmem:[#allocation69_spill] sm:$0xff] %v5214_v7  ;;  %v1279_v26 = vmul.f32 %v3850_v58, %v6719_v41  ;;  %v1209_v61 = vadd.f32 1e-06, %v1173_v56  ;;  %v1210_v60 = vadd.f32 1e-06, %v1174_v42  ;;  %v2415_v57 = vmul.f32 %v6713_v39, %v2263_v1 }
 0x2a7   : > { %6718 = vst [vmem:[#allocation65_spill] sm:$0xff] %v5222_v12  ;;  %v2379_v29 = vadd.f32 %v2347_v2, %v2166_v9  ;;  %v2513_v7 = vadd.f32 %v2481_v63, %v2445_v48  ;;  %v2065_v46 = vmul.f32 %v4884_v22, %v4983_v51  ;;  %v3852_v3 = vpop.eup %3851  ;;  %v2133_v20 = vmul.f32 %v4893_v24, %v6710_v21  ;;  %v6721_v9 = vld [vmem:[#allocation64_spill] sm:$0xff]  ;;  %v1127_v48 = vpop.xlane.xlu1 %1126  ;;  %v6729_v12 = vld [vmem:[#allocation23_spill] sm:$0xff] }
 0x2a8   : > { %3853 = vrsqrt.f32 %v1209_v61  ;;  %v2202_v53 = vrot.slane %v4998_v13, 1  ;;  %v2264_v30 = vsel %vm2232_vm7, %v2199_v5, %v2200_v32  ;;  %v2266_v63 = vsel %vm2232_vm7, %v6721_v9, %v2198_v10  ;;  %v1130_v32 = vpop.xlane.xlu0 %1129 }
 0x2a9   : > { %v2545_v56 = vadd.f32 %v2513_v7, %v6720_v52  ;;  %3855 = vrsqrt.f32 %v1210_v60  ;;  %v2097_v58 = vadd.f32 %v2065_v46, %v2029_v6  ;;  %v2306_v4 = vsel %vm5168_vm8, %v2266_v63, 0.0  ;;  %v6722_v60 = vld [vmem:[#allocation66_spill] sm:$0xff] }
 0x2aa   : > { %v2262_v61 = vsel %vm2232_vm7, %v2201_v19, %v2202_v53  ;;  %v2308_v42 = vsel %vm5174_vm9, %v2264_v30, 0.0  ;;  %v2203_v5 = vrot.slane %v5024_v47, 1  ;;  %v2349_v7 = vmul.f32 %v6717_v17, %v2263_v1 }
 0x2ab   : > { %3678 = vmatprep.mubr.msk.f32.mxu1 %vm820_vm0, %v2545_v56  ;;  %v2165_v6 = vadd.f32 %v2133_v20, %v2097_v58  ;;  %v5248_v10 = vsel %vm5184_vm10, %v2262_v61, 0.0  ;;  %v2346_v19 = vmul.f32 %v6717_v17, %v2306_v4  ;;  %v2414_v14 = vmul.f32 %v6713_v39, %v2308_v42 }
 0x2ac   : > { %v5254_v49 = vsel %vm2232_vm7, %v2202_v53, %v2203_v5  ;;  %v2447_v2 = vadd.f32 %v2415_v57, %v2379_v29  ;;  %v1175_v41 = vmul.f32 0.015625, %v1127_v48  ;;  %v6723_v46 = vand.u32 15, %v6722_v60  ;;  %v1136_v9 = vpop.xlane.xlu0 %1135 }
 0x2ad   : > { %v2378_v20 = vadd.f32 %v2346_v19, %v2165_v6  ;;  %v2483_v33 = vmul.f32 %v5200_v43, %v5254_v49  ;;  %v1176_v30 = vmul.f32 0.015625, %v1130_v32  ;;  %v6726_v52 = vrot.slane %v5024_v47, 7  ;;  %v6728_v19 = vld [vmem:[#allocation54_spill] sm:$0xff] }
 0x2ae   : > { %vm5258_vm11 = vcmp.lt.s32.totalorder %v6723_v46, 15  ;;  %v6727_v56 = vrot.slane %v4998_v13, 7  ;;  %v1211_v29 = vadd.f32 1e-06, %v1175_v41  ;;  %v1827_v57 = vmul.f32 %v4854_v34, %v5062_v11  ;;  %v1133_v46 = vpop.xlane.xlu1 %1132 }
 0x2af   : > { %v1863_v58 = vmul.f32 %v4870_v38, %v5058_v15  ;;  %v2446_v48 = vadd.f32 %v2414_v14, %v2378_v20  ;;  %v2482_v61 = vmul.f32 %v5200_v43, %v5248_v10  ;;  %v2515_v4 = vadd.f32 %v2483_v33, %v2447_v2 }
 0x2b0   : > { %v5270_v53 = vsel %vm1711_vm2, %v6727_v56, %v6726_v52  ;;  %v1212_v32 = vadd.f32 1e-06, %v1176_v30  ;;  %v1322_v6 = vmul.f32 %v4927_v25, %v1279_v26  ;;  %v1280_v60 = vmul.f32 %v3852_v3, %v6728_v19  ;;  %v6730_v26 = vld [vmem:[#allocation22_spill] sm:$0xff] }
 0x2b1   : > { %v1931_v63 = vmul.f32 %v4882_v59, %v5270_v53  ;;  %3857 = vrsqrt.f32 %v1211_v29  ;;  %v1895_v41 = vadd.f32 %v1863_v58, %v1827_v57  ;;  %v2381_v11 = vadd.f32 %v2349_v7, %v2168_v27  ;;  %v6731_v58 = vld [vmem:[#allocation68_spill] sm:$0xff] }
 0x2b2   : > { %v2514_v52 = vadd.f32 %v2482_v61, %v2446_v48  ;;  %3859 = vrsqrt.f32 %v1212_v32  ;;  %v2204_v56 = vrot.slane %v5027_v62, 1  ;;  %v2547_v14 = vadd.f32 %v2515_v4, %v6729_v12 }
 0x2b3   : > { %v1963_v20 = vadd.f32 %v1931_v63, %v1895_v41  ;;  %v1999_v2 = vmul.f32 %v4872_v16, %v4983_v51  ;;  %v2205_v33 = vrot.slane %v5067_v23, 1  ;;  %v2067_v3 = vmul.f32 %v4884_v22, %v6710_v21  ;;  %v6735_v41 = vld [vmem:[#allocation67_spill] sm:$0xff] }
 0x2b4   : > { %v2546_v30 = vadd.f32 %v2514_v52, %v6730_v26  ;;  %v2260_v27 = vsel %vm2232_vm7, %v2203_v5, %v2204_v56  ;;  %v1177_v7 = vmul.f32 0.015625, %v1133_v46  ;;  %v2417_v12 = vmul.f32 %v6713_v39, %v5254_v49  ;;  %v6739_v26 = vld [vmem:[#allocation55_spill] sm:$0xff] }
 0x2b5   : > { %v2031_v29 = vadd.f32 %v1999_v2, %v1963_v20  ;;  %v5294_v57 = vsel %vm2232_vm7, %v2204_v56, %v2205_v33  ;;  %v1178_v51 = vmul.f32 0.015625, %v1136_v9  ;;  %v6732_v63 = vand.u32 15, %v6731_v58  ;;  %v3854_v61 = vpop.eup %3853  ;;  %v6740_v58 = vld [vmem:[#allocation56_spill] sm:$0xff] }
 0x2b6   : > { %v1323_v4 = vmul.f32 %v4927_v25, %v1280_v60  ;;  %3679 = vmatmul.mubr.msk.f32.vlgmr.msra.gmra.mxu1 %vm820_vm0, %v2546_v30  ;;  %v2135_v5 = vmul.f32 %v4893_v24, %v5024_v47  ;;  %v2348_v32 = vmul.f32 %v6717_v17, %v2308_v42  ;;  %v1213_v19 = vadd.f32 1e-06, %v1177_v7  ;;  %v3856_v52 = vpop.eup %3855 }
 0x2b7   : > { %vm5300_vm12 = vcmp.ge.s32.totalorder %v6732_v63, 1  ;;  %v6736_v46 = vand.u32 15, %v6735_v41  ;;  %3681 = vmatprep.mubr.msk.f32.mxu1 %vm820_vm0, %v2547_v14  ;;  %v2099_v56 = vadd.f32 %v2067_v3, %v2031_v29  ;;  %v2449_v20 = vadd.f32 %v2417_v12, %v2381_v11 }
 0x2b8   : > { %v1214_v60 = vadd.f32 1e-06, %v1178_v51  ;;  %v1684_v2 = vrot.slane %v5067_v23, 7  ;;  %v1281_v30 = vmul.f32 %v3854_v61, %v6739_v26  ;;  %v5320_v42 = vsel %vm5258_vm11, %v2260_v27, 0.0 }
 0x2b9   : > { %vm5311_vm13 = vcmp.lt.s32.totalorder %v6736_v46, 15  ;;  %v2485_v7 = vmul.f32 %v5200_v43, %v5294_v57  ;;  %3861 = vrsqrt.f32 %v1213_v19  ;;  %v1282_v63 = vmul.f32 %v3856_v52, %v6740_v58 }
 0x2ba   : > { %v2167_v41 = vadd.f32 %v2135_v5, %v2099_v56  ;;  %3863 = vrsqrt.f32 %v1214_v60  ;;  %v6741_v14 = vrot.slane %v5027_v62, 7  ;;  %v5333_v3 = vadd.f32 %v4951_v50, %v5217_v45 }
 0x2bb   : > { %v1829_v1 = vmul.f32 %v4854_v34, %v5058_v15  ;;  %v1865_v27 = vmul.f32 %v4870_v38, %v5270_v53  ;;  %v5342_v12 = vadd.f32 %v4951_v50, %v1322_v6  ;;  %v2416_v61 = vmul.f32 %v6713_v39, %v5248_v10 }
 0x2bc   : > { %v5329_v11 = vsel %vm1711_vm2, %v6741_v14, %v1684_v2  ;;  %v2380_v51 = vadd.f32 %v2348_v32, %v2167_v41  ;;  %v2517_v5 = vadd.f32 %v2485_v7, %v2449_v20  ;;  %v5347_v45 = vadd.f32 %v4951_v50, %v1323_v4  ;;  %v6742_v41 = vld [vmem:[#allocation25_spill] sm:$0xff] }
 0x2bd   : > { %v1933_v29 = vmul.f32 %v4882_v59, %v5329_v11  ;;  %v2484_v15 = vmul.f32 %v5200_v43, %v5320_v42  ;;  %v1897_v19 = vadd.f32 %v1865_v27, %v1829_v1  ;;  %v6604_v46 = vrot.slane %v5070_v8, 1  ;;  %v6743_v27 = vld [vmem:[#allocation57_spill] sm:$0xff] }
 0x2be   : > { %v1324_v52 = vmul.f32 %v4927_v25, %v1281_v30  ;;  %v1325_v56 = vmul.f32 %v4927_v25, %v1282_v63  ;;  %v2448_v6 = vadd.f32 %v2416_v61, %v2380_v51  ;;  %v1685_v32 = vrot.slane %v5070_v8, 7  ;;  %v3858_v60 = vpop.eup %3857  ;;  %v6744_v61 = vld [vmem:[#allocation24_spill] sm:$0xff] }
 0x2bf   : > { %v1965_v26 = vadd.f32 %v1933_v29, %v1897_v19  ;;  %v2001_v20 = vmul.f32 %v4872_v16, %v6710_v21  ;;  %v2258_v4 = vsel %vm2232_vm7, %v2205_v33, %v6604_v46  ;;  %v1866_v7 = vmul.f32 %v4870_v38, %v5098_v54  ;;  %v3860_v58 = vpop.eup %3859 }
 0x2c0   : > { %v2516_v30 = vadd.f32 %v2484_v15, %v2448_v6  ;;  %v2549_v63 = vadd.f32 %v2517_v5, %v6742_v41  ;;  %v1737_v14 = vsel %vm1711_vm2, %v1684_v2, %v1685_v32  ;;  %v1830_v1 = vmul.f32 %v4854_v34, %v5086_v35  ;;  %v6745_v6 = vld [vmem:[#allocation58_spill] sm:$0xff] }
 0x2c1   : > { %v1283_v21 = vmul.f32 %v3858_v60, %v6743_v27  ;;  %v2033_v29 = vadd.f32 %v2001_v20, %v1965_v26  ;;  %v2069_v51 = vmul.f32 %v4884_v22, %v5024_v47  ;;  %v5373_v33 = vsel %vm5300_vm12, %v1737_v14, 0.0  ;;  %v1139_v20 = vpop.xlane.xlu1 %1138 }
 0x2c2   : > { %v2548_v15 = vadd.f32 %v2516_v30, %v6744_v61  ;;  %v5378_v5 = vsel %vm5311_vm13, %v2258_v4, 0.0  ;;  %v1898_v2 = vadd.f32 %v1866_v7, %v1830_v1  ;;  %v1934_v35 = vmul.f32 %v4882_v59, %v5373_v33 }
 0x2c3   : > { %v5383_v19 = vadd.f32 %v4951_v50, %v1324_v52  ;;  %v1284_v60 = vmul.f32 %v3860_v58, %v6745_v6  ;;  %v2101_v26 = vadd.f32 %v2069_v51, %v2033_v29  ;;  %v2137_v48 = vmul.f32 %v4893_v24, %v5067_v23  ;;  %v6750_v6 = vld [vmem:[#allocation70_spill] sm:$0xff] }
 0x2c4   : > { %v5389_v30 = vadd.f32 %v4951_v50, %v1325_v56  ;;  %3682 = vmatmul.mubr.msk.f32.gmra.mxu1 %vm820_vm0, %v2548_v15  ;;  %v2350_v9 = vmul.f32 %v6717_v17, %v5248_v10  ;;  %v1966_v4 = vadd.f32 %v1934_v35, %v1898_v2  ;;  %v2002_v52 = vmul.f32 %v4872_v16, %v4998_v13  ;;  %v6746_v13 = vld [vmem:[#allocation71_spill] sm:$0xff] }
 0x2c5   : > { %v1326_v7 = vmul.f32 %v4927_v25, %v1283_v21  ;;  %3684 = vmatprep.mubr.msk.f32.mxu1 %vm820_vm0, %v2549_v63  ;;  %v2169_v58 = vadd.f32 %v2137_v48, %v2101_v26  ;;  %v2418_v41 = vmul.f32 %v6713_v39, %v5320_v42  ;;  %v2486_v56 = vmul.f32 %v5200_v43, %v5378_v5 }
 0x2c6   : > { %v3862_v14 = vpop.eup %3861  ;;  %v2034_v1 = vadd.f32 %v2002_v52, %v1966_v4  ;;  %v2070_v10 = vmul.f32 %v4884_v22, %v5027_v62  ;;  %v1179_v27 = vmul.f32 0.015625, %v1139_v20  ;;  %v1686_v29 = vrot.slane %v5089_v31, 7  ;;  %v6754_v20 = vld [vmem:[#allocation59_spill] sm:$0xff] }
 0x2c7   : > { %v6747_v51 = vand.u32 15, %v6746_v13  ;;  %v3864_v63 = vpop.eup %3863  ;;  %v1327_v61 = vmul.f32 %v4927_v25, %v1284_v60  ;;  %v2382_v15 = vadd.f32 %v2350_v9, %v2169_v58  ;;  %v2138_v2 = vmul.f32 %v4893_v24, %v5070_v8  ;;  %v6755_v9 = vld [vmem:[#allocation60_spill] sm:$0xff] }
 0x2c8   : > { %v2207_v35 = vrot.slane %v5089_v31, 1  ;;  %v6751_v26 = vand.u32 15, %v6750_v6  ;;  %v1285_v4 = vmul.f32 %v3862_v14, %v6754_v20  ;;  %v2102_v52 = vadd.f32 %v2070_v10, %v2034_v1 }
 0x2c9   : > { %vm5407_vm14 = vcmp.ge.s32.totalorder %v6747_v51, 1  ;;  %v5424_v13 = vsel %vm1711_vm2, %v1685_v32, %v1686_v29  ;;  %v1831_v60 = vmul.f32 %v4854_v34, %v5270_v53  ;;  %v1286_v58 = vmul.f32 %v3864_v63, %v6755_v9 }
 0x2ca   : > { %vm5417_vm15 = vcmp.lt.s32.totalorder %v6751_v26, 15  ;;  %v2450_v51 = vadd.f32 %v2418_v41, %v2382_v15  ;;  %v1867_v6 = vmul.f32 %v4870_v38, %v5329_v11  ;;  %v1935_v26 = vmul.f32 %v4882_v59, %v5424_v13 }
 0x2cb   : > { %v5434_v46 = vadd.f32 %v4951_v50, %v1326_v7  ;;  %v2170_v14 = vadd.f32 %v2138_v2, %v2102_v52  ;;  %v2351_v32 = vmul.f32 %v6717_v17, %v5254_v49  ;;  %v1215_v1 = vadd.f32 1e-06, %v1179_v27 }
 0x2cc   : > { %v5439_v10 = vadd.f32 %v4951_v50, %v1327_v61  ;;  %v2518_v53 = vadd.f32 %v2486_v56, %v2450_v51  ;;  %v6756_v41 = vrot.slane %v5070_v8, 1  ;;  %v1899_v15 = vadd.f32 %v1867_v6, %v1831_v60  ;;  %v6757_v61 = vld [vmem:[#allocation26_spill] sm:$0xff] }
 0x2cd   : > { %v1328_v20 = vmul.f32 %v4927_v25, %v1285_v4  ;;  %v2383_v7 = vadd.f32 %v2351_v32, %v2170_v14  ;;  %v2419_v2 = vmul.f32 %v6713_v39, %v5294_v57  ;;  %v2208_v49 = vrot.slane %v5092_v55, 1 }
 0x2ce   : > { %v5445_v63 = vsel %vm2232_vm7, %v6756_v41, %v2207_v35  ;;  %v1329_v27 = vmul.f32 %v4927_v25, %v1286_v58  ;;  %v2550_v52 = vadd.f32 %v2518_v53, %v6757_v61  ;;  %v1967_v56 = vadd.f32 %v1935_v26, %v1899_v15 }
 0x2cf   : > { %v2003_v9 = vmul.f32 %v4872_v16, %v5024_v47  ;;  %v2451_v51 = vadd.f32 %v2419_v2, %v2383_v7  ;;  %v2487_v60 = vmul.f32 %v5200_v43, %v5445_v63  ;;  %3865 = vrsqrt.f32 %v1215_v1  ;;  %v3931_v2 = vld [vmem:[%s6515_s5] ss:$0 sm:$0xff] }
 0x2d0   : > { %v1687_v4 = vrot.slane %v5092_v55, 7  ;;  %3685 = vmatmul.mubr.msk.f32.gmra.mxu1 %vm820_vm0, %v2550_v52  ;;  %v2071_v14 = vmul.f32 %v4884_v22, %v5067_v23  ;;  %v2256_v25 = vsel %vm2232_vm7, %v2207_v35, %v2208_v49  ;;  %v1868_v58 = vmul.f32 %v4870_v38, %v5373_v33 }
 0x2d1   : > { %v2035_v6 = vadd.f32 %v2003_v9, %v1967_v56  ;;  %v5466_v47 = vadd.f32 %v4951_v50, %v1328_v20  ;;  %v2519_v26 = vadd.f32 %v2487_v60, %v2451_v51  ;;  %v1832_v1 = vmul.f32 %v4854_v34, %v5098_v54  ;;  %v6758_v20 = vld [vmem:[#allocation73_spill] sm:$0xff]  ;;  %v6772_v54 = vld [vmem:[#allocation76_spill] sm:$0xff] }
 0x2d2   : > { %v1735_v32 = vsel %vm1711_vm2, %v1686_v29, %v1687_v4  ;;  %v5473_v53 = vadd.f32 %v4951_v50, %v1329_v27  ;;  %v2139_v35 = vmul.f32 %v4893_v24, %v5089_v31  ;;  %v6759_v7 = vand.u32 15, %v6758_v20  ;;  %v6762_v29 = vld [vmem:[#allocation74_spill] sm:$0xff]  ;;  %v6766_v50 = vld [vmem:[#allocation27_spill] sm:$0xff] }
 0x2d3   : > { %v2103_v41 = vadd.f32 %v2071_v14, %v2035_v6  ;;  %v5479_v15 = vsel %vm5407_vm14, %v1735_v32, 0.0  ;;  %v6763_v61 = vand.u32 15, %v6762_v29  ;;  %v2551_v27 = vadd.f32 %v2519_v26, %v6766_v50 }
 0x2d4   : > { %vm5483_vm1 = vcmp.lt.s32.totalorder %v6759_v7, 15  ;;  %v5496_v52 = vsel %vm5417_vm15, %v2256_v25, 0.0  ;;  %v1900_v21 = vadd.f32 %v1868_v58, %v1832_v1  ;;  %v1936_v56 = vmul.f32 %v4882_v59, %v5479_v15 }
 0x2d5   : > { %vm5489_vm3 = vcmp.ge.s32.totalorder %v6763_v61, 1  ;;  %v2171_v9 = vadd.f32 %v2139_v35, %v2103_v41  ;;  %v2352_v51 = vmul.f32 %v6717_v17, %v5320_v42  ;;  %v2420_v60 = vmul.f32 %v6713_v39, %v5378_v5  ;;  %3687 = vmatprep.mubr.msk.f32.mxu1 %vm820_vm0, %v2551_v27 }
 0x2d6   : > { %v1688_v6 = vrot.slane %v5110_v0, 7  ;;  %v1968_v14 = vadd.f32 %v1936_v56, %v1900_v21  ;;  %v2004_v48 = vmul.f32 %v4872_v16, %v5027_v62  ;;  %v1833_v25 = vmul.f32 %v4854_v34, %v5329_v11 }
 0x2d7   : > { %v1869_v58 = vmul.f32 %v4870_v38, %v5424_v13  ;;  %v2384_v26 = vadd.f32 %v2352_v51, %v2171_v9  ;;  %v2488_v42 = vmul.f32 %v5200_v43, %v5496_v52  ;;  %v2209_v32 = vrot.slane %v5110_v0, 1 }
 0x2d8   : > { %v5517_v1 = vsel %vm1711_vm2, %v1687_v4, %v1688_v6  ;;  %v2036_v41 = vadd.f32 %v2004_v48, %v1968_v14  ;;  %v2072_v62 = vmul.f32 %v4884_v22, %v5070_v8  ;;  %v2140_v7 = vmul.f32 %v4893_v24, %v5092_v55 }
 0x2d9   : > { %v1901_v35 = vadd.f32 %v1869_v58, %v1833_v25  ;;  %v1937_v11 = vmul.f32 %v4882_v59, %v5517_v1  ;;  %v2452_v20 = vadd.f32 %v2420_v60, %v2384_v26  ;;  %v2353_v29 = vmul.f32 %v6717_v17, %v5294_v57 }
 0x2da   : > { %v2210_v61 = vrot.slane %v5127_v40, 1  ;;  %v2104_v50 = vadd.f32 %v2072_v62, %v2036_v41  ;;  %v2421_v4 = vmul.f32 %v6713_v39, %v5445_v63  ;;  %v2005_v21 = vmul.f32 %v4872_v16, %v5067_v23  ;;  %v6767_v23 = vld [vmem:[#allocation28_spill] sm:$0xff] }
 0x2db   : > { %v1969_v27 = vadd.f32 %v1937_v11, %v1901_v35  ;;  %v2520_v56 = vadd.f32 %v2488_v42, %v2452_v20  ;;  %v5534_v9 = vsel %vm2232_vm7, %v2208_v49, %v2209_v32  ;;  %v1689_v57 = vrot.slane %v5127_v40, 7 }
 0x2dc   : > { %v2254_v51 = vsel %vm2232_vm7, %v2209_v32, %v2210_v61  ;;  %v2172_v60 = vadd.f32 %v2140_v7, %v2104_v50  ;;  %v2073_v48 = vmul.f32 %v4884_v22, %v5089_v31  ;;  %v2141_v25 = vmul.f32 %v4893_v24, %v5110_v0  ;;  %v3866_v58 = vpop.eup %3865 }
 0x2dd   : > { %v2037_v14 = vadd.f32 %v2005_v21, %v1969_v27  ;;  %v2552_v26 = vadd.f32 %v2520_v56, %v6767_v23  ;;  %v1733_v49 = vsel %vm1711_vm2, %v1688_v6, %v1689_v57  ;;  %v1834_v42 = vmul.f32 %v4854_v34, %v5373_v33  ;;  %v6776_v56 = vld [vmem:[#allocation61_spill] sm:$0xff] }
 0x2de   : > { %v1870_v32 = vmul.f32 %v4870_v38, %v5479_v15  ;;  %v2385_v41 = vadd.f32 %v2353_v29, %v2172_v60  ;;  %v5552_v35 = vsel %vm5483_vm1, %v2254_v51, 0.0  ;;  %v5556_v11 = vsel %vm5489_vm3, %v1733_v49, 0.0  ;;  %v6768_v29 = vld [vmem:[#allocation75_spill] sm:$0xff] }
 0x2df   : > { %v2105_v62 = vadd.f32 %v2073_v48, %v2037_v14  ;;  %v1707_v20 = vrot.slane %v5473_v53, 7  ;;  %3688 = vmatmul.mubr.msk.f32.gmra.mxu1 %vm820_vm0, %v2552_v26  ;;  %v2489_v33 = vmul.f32 %v5200_v43, %v5534_v9  ;;  %v1938_v7 = vmul.f32 %v4882_v59, %v5556_v11 }
 0x2e0   : > { %v1902_v6 = vadd.f32 %v1870_v32, %v1834_v42  ;;  %v6769_v50 = vand.u32 15, %v6768_v29  ;;  %v6773_v27 = vand.u32 15, %v6772_v54  ;;  %v1287_v51 = vmul.f32 %v3866_v58, %v6776_v56 }
 0x2e1   : > { %v2453_v60 = vadd.f32 %v2421_v4, %v2385_v41  ;;  %v2173_v14 = vadd.f32 %v2141_v25, %v2105_v62  ;;  %v2354_v48 = vmul.f32 %v6717_v17, %v5378_v5  ;;  %v2422_v23 = vmul.f32 %v6713_v39, %v5496_v52  ;;  %v6777_v62 = vld [vmem:[#allocation29_spill] sm:$0xff] }
 0x2e2   : > { %vm5566_vm4 = vcmp.lt.s32.totalorder %v6769_v50, 15  ;;  %vm5572_vm5 = vcmp.ge.s32.totalorder %v6773_v27, 1  ;;  %v2490_v26 = vmul.f32 %v5200_v43, %v5552_v35  ;;  %v1970_v49 = vadd.f32 %v1938_v7, %v1902_v6 }
 0x2e3   : > { %v2006_v42 = vmul.f32 %v4872_v16, %v5070_v8  ;;  %v2521_v32 = vadd.f32 %v2489_v33, %v2453_v60  ;;  %v2386_v29 = vadd.f32 %v2354_v48, %v2173_v14  ;;  %v2211_v50 = vrot.slane %v5136_v37, 1 }
 0x2e4   : > { %v1690_v4 = vrot.slane %v5136_v37, 7  ;;  %v2074_v5 = vmul.f32 %v4884_v22, %v5092_v55  ;;  %v1835_v58 = vmul.f32 %v4854_v34, %v5424_v13  ;;  %v1871_v41 = vmul.f32 %v4870_v38, %v5517_v1 }
 0x2e5   : > { %v2038_v25 = vadd.f32 %v2006_v42, %v1970_v49  ;;  %v2553_v6 = vadd.f32 %v2521_v32, %v6777_v62  ;;  %v2454_v7 = vadd.f32 %v2422_v23, %v2386_v29  ;;  %v2142_v8 = vmul.f32 %v4893_v24, %v5127_v40  ;;  %v6778_v32 = vld [vmem:[#allocation30_spill] sm:$0xff] }
 0x2e6   : > { %v5598_v33 = vsel %vm1711_vm2, %v1689_v57, %v1690_v4  ;;  %v2355_v27 = vmul.f32 %v6717_v17, %v5445_v63  ;;  %v1903_v56 = vadd.f32 %v1871_v41, %v1835_v58  ;;  %v5607_v14 = vsel %vm2232_vm7, %v2210_v61, %v2211_v50 }
 0x2e7   : > { %v2106_v54 = vadd.f32 %v2074_v5, %v2038_v25  ;;  %v1939_v13 = vmul.f32 %v4882_v59, %v5598_v33  ;;  %3690 = vmatprep.mubr.msk.f32.mxu1 %vm820_vm0, %v2553_v6  ;;  %v2522_v60 = vadd.f32 %v2490_v26, %v2454_v7  ;;  %v2423_v48 = vmul.f32 %v6713_v39, %v5534_v9 }
 0x2e8   : > { %v2212_v57 = vrot.slane %v5142_v36, 1  ;;  %v2007_v63 = vmul.f32 %v4872_v16, %v5089_v31  ;;  %v1691_v42 = vrot.slane %v5142_v36, 7  ;;  %v2075_v26 = vmul.f32 %v4884_v22, %v5110_v0 }
 0x2e9   : > { %v2174_v23 = vadd.f32 %v2142_v8, %v2106_v54  ;;  %v1971_v49 = vadd.f32 %v1939_v13, %v1903_v56  ;;  %v2554_v29 = vadd.f32 %v2522_v60, %v6778_v32  ;;  %v1872_v25 = vmul.f32 %v4870_v38, %v5556_v11 }
 0x2ea   : > { %v2252_v61 = vsel %vm2232_vm7, %v2211_v50, %v2212_v57  ;;  %v1731_v41 = vsel %vm1711_vm2, %v1690_v4, %v1691_v42  ;;  %v1836_v31 = vmul.f32 %v4854_v34, %v5479_v15  ;;  %v2491_v62 = vmul.f32 %v5200_v43, %v5607_v14 }
 0x2eb   : > { %v2387_v5 = vadd.f32 %v2355_v27, %v2174_v23  ;;  %v2039_v58 = vadd.f32 %v2007_v63, %v1971_v49  ;;  %3691 = vmatmul.mubr.msk.f32.gmra.mxu1 %vm820_vm0, %v2554_v29  ;;  %v2143_v6 = vmul.f32 %v4893_v24, %v5136_v37  ;;  %v5633_v50 = vsel %vm5566_vm4, %v2252_v61, 0.0  ;;  %v6779_v27 = vld [vmem:[#allocation78_spill] sm:$0xff] }
 0x2ec   : > { %v5637_v7 = vsel %vm5572_vm5, %v1731_v41, 0.0  ;;  %v1904_v54 = vadd.f32 %v1872_v25, %v1836_v31  ;;  %v6780_v56 = vand.u32 15, %v6779_v27  ;;  %v5650_v60 = vmul.f32 %v3931_v2, %v1287_v51 }
 0x2ed   : > { %v2455_v4 = vadd.f32 %v2423_v48, %v2387_v5  ;;  %v2107_v8 = vadd.f32 %v2075_v26, %v2039_v58  ;;  %v1940_v15 = vmul.f32 %v4882_v59, %v5637_v7  ;;  %v2356_v21 = vmul.f32 %v6717_v17, %v5496_v52  ;;  %v6783_v26 = vld [vmem:[#allocation77_spill] sm:$0xff]  ;;  %v6787_v58 = vld [vmem:[#allocation31_spill] sm:$0xff] }
 0x2ee   : > { %vm5643_vm6 = vcmp.ge.s32.totalorder %v6780_v56, 1  ;;  %v2008_v48 = vmul.f32 %v4872_v16, %v5092_v55  ;;  %v2213_v23 = vrot.slane %v5145_v18, 1  ;;  %v1692_v29 = vrot.slane %v5145_v18, 7 }
 0x2ef   : > { %v2523_v49 = vadd.f32 %v2491_v62, %v2455_v4  ;;  %v2175_v63 = vadd.f32 %v2143_v6, %v2107_v8  ;;  %v1972_v32 = vadd.f32 %v1940_v15, %v1904_v54  ;;  %v6784_v61 = vand.u32 15, %v6783_v26 }
 0x2f0   : > { %v2424_v51 = vmul.f32 %v6713_v39, %v5552_v35  ;;  %v2492_v52 = vmul.f32 %v5200_v43, %v5633_v50  ;;  %v1837_v55 = vmul.f32 %v4854_v34, %v5517_v1  ;;  %v1873_v5 = vmul.f32 %v4870_v38, %v5598_v33 }
 0x2f1   : > { %vm5660_vm8 = vcmp.lt.s32.totalorder %v6784_v61, 15  ;;  %v2555_v41 = vadd.f32 %v2523_v49, %v6787_v58  ;;  %v2388_v31 = vadd.f32 %v2356_v21, %v2175_v63  ;;  %v2040_v62 = vadd.f32 %v2008_v48, %v1972_v32 }
 0x2f2   : > { %v2076_v6 = vmul.f32 %v4884_v22, %v5127_v40  ;;  %v2144_v4 = vmul.f32 %v4893_v24, %v5142_v36  ;;  %v5679_v8 = vsel %vm2232_vm7, %v2212_v57, %v2213_v23  ;;  %v5683_v1 = vsel %vm1711_vm2, %v1691_v42, %v1692_v29 }
 0x2f3   : > { %v1905_v54 = vadd.f32 %v1873_v5, %v1837_v55  ;;  %3693 = vmatprep.mubr.msk.f32.mxu1 %vm820_vm0, %v2555_v41  ;;  %v2456_v15 = vadd.f32 %v2424_v51, %v2388_v31  ;;  %v1941_v56 = vmul.f32 %v4882_v59, %v5683_v1  ;;  %v2214_v2 = vrot.slane %v5153_v28, 1  ;;  %v6788_v55 = vld [vmem:[#allocation32_spill] sm:$0xff]  ;;  %v550_v31 = vld [vmem:[%s459_s25] sm:$0xff] }
 0x2f4   : > { %v2108_v27 = vadd.f32 %v2076_v6, %v2040_v62  ;;  %v2357_v21 = vmul.f32 %v6717_v17, %v5534_v9  ;;  %v2425_v57 = vmul.f32 %v6713_v39, %v5607_v14  ;;  %v2009_v42 = vmul.f32 %v4872_v16, %v5110_v0  ;;  %v551_v62 = vld [vmem:[%s459_s25 + $0x8] sm:$0xff]  ;;  %3659 = vmatprep.mubr.f32.mxu0 %v550_v31  ;;  %s4054_s25 = sshll.u32 %s4142_s12, 4  ;;  %s4055_s25 = int_to_ptr.vmem [resolvable:$false] %s4054_s25 }
 0x2f5   : > { %v1693_v48 = vrot.slane %v5153_v28, 7  ;;  %v2524_v49 = vadd.f32 %v2492_v52, %v2456_v15  ;;  %v2493_v32 = vmul.f32 %v5200_v43, %v5679_v8  ;;  %v1973_v26 = vadd.f32 %v1941_v56, %v1905_v54  ;;  %3660 = vmatmul.mubr.f32.gmra.mxu0 %v551_v62  ;;  %v6791_v62 = vld [vmem:[#allocation79_spill] sm:$0xff]  ;;  %s4056_s17 = scalar_lea.vmem %s4055_s25, 8192  ;;  %p4057_p1 = scmp.lt.s32.totalorder %s6460_s10, %s4055_s25 }
 0x2f6   : > { %v2176_v63 = vadd.f32 %v2144_v4, %v2108_v27  ;;  %v2077_v61 = vmul.f32 %v4884_v22, %v5136_v37  ;;  %v1838_v51 = vmul.f32 %v4854_v34, %v5556_v11  ;;  %v1874_v0 = vmul.f32 %v4870_v38, %v5637_v7  ;;  %v6789_v27 = vld [vmem:[#allocation63_spill] sm:$0xff]  ;;  %p4058_p3 = scmp.lt.s32.totalorder %s4056_s17, %s4050_s21 }
 0x2f7   : > { %v1729_v9 = vsel %vm1711_vm2, %v1692_v29, %v1693_v48  ;;  %v2556_v5 = vadd.f32 %v2524_v49, %v6788_v55  ;;  %v2041_v58 = vadd.f32 %v2009_v42, %v1973_v26  ;;  %v2250_v41 = vsel %vm2232_vm7, %v2213_v23, %v2214_v2 }
 0x2f8   : > { %v2389_v52 = vadd.f32 %v2357_v21, %v2176_v63  ;;  %v2145_v29 = vmul.f32 %v4893_v24, %v5145_v18  ;;  %v2358_v11 = vmul.f32 %v6717_v17, %v5552_v35  ;;  %v5717_v6 = vsel %vm5643_vm6, %v1729_v9, 0.0  ;;  %p4059_p2 = por %p4058_p3, %p4057_p1 }
 0x2f9   : > { %v1906_v4 = vadd.f32 %v1874_v0, %v1838_v51  ;;  %3694 = vmatmul.mubr.msk.f32.gmra.mxu1 %vm820_vm0, %v2556_v5  ;;  %v2109_v23 = vadd.f32 %v2077_v61, %v2041_v58  ;;  %v1942_v15 = vmul.f32 %v4882_v59, %v5717_v6  ;;  %v2215_v56 = vrot.slane %v6789_v27, 1 }
 0x2fa   : > { %v2457_v54 = vadd.f32 %v2425_v57, %v2389_v52  ;;  %v5725_v21 = vsel %vm5660_vm8, %v2250_v41, 0.0  ;;  %v2426_v35 = vmul.f32 %v6713_v39, %v5633_v50  ;;  %v1396_v13 = vadd.s32 152, %v4829_v44  ;;  %p4060_p4 = pnand %p4059_p2, %p4053_p0 }
 0x2fb   : > { %v1694_v42 = vrot.slane %v6789_v27, 7  ;;  %v2177_v57 = vadd.f32 %v2145_v29, %v2109_v23  ;;  %v1974_v63 = vadd.f32 %v1942_v15, %v1906_v4  ;;  %v2010_v26 = vmul.f32 %v4872_v16, %v5127_v40 }
 0x2fc   : > { %v2525_v49 = vadd.f32 %v2493_v32, %v2457_v54  ;;  %v2078_v61 = vmul.f32 %v4884_v22, %v5142_v36  ;;  %v5737_v25 = vsel %vm2232_vm7, %v2214_v2, %v2215_v56  ;;  %v1839_v51 = vmul.f32 %v4854_v34, %v5598_v33  ;;  %v6790_v32 = vld [vmem:[#allocation33_spill] sm:$0xff] }
 0x2fd   : > { %v5741_v9 = vsel %vm1711_vm2, %v1693_v48, %v1694_v42  ;;  %v2390_v55 = vadd.f32 %v2358_v11, %v2177_v57  ;;  %v2042_v5 = vadd.f32 %v2010_v26, %v1974_v63  ;;  %v1875_v40 = vmul.f32 %v4870_v38, %v5683_v1 }
 0x2fe   : > { %v2557_v0 = vadd.f32 %v2525_v49, %v6790_v32  ;;  %v2494_v52 = vmul.f32 %v5200_v43, %v5725_v21  ;;  %v2146_v2 = vmul.f32 %v4893_v24, %v5153_v28  ;;  %v1656_v58 = vand.u32 15, %v1396_v13 }
 0x2ff   : > { %v1943_v48 = vmul.f32 %v4882_v59, %v5741_v9  ;;  %v2458_v33 = vadd.f32 %v2426_v35, %v2390_v55  ;;  %v2110_v41 = vadd.f32 %v2078_v61, %v2042_v5  ;;  %v1907_v31 = vadd.f32 %v1875_v40, %v1839_v51  ;;  %v6794_v61 = vld [vmem:[#allocation34_spill] sm:$0xff] }
 0x300   : > { %3696 = vmatprep.mubr.msk.f32.mxu1 %vm820_vm0, %v2557_v0  ;;  %v2216_v29 = vrot.slane %v6791_v62, 1  ;;  %v2359_v11 = vmul.f32 %v6717_v17, %v5607_v14  ;;  %v2427_v4 = vmul.f32 %v6713_v39, %v5679_v8  ;;  %v2495_v54 = vmul.f32 %v5200_v43, %v5737_v25 }
 0x301   : > { %v1397_v23 = vadd.s32 160, %v4829_v44  ;;  %v2526_v15 = vadd.f32 %v2494_v52, %v2458_v33  ;;  %v2178_v13 = vadd.f32 %v2146_v2, %v2110_v41  ;;  %v1975_v49 = vadd.f32 %v1943_v48, %v1907_v31 }
 0x302   : > { %v2011_v35 = vmul.f32 %v4872_v16, %v5136_v37  ;;  %v2079_v57 = vmul.f32 %v4884_v22, %v5145_v18  ;;  %vm5767_vm9 = vcmp.lt.s32.totalorder %v1656_v58, 15  ;;  %v1695_v26 = vrot.slane %v6791_v62, 7 }
 0x303   : > { %v1657_v14 = vand.u32 15, %v1397_v23  ;;  %v2558_v51 = vadd.f32 %v2526_v15, %v6794_v61  ;;  %v2391_v32 = vadd.f32 %v2359_v11, %v2178_v13  ;;  %v2248_v55 = vsel %vm2232_vm7, %v2215_v56, %v2216_v29  ;;  %v6795_v13 = vld [vmem:[#allocation72_spill] sm:$0xff] }
 0x304   : > { %v2043_v0 = vadd.f32 %v2011_v35, %v1975_v49  ;;  %v1727_v37 = vsel %vm1711_vm2, %v1694_v42, %v1695_v26  ;;  %v1840_v5 = vmul.f32 %v4854_v34, %v5637_v7  ;;  %v1876_v40 = vmul.f32 %v4870_v38, %v5717_v6  ;;  %v6796_v35 = vld [vmem:[#allocation35_spill] sm:$0xff] }
 0x305   : > { %vm1768_vm10 = vcmp.ge.s32.totalorder %v1657_v14, 1  ;;  %3697 = vmatmul.mubr.msk.f32.gmra.mxu1 %vm820_vm0, %v2558_v51  ;;  %v2459_v52 = vadd.f32 %v2427_v4, %v2391_v32  ;;  %v2147_v58 = vmul.f32 %v4893_v24, %v6789_v27  ;;  %v2360_v56 = vmul.f32 %v6717_v17, %v5633_v50 }
 0x306   : > { %v2111_v2 = vadd.f32 %v2079_v57, %v2043_v0  ;;  %v5784_v48 = vsel %vm1768_vm10, %v1727_v37, 0.0  ;;  %v2428_v42 = vmul.f32 %v6713_v39, %v5725_v21  ;;  %v1908_v33 = vadd.f32 %v1876_v40, %v1840_v5 }
 0x307   : > { %v1944_v7 = vmul.f32 %v4882_v59, %v5784_v48  ;;  %v2527_v41 = vadd.f32 %v2495_v54, %v2459_v52  ;;  %v5794_v11 = vsel %vm5767_vm9, %v2248_v55, 0.0  ;;  %v2012_v4 = vmul.f32 %v4872_v16, %v5142_v36  ;;  %v6797_v52 = vld [vmem:[#allocation69_spill] sm:$0xff] }
 0x308   : > { %v2179_v31 = vadd.f32 %v2147_v58, %v2111_v2  ;;  %v2080_v50 = vmul.f32 %v4884_v22, %v5153_v28  ;;  %v1398_v15 = vadd.s32 168, %v4829_v44  ;;  %v1696_v49 = vrot.slane %v6795_v13, 7 }
 0x309   : > { %v1976_v23 = vadd.f32 %v1944_v7, %v1908_v33  ;;  %v2559_v57 = vadd.f32 %v2527_v41, %v6796_v35  ;;  %v2217_v54 = vrot.slane %v6795_v13, 1  ;;  %v1841_v63 = vmul.f32 %v4854_v34, %v5683_v1 }
 0x30a   : > { %v2392_v14 = vadd.f32 %v2360_v56, %v2179_v31  ;;  %v1658_v51 = vand.u32 15, %v1398_v15  ;;  %v5808_v36 = vsel %vm1711_vm2, %v1695_v26, %v1696_v49  ;;  %v1877_v32 = vmul.f32 %v4870_v38, %v5741_v9 }
 0x30b   : > { %v2044_v61 = vadd.f32 %v2012_v4, %v1976_v23  ;;  %3699 = vmatprep.mubr.msk.f32.mxu1 %vm820_vm0, %v2559_v57  ;;  %v2496_v55 = vmul.f32 %v5200_v43, %v5794_v11  ;;  %v2148_v37 = vmul.f32 %v4893_v24, %v6791_v62  ;;  %v1945_v1 = vmul.f32 %v4882_v59, %v5808_v36 }
 0x30c   : > { %v2460_v0 = vadd.f32 %v2428_v42, %v2392_v14  ;;  %v2361_v26 = vmul.f32 %v6717_v17, %v5679_v8  ;;  %v1909_v40 = vadd.f32 %v1877_v32, %v1841_v63  ;;  %v2218_v2 = vrot.slane %v6797_v52, 1  ;;  %v6798_v8 = vld [vmem:[#allocation36_spill] sm:$0xff] }
 0x30d   : > { %v2112_v5 = vadd.f32 %v2080_v50, %v2044_v61  ;;  %v5824_v56 = vsel %vm2232_vm7, %v2216_v29, %v2217_v54  ;;  %v2013_v42 = vmul.f32 %v4872_v16, %v5145_v18  ;;  %vm2290_vm11 = vcmp.lt.s32.totalorder %v1658_v51, 15 }
 0x30e   : > { %v2528_v58 = vadd.f32 %v2496_v55, %v2460_v0  ;;  %v1977_v7 = vadd.f32 %v1945_v1, %v1909_v40  ;;  %v2246_v41 = vsel %vm2232_vm7, %v2217_v54, %v2218_v2  ;;  %v1399_v31 = vadd.s32 176, %v4829_v44 }
 0x30f   : > { %v2180_v33 = vadd.f32 %v2148_v37, %v2112_v5  ;;  %v2429_v23 = vmul.f32 %v6713_v39, %v5737_v25  ;;  %v2081_v29 = vmul.f32 %v4884_v22, %v6789_v27  ;;  %v1697_v50 = vrot.slane %v6797_v52, 7 }
 0x310   : > { %v2560_v4 = vadd.f32 %v2528_v58, %v6798_v8  ;;  %v2045_v18 = vadd.f32 %v2013_v42, %v1977_v7  ;;  %v5837_v35 = vsel %vm2290_vm11, %v2246_v41, 0.0  ;;  %v1659_v57 = vand.u32 15, %v1399_v31  ;;  %v6799_v42 = vld [vmem:[#allocation65_spill] sm:$0xff] }
 0x311   : > { %v2393_v15 = vadd.f32 %v2361_v26, %v2180_v33  ;;  %v2497_v14 = vmul.f32 %v5200_v43, %v5824_v56  ;;  %v2149_v54 = vmul.f32 %v4893_v24, %v6795_v13  ;;  %v1725_v63 = vsel %vm1711_vm2, %v1696_v49, %v1697_v50  ;;  %v6800_v41 = vld [vmem:[#allocation37_spill] sm:$0xff] }
 0x312   : > { %3700 = vmatmul.mubr.msk.f32.gmra.mxu1 %vm820_vm0, %v2560_v4  ;;  %v1878_v61 = vmul.f32 %v4870_v38, %v5784_v48  ;;  %v2113_v32 = vadd.f32 %v2081_v29, %v2045_v18  ;;  %vm1770_vm12 = vcmp.ge.s32.totalorder %v1659_v57, 1  ;;  %v1842_v0 = vmul.f32 %v4854_v34, %v5717_v6 }
 0x313   : > { %v2461_v51 = vadd.f32 %v2429_v23, %v2393_v15  ;;  %v2362_v55 = vmul.f32 %v6717_v17, %v5725_v21  ;;  %v2430_v37 = vmul.f32 %v6713_v39, %v5794_v11  ;;  %v2498_v1 = vmul.f32 %v5200_v43, %v5837_v35 }
 0x314   : > { %v5856_v5 = vsel %vm1770_vm12, %v1725_v63, 0.0  ;;  %v2181_v26 = vadd.f32 %v2149_v54, %v2113_v32  ;;  %v1910_v40 = vadd.f32 %v1878_v61, %v1842_v0  ;;  %v2014_v6 = vmul.f32 %v4872_v16, %v5153_v28 }
 0x315   : > { %v2529_v49 = vadd.f32 %v2497_v14, %v2461_v51  ;;  %v1946_v58 = vmul.f32 %v4882_v59, %v5856_v5  ;;  %v2219_v33 = vrot.slane %v6799_v42, 1  ;;  %v1400_v21 = vadd.s32 184, %v4829_v44 }
 0x316   : > { %v1698_v7 = vrot.slane %v6799_v42, 7  ;;  %v2394_v43 = vadd.f32 %v2362_v55, %v2181_v26  ;;  %v2082_v4 = vmul.f32 %v4884_v22, %v6791_v62  ;;  %v1843_v28 = vmul.f32 %v4854_v34, %v5741_v9  ;;  %v6801_v26 = vld [vmem:[#allocation38_spill] sm:$0xff] }
 0x317   : > { %v2561_v31 = vadd.f32 %v2529_v49, %v6800_v41  ;;  %v1978_v8 = vadd.f32 %v1946_v58, %v1910_v40  ;;  %v1660_v23 = vand.u32 15, %v1400_v21  ;;  %v1879_v15 = vmul.f32 %v4870_v38, %v5808_v36 }
 0x318   : > { %v5870_v29 = vsel %vm1711_vm2, %v1697_v50, %v1698_v7  ;;  %v2462_v18 = vadd.f32 %v2430_v37, %v2394_v43  ;;  %v2150_v14 = vmul.f32 %v4893_v24, %v6797_v52  ;;  %v5883_v50 = vsel %vm2232_vm7, %v2218_v2, %v2219_v33 }
 0x319   : > { %3702 = vmatprep.mubr.msk.f32.mxu1 %vm820_vm0, %v2561_v31  ;;  %v2046_v57 = vadd.f32 %v2014_v6, %v1978_v8  ;;  %v1947_v54 = vmul.f32 %v4882_v59, %v5870_v29  ;;  %v2363_v9 = vmul.f32 %v6717_v17, %v5737_v25  ;;  %v1911_v63 = vadd.f32 %v1879_v15, %v1843_v28  ;;  %v5907_v31 = vld [vmem:[%s6517_s7 + $0x8] ss:$0 sm:$0xff] }
 0x31a   : > { %v2220_v61 = vrot.slane %v5333_v3, 1  ;;  %v2530_v51 = vadd.f32 %v2498_v1, %v2462_v18  ;;  %v2015_v0 = vmul.f32 %v4872_v16, %v6789_v27  ;;  %vm2292_vm13 = vcmp.lt.s32.totalorder %v1660_v23, 15 }
 0x31b   : > { %v2114_v32 = vadd.f32 %v2082_v4, %v2046_v57  ;;  %v1979_v55 = vadd.f32 %v1947_v54, %v1911_v63  ;;  %v1401_v49 = vadd.s32 192, %v4829_v44  ;;  %v1699_v2 = vrot.slane %v5333_v3, 7 }
 0x31c   : > { %v2244_v37 = vsel %vm2232_vm7, %v2219_v33, %v2220_v61  ;;  %v2562_v40 = vadd.f32 %v2530_v51, %v6801_v26  ;;  %v2431_v58 = vmul.f32 %v6713_v39, %v5824_v56  ;;  %v2083_v1 = vmul.f32 %v4884_v22, %v6795_v13 }
 0x31d   : > { %v2182_v25 = vadd.f32 %v2150_v14, %v2114_v32  ;;  %v2047_v6 = vadd.f32 %v2015_v0, %v1979_v55  ;;  %v5899_v27 = vsel %vm2292_vm13, %v2244_v37, 0.0  ;;  %v1661_v21 = vand.u32 15, %v1401_v49 }
 0x31e   : > { %v1723_v33 = vsel %vm1711_vm2, %v1698_v7, %v1699_v2  ;;  %3703 = vmatmul.mubr.msk.f32.gmra.mxu1 %vm820_vm0, %v2562_v40  ;;  %v2499_v43 = vmul.f32 %v5907_v31, %v5883_v50  ;;  %v2151_v8 = vmul.f32 %v4893_v24, %v6799_v42  ;;  %v1880_v4 = vmul.f32 %v4870_v38, %v5856_v5  ;;  %v6802_v40 = vld [vmem:[#allocation39_spill] sm:$0xff] }
 0x31f   : > { %v2395_v41 = vadd.f32 %v2363_v9, %v2182_v25  ;;  %v2115_v23 = vadd.f32 %v2083_v1, %v2047_v6  ;;  %v2364_v7 = vmul.f32 %v6717_v17, %v5794_v11  ;;  %vm1772_vm14 = vcmp.ge.s32.totalorder %v1661_v21, 1 }
 0x320   : > { %v1844_v28 = vmul.f32 %v4854_v34, %v5784_v48  ;;  %v2432_v18 = vmul.f32 %v6713_v39, %v5837_v35  ;;  %v2500_v57 = vmul.f32 %v5907_v31, %v5899_v27  ;;  %v5923_v14 = vsel %vm1772_vm14, %v1723_v33, 0.0 }
 0x321   : > { %v2463_v15 = vadd.f32 %v2431_v58, %v2395_v41  ;;  %v2183_v54 = vadd.f32 %v2151_v8, %v2115_v23  ;;  %v1948_v63 = vmul.f32 %v4882_v59, %v5923_v14  ;;  %v2016_v11 = vmul.f32 %v4872_v16, %v6791_v62 }
 0x322   : > { %v1912_v9 = vadd.f32 %v1880_v4, %v1844_v28  ;;  %v2221_v48 = vrot.slane %v5342_v12, 1  ;;  %v1402_v32 = vadd.s32 200, %v4829_v44  ;;  %v1700_v0 = vrot.slane %v5342_v12, 7 }
 0x323   : > { %v2531_v51 = vadd.f32 %v2499_v43, %v2463_v15  ;;  %v2396_v55 = vadd.f32 %v2364_v7, %v2183_v54  ;;  %v1845_v49 = vmul.f32 %v4854_v34, %v5808_v36  ;;  %v1881_v26 = vmul.f32 %v4870_v38, %v5870_v29  ;;  %v6803_v54 = vld [vmem:[#allocation40_spill] sm:$0xff] }
 0x324   : > { %v1980_v37 = vadd.f32 %v1948_v63, %v1912_v9  ;;  %v2084_v62 = vmul.f32 %v4884_v22, %v6797_v52  ;;  %v1662_v58 = vand.u32 15, %v1402_v32  ;;  %v5941_v1 = vsel %vm1711_vm2, %v1699_v2, %v1700_v0 }
 0x325   : > { %v2563_v25 = vadd.f32 %v2531_v51, %v6802_v40  ;;  %v2464_v6 = vadd.f32 %v2432_v18, %v2396_v55  ;;  %v1913_v33 = vadd.f32 %v1881_v26, %v1845_v49  ;;  %v1949_v41 = vmul.f32 %v4882_v59, %v5941_v1  ;;  %v3933_v26 = vld [vmem:[%s6516_s6] ss:$0 sm:$0xff] }
 0x326   : > { %v2048_v21 = vadd.f32 %v2016_v11, %v1980_v37  ;;  %v2152_v36 = vmul.f32 %v4893_v24, %v5333_v3  ;;  %v5950_v43 = vsel %vm2232_vm7, %v2220_v61, %v2221_v48  ;;  %v2365_v8 = vmul.f32 %v6717_v17, %v5824_v56 }
 0x327   : > { %3705 = vmatprep.mubr.msk.f32.mxu1 %vm820_vm0, %v2563_v25  ;;  %v2222_v2 = vrot.slane %v5347_v45, 1  ;;  %v2532_v4 = vadd.f32 %v2500_v57, %v2464_v6  ;;  %v1981_v7 = vadd.f32 %v1949_v41, %v1913_v33  ;;  %v2017_v28 = vmul.f32 %v4872_v16, %v6795_v13 }
 0x328   : > { %v2116_v23 = vadd.f32 %v2084_v62, %v2048_v21  ;;  %vm2294_vm15 = vcmp.lt.s32.totalorder %v1662_v58, 15  ;;  %v1403_v18 = vadd.s32 208, %v4829_v44  ;;  %v1701_v61 = vrot.slane %v5347_v45, 7 }
 0x329   : > { %v2242_v15 = vsel %vm2232_vm7, %v2221_v48, %v2222_v2  ;;  %v2564_v9 = vadd.f32 %v2532_v4, %v6803_v54  ;;  %v2049_v56 = vadd.f32 %v2017_v28, %v1981_v7  ;;  %v2085_v57 = vmul.f32 %v4884_v22, %v6799_v42 }
 0x32a   : > { %v2184_v63 = vadd.f32 %v2152_v36, %v2116_v23  ;;  %v2433_v11 = vmul.f32 %v6713_v39, %v5883_v50  ;;  %v2153_v13 = vmul.f32 %v4893_v24, %v5342_v12  ;;  %v1663_v51 = vand.u32 15, %v1403_v18  ;;  %v6804_v18 = vld [vmem:[#allocation41_spill] sm:$0xff] }
 0x32b   : > { %v1721_v48 = vsel %vm1711_vm2, %v1700_v0, %v1701_v61  ;;  %3706 = vmatmul.mubr.msk.f32.gmra.mxu1 %vm820_vm0, %v2564_v9  ;;  %v2117_v55 = vadd.f32 %v2085_v57, %v2049_v56  ;;  %v5971_v37 = vsel %vm2294_vm15, %v2242_v15, 0.0  ;;  %v1882_v49 = vmul.f32 %v4870_v38, %v5923_v14 }
 0x32c   : > { %v2397_v32 = vadd.f32 %v2365_v8, %v2184_v63  ;;  %v5979_v40 = vadd.f32 %v3933_v26, %v5650_v60  ;;  %v2501_v25 = vmul.f32 %v5907_v31, %v5950_v43  ;;  %vm1774_vm1 = vcmp.ge.s32.totalorder %v1663_v51, 1 }
 0x32d   : > { %v1846_v0 = vmul.f32 %v4854_v34, %v5856_v5  ;;  %v2185_v58 = vadd.f32 %v2153_v13, %v2117_v55  ;;  %v2366_v6 = vmul.f32 %v6717_v17, %v5837_v35  ;;  %v5987_v21 = vsel %vm1774_vm1, %v1721_v48, 0.0 }
 0x32e   : > { %v2465_v62 = vadd.f32 %v2433_v11, %v2397_v32  ;;  %v2434_v33 = vmul.f32 %v6713_v39, %v5899_v27  ;;  %v2502_v60 = vmul.f32 %v5907_v31, %v5971_v37  ;;  %v1950_v36 = vmul.f32 %v4882_v59, %v5987_v21 }
 0x32f   : > { %v1914_v41 = vadd.f32 %v1882_v49, %v1846_v0  ;;  %v2398_v4 = vadd.f32 %v2366_v6, %v2185_v58  ;;  %v2018_v5 = vmul.f32 %v4872_v16, %v6797_v52  ;;  %v1404_v23 = vadd.s32 216, %v4829_v44 }
 0x330   : > { %v2533_v8 = vadd.f32 %v2501_v25, %v2465_v62  ;;  %v2223_v7 = vrot.slane %v5383_v19, 1  ;;  %v1702_v28 = vrot.slane %v5383_v19, 7  ;;  %v1883_v15 = vmul.f32 %v4870_v38, %v5941_v1  ;;  %v6805_v25 = vld [vmem:[#allocation42_spill] sm:$0xff] }
 0x331   : > { %v1982_v35 = vadd.f32 %v1950_v36, %v1914_v41  ;;  %v2466_v9 = vadd.f32 %v2434_v33, %v2398_v4  ;;  %v2086_v63 = vmul.f32 %v4884_v22, %v5333_v3  ;;  %v1847_v56 = vmul.f32 %v4854_v34, %v5870_v29 }
 0x332   : > { %v2565_v54 = vadd.f32 %v2533_v8, %v6804_v18  ;;  %v2154_v57 = vmul.f32 %v4893_v24, %v5347_v45  ;;  %v1664_v11 = vand.u32 15, %v1404_v23  ;;  %v6011_v13 = vsel %vm1711_vm2, %v1701_v61, %v1702_v28 }
 0x333   : > { %v2050_v52 = vadd.f32 %v2018_v5, %v1982_v35  ;;  %v2534_v51 = vadd.f32 %v2502_v60, %v2466_v9  ;;  %v1915_v48 = vadd.f32 %v1883_v15, %v1847_v56  ;;  %v1951_v32 = vmul.f32 %v4882_v59, %v6011_v13 }
 0x334   : > { %3708 = vmatprep.mubr.msk.f32.mxu1 %vm820_vm0, %v2565_v54  ;;  %v2224_v55 = vrot.slane %v5389_v30, 1  ;;  %v6019_v29 = vsel %vm2232_vm7, %v2222_v2, %v2223_v7  ;;  %v2367_v26 = vmul.f32 %v6717_v17, %v5883_v50  ;;  %v2435_v61 = vmul.f32 %v6713_v39, %v5950_v43 }
 0x335   : > { %v2118_v49 = vadd.f32 %v2086_v63, %v2050_v52  ;;  %v2566_v0 = vadd.f32 %v2534_v51, %v6805_v25  ;;  %v1983_v62 = vadd.f32 %v1951_v32, %v1915_v48  ;;  %v2019_v58 = vmul.f32 %v4872_v16, %v6799_v42 }
 0x336   : > { %v1405_v6 = vadd.s32 224, %v4829_v44  ;;  %v2240_v60 = vsel %vm2232_vm7, %v2223_v7, %v2224_v55  ;;  %vm2296_vm3 = vcmp.lt.s32.totalorder %v1664_v11, 15  ;;  %v1703_v2 = vrot.slane %v5389_v30, 7 }
 0x337   : > { %v2186_v33 = vadd.f32 %v2154_v57, %v2118_v49  ;;  %3709 = vmatmul.mubr.msk.f32.gmra.mxu1 %vm820_vm0, %v2566_v0  ;;  %v2051_v50 = vadd.f32 %v2019_v58, %v1983_v62  ;;  %v2087_v41 = vmul.f32 %v4884_v22, %v5342_v12  ;;  %v1884_v8 = vmul.f32 %v4870_v38, %v5987_v21 }
 0x338   : > { %v1665_v36 = vand.u32 15, %v1405_v6  ;;  %v2503_v4 = vmul.f32 %v5907_v31, %v6019_v29  ;;  %v2155_v5 = vmul.f32 %v4893_v24, %v5383_v19  ;;  %v1719_v23 = vsel %vm1711_vm2, %v1702_v28, %v1703_v2 }
 0x339   : > { %v2399_v42 = vadd.f32 %v2367_v26, %v2186_v33  ;;  %v2119_v35 = vadd.f32 %v2087_v41, %v2051_v50  ;;  %v6043_v7 = vsel %vm2296_vm3, %v2240_v60, 0.0  ;;  %v1848_v15 = vmul.f32 %v4854_v34, %v5923_v14 }
 0x33a   : > { %vm1776_vm4 = vcmp.ge.s32.totalorder %v1665_v36, 1  ;;  %v2368_v54 = vmul.f32 %v6717_v17, %v5899_v27  ;;  %v2436_v9 = vmul.f32 %v6713_v39, %v5971_v37  ;;  %v1406_v57 = vadd.s32 232, %v4829_v44 }
 0x33b   : > { %v2467_v18 = vadd.f32 %v2435_v61, %v2399_v42  ;;  %v6051_v63 = vsel %vm1776_vm4, %v1719_v23, 0.0  ;;  %v2187_v56 = vadd.f32 %v2155_v5, %v2119_v35  ;;  %v1916_v52 = vadd.f32 %v1884_v8, %v1848_v15  ;;  %v6806_v61 = vld [vmem:[#allocation43_spill] sm:$0xff]  ;;  %v6809_v15 = vld [vmem:[#allocation44_spill] sm:$0xff] }
 0x33c   : > { %v1952_v28 = vmul.f32 %v4882_v59, %v6051_v63  ;;  %v2504_v14 = vmul.f32 %v5907_v31, %v6043_v7  ;;  %v2225_v51 = vrot.slane %v5434_v46, 1  ;;  %v1704_v27 = vrot.slane %v5434_v46, 7 }
 0x33d   : > { %v2535_v11 = vadd.f32 %v2503_v4, %v2467_v18  ;;  %v2400_v48 = vadd.f32 %v2368_v54, %v2187_v56  ;;  %v2020_v49 = vmul.f32 %v4872_v16, %v5333_v3  ;;  %v1666_v26 = vand.u32 15, %v1406_v57 }
 0x33e   : > { %v1984_v32 = vadd.f32 %v1952_v28, %v1916_v52  ;;  %v6065_v0 = vsel %vm1711_vm2, %v1703_v2, %v1704_v27  ;;  %v1849_v62 = vmul.f32 %v4854_v34, %v5941_v1  ;;  %v1885_v58 = vmul.f32 %v4870_v38, %v6011_v13 }
 0x33f   : > { %v2567_v25 = vadd.f32 %v2535_v11, %v6806_v61  ;;  %v2468_v6 = vadd.f32 %v2436_v9, %v2400_v48  ;;  %v2088_v60 = vmul.f32 %v4884_v22, %v5347_v45  ;;  %v1953_v3 = vmul.f32 %v4882_v59, %v6065_v0 }
 0x340   : > { %v2052_v33 = vadd.f32 %v2020_v49, %v1984_v32  ;;  %v2156_v2 = vmul.f32 %v4893_v24, %v5389_v30  ;;  %v6080_v50 = vsel %vm2232_vm7, %v2224_v55, %v2225_v51  ;;  %v1917_v1 = vadd.f32 %v1885_v58, %v1849_v62 }
 0x341   : > { %3711 = vmatprep.mubr.msk.f32.mxu1 %vm820_vm0, %v2567_v25  ;;  %v2226_v41 = vrot.slane %v5439_v10, 1  ;;  %v2536_v36 = vadd.f32 %v2504_v14, %v2468_v6  ;;  %v2021_v42 = vmul.f32 %v4872_v16, %v5342_v12  ;;  %vm6085_vm5 = vcmp.lt.s32.totalorder %v1666_v26, 15 }
 0x342   : > { %v2120_v8 = vadd.f32 %v2088_v60, %v2052_v33  ;;  %v1985_v5 = vadd.f32 %v1953_v3, %v1917_v1  ;;  %v1407_v35 = vadd.s32 240, %v4829_v44  ;;  %v1705_v55 = vrot.slane %v5439_v10, 7 }
 0x343   : > { %v2238_v23 = vsel %vm2232_vm7, %v2225_v51, %v2226_v41  ;;  %v2568_v18 = vadd.f32 %v2536_v36, %v6809_v15  ;;  %v2369_v9 = vmul.f32 %v6717_v17, %v5950_v43  ;;  %v2437_v12 = vmul.f32 %v6713_v39, %v6019_v29 }
 0x344   : > { %v2188_v54 = vadd.f32 %v2156_v2, %v2120_v8  ;;  %v2053_v56 = vadd.f32 %v2021_v42, %v1985_v5  ;;  %v2089_v52 = vmul.f32 %v4884_v22, %v5383_v19  ;;  %v1667_v28 = vand.u32 15, %v1407_v35  ;;  %v6810_v42 = vld [vmem:[#allocation45_spill] sm:$0xff] }
 0x345   : > { %v1717_v57 = vsel %vm1711_vm2, %v1704_v27, %v1705_v55  ;;  %3712 = vmatmul.mubr.msk.f32.gmra.mxu1 %vm820_vm0, %v2568_v18  ;;  %v2505_v14 = vmul.f32 %v5907_v31, %v6080_v50  ;;  %v6107_v43 = vsel %vm6085_vm5, %v2238_v23, 0.0  ;;  %v1886_v51 = vmul.f32 %v4870_v38, %v6051_v63 }
 0x346   : > { %v2401_v11 = vadd.f32 %v2369_v9, %v2188_v54  ;;  %v2121_v48 = vadd.f32 %v2089_v52, %v2053_v56  ;;  %v2157_v32 = vmul.f32 %v4893_v24, %v5434_v46  ;;  %vm1778_vm6 = vcmp.ge.s32.totalorder %v1667_v28, 1 }
 0x347   : > { %v1850_v27 = vmul.f32 %v4854_v34, %v5987_v21  ;;  %v2370_v26 = vmul.f32 %v6717_v17, %v5971_v37  ;;  %v2438_v61 = vmul.f32 %v6713_v39, %v6043_v7  ;;  %v6119_v25 = vsel %vm1778_vm6, %v1717_v57, 0.0 }
 0x348   : > { %v2469_v49 = vadd.f32 %v2437_v12, %v2401_v11  ;;  %v2189_v62 = vadd.f32 %v2157_v32, %v2121_v48  ;;  %v2506_v58 = vmul.f32 %v5907_v31, %v6107_v43  ;;  %v1954_v33 = vmul.f32 %v4882_v59, %v6119_v25  ;;  %v6811_v32 = vld [vmem:[#allocation46_spill] sm:$0xff] }
 0x349   : > { %v1918_v6 = vadd.f32 %v1886_v51, %v1850_v27  ;;  %v2022_v21 = vmul.f32 %v4872_v16, %v5347_v45  ;;  %v1408_v3 = vadd.s32 248, %v4829_v44  ;;  %v1706_v37 = vrot.slane %v5466_v47, 7 }
 0x34a   : > { %v2537_v60 = vadd.f32 %v2505_v14, %v2469_v49  ;;  %v2402_v2 = vadd.f32 %v2370_v26, %v2189_v62  ;;  %v1851_v36 = vmul.f32 %v4854_v34, %v6011_v13  ;;  %v1887_v8 = vmul.f32 %v4870_v38, %v6065_v0 }
 0x34b   : > { %v1986_v1 = vadd.f32 %v1954_v33, %v1918_v6  ;;  %v2090_v5 = vmul.f32 %v4884_v22, %v5389_v30  ;;  %v2227_v23 = vrot.slane %v5466_v47, 1  ;;  %v6139_v45 = vsel %vm1711_vm2, %v1705_v55, %v1706_v37 }
 0x34c   : > { %v2569_v4 = vadd.f32 %v2537_v60, %v6810_v42  ;;  %v2470_v35 = vadd.f32 %v2438_v61, %v2402_v2  ;;  %v1919_v18 = vadd.f32 %v1887_v8, %v1851_v36  ;;  %v1955_v13 = vmul.f32 %v4882_v59, %v6139_v45 }
 0x34d   : > { %v2054_v15 = vadd.f32 %v2022_v21, %v1986_v1  ;;  %v1708_v54 = vrot.slane %v5979_v40, 7  ;;  %v2158_v9 = vmul.f32 %v4893_v24, %v5439_v10  ;;  %v1668_v12 = vand.u32 15, %v1408_v3 }
 0x34e   : > { %3714 = vmatprep.mubr.msk.f32.mxu1 %vm820_vm0, %v2569_v4  ;;  %v2023_v56 = vmul.f32 %v4872_v16, %v5383_v19  ;;  %v2538_v52 = vadd.f32 %v2506_v58, %v2470_v35  ;;  %v1987_v28 = vadd.f32 %v1955_v13, %v1919_v18  ;;  %v2228_v57 = vrot.slane %v5473_v53, 1 }
 0x34f   : > { %v2122_v55 = vadd.f32 %v2090_v5, %v2054_v15  ;;  %v6152_v11 = vsel %vm2232_vm7, %v2226_v41, %v2227_v23  ;;  %v2371_v14 = vmul.f32 %v6717_v17, %v6019_v29  ;;  %v2439_v51 = vmul.f32 %v6713_v39, %v6080_v50 }
 0x350   : > { %v1409_v48 = vadd.s32 256, %v4829_v44  ;;  %v2570_v27 = vadd.f32 %v2538_v52, %v6811_v32  ;;  %v2055_v49 = vadd.f32 %v2023_v56, %v1987_v28  ;;  %v2091_v26 = vmul.f32 %v4884_v22, %v5434_v46 }
 0x351   : > { %v2190_v19 = vadd.f32 %v2158_v9, %v2122_v55  ;;  %v2159_v61 = vmul.f32 %v4893_v24, %v5466_v47  ;;  %v1715_v29 = vsel %vm1711_vm2, %v1706_v37, %v1707_v20  ;;  %v1888_v62 = vmul.f32 %v4870_v38, %v6119_v25 }
 0x352   : > { %v1669_v41 = vand.u32 15, %v1409_v48  ;;  %3715 = vmatmul.mubr.msk.f32.gmra.mxu1 %vm820_vm0, %v2570_v27  ;;  %v2123_v6 = vadd.f32 %v2091_v26, %v2055_v49  ;;  %v2236_v33 = vsel %vm2232_vm7, %v2227_v23, %v2228_v57  ;;  %vm2300_vm8 = vcmp.lt.s32.totalorder %v1668_v12, 15  ;;  %v6812_v12 = vld [vmem:[#allocation47_spill] sm:$0xff] }
 0x353   : > { %v2403_v58 = vadd.f32 %v2371_v14, %v2190_v19  ;;  %v2507_v60 = vmul.f32 %v5907_v31, %v6152_v11  ;;  %v2372_v21 = vmul.f32 %v6717_v17, %v6043_v7  ;;  %v1852_v3 = vmul.f32 %v4854_v34, %v6051_v63 }
 0x354   : > { %vm1780_vm9 = vcmp.ge.s32.totalorder %v1669_v41, 1  ;;  %v2191_v2 = vadd.f32 %v2159_v61, %v2123_v6  ;;  %v2440_v1 = vmul.f32 %v6713_v39, %v6107_v43  ;;  %v6181_v8 = vsel %vm2300_vm8, %v2236_v33, 0.0  ;;  %v6813_v61 = vld [vmem:[#allocation48_spill] sm:$0xff] }
 0x355   : > { %v2471_v37 = vadd.f32 %v2439_v51, %v2403_v58  ;;  %v1816_v36 = vsel %vm1780_vm9, %v1715_v29, 0.0  ;;  %v1920_v42 = vadd.f32 %v1888_v62, %v1852_v3  ;;  %v1410_v5 = vadd.s32 264, %v4829_v44  ;;  %v6814_v62 = vld [vmem:[#allocation64_spill] sm:$0xff]  ;;  %v6815_v3 = vld [vmem:[#allocation62_spill] sm:$0xff] }
 0x356   : > { %v1956_v4 = vmul.f32 %v4882_v59, %v1816_v36  ;;  %v2404_v35 = vadd.f32 %v2372_v21, %v2191_v2  ;;  %v2024_v7 = vmul.f32 %v4872_v16, %v5389_v30  ;;  %v1714_v63 = vsel %vm1711_vm2, %v1707_v20, %v1708_v54 }
 0x357   : > { %v2539_v23 = vadd.f32 %v2507_v60, %v2471_v37  ;;  %v2229_v18 = vrot.slane %v5979_v40, 1  ;;  %v1853_v13 = vmul.f32 %v4854_v34, %v6065_v0  ;;  %v1889_v9 = vmul.f32 %v4870_v38, %v6139_v45 }
 0x358   : > { %v1988_v15 = vadd.f32 %v1956_v4, %v1920_v42  ;;  %v2472_v52 = vadd.f32 %v2440_v1, %v2404_v35  ;;  %v2508_v30 = vmul.f32 %v5907_v31, %v6181_v8  ;;  %v1957_v55 = vmul.f32 %v4882_v59, %v1714_v63 }
 0x359   : > { %v2571_v56 = vadd.f32 %v2539_v23, %v6812_v12  ;;  %v2092_v20 = vmul.f32 %v4884_v22, %v5439_v10  ;;  %v1670_v14 = vand.u32 15, %v1410_v5  ;;  %v1921_v51 = vadd.f32 %v1889_v9, %v1853_v13 }
 0x35a   : > { %v2056_v28 = vadd.f32 %v2024_v7, %v1988_v15  ;;  %v2540_v0 = vadd.f32 %v2508_v30, %v2472_v52  ;;  %v2160_v48 = vmul.f32 %v4893_v24, %v5473_v53  ;;  %v2373_v32 = vmul.f32 %v6717_v17, %v6080_v50 }
 0x35b   : > { %3717 = vmatprep.mubr.msk.f32.mxu1 %vm820_vm0, %v2571_v56  ;;  %v2235_v19 = vsel %vm2232_vm7, %v2228_v57, %v2229_v18  ;;  %v1989_v49 = vadd.f32 %v1957_v55, %v1921_v51  ;;  %v2025_v26 = vmul.f32 %v4872_v16, %v5434_v46  ;;  %v2093_v29 = vmul.f32 %v4884_v22, %v5466_v47 }
 0x35c   : > { %v2124_v27 = vadd.f32 %v2092_v20, %v2056_v28  ;;  %v2572_v41 = vadd.f32 %v2540_v0, %v6813_v61  ;;  %v2234_v58 = vsel %vm2232_vm7, %v2229_v18, %v6814_v62  ;;  %v1411_v6 = vadd.s32 272, %v4829_v44  ;;  %v6816_v28 = vld [vmem:[#allocation49_spill] sm:$0xff] }
 0x35d   : > { %v2057_v33 = vadd.f32 %v2025_v26, %v1989_v49  ;;  %vm2302_vm10 = vcmp.lt.s32.totalorder %v1670_v14, 15  ;;  %v1890_v57 = vmul.f32 %v4870_v38, %v1816_v36  ;;  %v2441_v46 = vmul.f32 %v6713_v39, %v6152_v11 }
 0x35e   : > { %v2192_v50 = vadd.f32 %v2160_v48, %v2124_v27  ;;  %3718 = vmatmul.mubr.msk.f32.gmra.mxu1 %vm820_vm0, %v2572_v41  ;;  %v2509_v60 = vmul.f32 %v5907_v31, %v2235_v19  ;;  %v1671_v21 = vand.u32 15, %v1411_v6  ;;  %v1713_v37 = vsel %vm1711_vm2, %v1708_v54, %v6815_v3  ;;  %v6817_v27 = vld [vmem:[#allocation50_spill] sm:$0xff] }
 0x35f   : > { %v2125_v1 = vadd.f32 %v2093_v29, %v2057_v33  ;;  %v2161_v42 = vmul.f32 %v4893_v24, %v5979_v40  ;;  %v1854_v36 = vmul.f32 %v4854_v34, %v6119_v25  ;;  %v2338_v4 = vsel %vm2302_vm10, %v2234_v58, 0.0 }
 0x360   : > { %v2405_v2 = vadd.f32 %v2373_v32, %v2192_v50  ;;  %v2374_v5 = vmul.f32 %v6717_v17, %v6107_v43  ;;  %vm1782_vm7 = vcmp.ge.s32.totalorder %v1671_v21, 1  ;;  %v1412_v23 = vadd.s32 280, %v4829_v44 }
 0x361   : > { %v2193_v7 = vadd.f32 %v2161_v42, %v2125_v1  ;;  %v1818_v15 = vsel %vm1782_vm7, %v1713_v37, 0.0  ;;  %v1922_v18 = vadd.f32 %v1890_v57, %v1854_v36  ;;  %v1855_v13 = vmul.f32 %v4854_v34, %v6139_v45  ;;  %v6818_v57 = vld [vmem:[#allocation51_spill] sm:$0xff] }
 0x362   : > { %v2473_v35 = vadd.f32 %v2441_v46, %v2405_v2  ;;  %v1958_v54 = vmul.f32 %v4882_v59, %v1818_v15  ;;  %v1891_v9 = vmul.f32 %v4870_v38, %v1714_v63  ;;  %v1959_v25 = vmul.f32 %v4882_v59, %v6815_v3 }
 0x363   : > { %v2406_v56 = vadd.f32 %v2374_v5, %v2193_v7  ;;  %v2442_v43 = vmul.f32 %v6713_v39, %v6181_v8  ;;  %v2026_v52 = vmul.f32 %v4872_v16, %v5439_v10  ;;  %v1672_v30 = vand.u32 15, %v1412_v23 }
 0x364   : > { %v2541_v12 = vadd.f32 %v2509_v60, %v2473_v35  ;;  %v1990_v44 = vadd.f32 %v1958_v54, %v1922_v18  ;;  %v1923_v55 = vadd.f32 %v1891_v9, %v1855_v13  ;;  %v2510_v34 = vmul.f32 %v5907_v31, %v2338_v4  ;;  %v6819_v60 = vld [vmem:[#allocation52_spill] sm:$0xff] }
 0x365   : > { %v2474_v14 = vadd.f32 %v2442_v43, %v2406_v56  ;;  %v2094_v38 = vmul.f32 %v4884_v22, %v5473_v53  ;;  %v2162_v45 = vmul.f32 0.0, %v4893_v24  ;;  %v2027_v51 = vmul.f32 %v4872_v16, %v5466_v47 }
 0x366   : > { %v2573_v20 = vadd.f32 %v2541_v12, %v6816_v28  ;;  %v2058_v59 = vadd.f32 %v2026_v52, %v1990_v44  ;;  %v1991_v63 = vadd.f32 %v1959_v25, %v1923_v55  ;;  %v2095_v32 = vmul.f32 %v4884_v22, %v5979_v40 }
 0x367   : > { %v2542_v10 = vadd.f32 %v2510_v34, %v2474_v14  ;;  %vm2304_vm2 = vcmp.lt.s32.totalorder %v1672_v30, 15  ;;  %v2375_v53 = vmul.f32 %v6717_v17, %v6152_v11  ;;  %v2443_v16 = vmul.f32 %v6713_v39, %v2235_v19 }
 0x368   : > { %3720 = vmatprep.mubr.msk.f32.mxu1 %vm820_vm0, %v2573_v20  ;;  %v2126_v0 = vadd.f32 %v2094_v38, %v2058_v59  ;;  %v2059_v48 = vadd.f32 %v2027_v51, %v1991_v63  ;;  %v2340_v47 = vsel %vm2304_vm2, %v6814_v62, 0.0  ;;  %v2511_v41 = vmul.f32 %v5907_v31, %v6814_v62 }
 0x369   : > { %v2574_v49 = vadd.f32 %v2542_v10, %v6817_v27  ;;  %v2376_v22 = vmul.f32 %v6717_v17, %v6181_v8  ;;  %v2444_v6 = vmul.f32 %v6713_v39, %v2338_v4  ;;  %v2512_v11 = vmul.f32 %v5907_v31, %v2340_v47  ;;  %v6276_v17 = vld [vmem:[%s6820_s30] ss:$0 sm:$0xff] }
 0x36a   : > { %v2194_v26 = vadd.f32 %v2162_v45, %v2126_v0  ;;  %v2127_v24 = vadd.f32 %v2095_v32, %v2059_v48  ;;  %v3935_v47 = vld [vmem:[%s4350_s11] sm:$0xff] }
 0x36b   : > { %3721 = vmatmul.mubr.msk.f32.gmra.mxu1 %vm820_vm0, %v2574_v49  ;;  %v3934_v49 = vld [vmem:[%s4350_s11 + $0x8] sm:$0xff] }
 0x36c   : > { %v2407_v61 = vadd.f32 %v2375_v53, %v2194_v26  ;;  %v2195_v29 = vadd.f32 %v2162_v45, %v2127_v24 }
 0x36e   : > { %v2475_v40 = vadd.f32 %v2443_v16, %v2407_v61  ;;  %v2408_v58 = vadd.f32 %v2376_v22, %v2195_v29 }
 0x370   : > { %v2543_v50 = vadd.f32 %v2511_v41, %v2475_v40  ;;  %v2476_v33 = vadd.f32 %v2444_v6, %v2408_v58 }
 0x372   : > { %v2575_v19 = vadd.f32 %v2543_v50, %v6818_v57  ;;  %v2544_v46 = vadd.f32 %v2512_v11, %v2476_v33 }
 0x374   : > { %3723 = vmatprep.mubr.msk.f32.mxu1 %vm820_vm0, %v2575_v19  ;;  %v2576_v21 = vadd.f32 %v2544_v46, %v6819_v60 }
 0x376   : > { %3724 = vmatmul.mubr.msk.f32.gmra.mxu1 %vm820_vm0, %v2576_v21  ;;  %v3680_v8 = vpop.f32.mrf.mxu1 }
 0x377   : > { %v2760_v39 = vadd.f32 %v3680_v8, %v6276_v17 }
 0x378   : > { %v2754_v31 = vpop.f32.mrf.mxu1 }
 0x379   : > { %v2946_v62 = vmul.f32 0.044715, %v2760_v39  ;;  %v2755_v3 = vadd.f32 %v6276_v17, %v2754_v31  ;;  %v2914_v38 = vmul.f32 0.5, %v2760_v39 }
 0x37b   : > { %v2978_v37 = vmul.f32 %v2946_v62, %v2760_v39  ;;  %v2945_v2 = vmul.f32 0.044715, %v2755_v3  ;;  %v2913_v0 = vmul.f32 0.5, %v2755_v3 }
 0x37d   : > { %v3010_v1 = vmul.f32 %v2978_v37, %v2760_v39  ;;  %v2977_v42 = vmul.f32 %v2945_v2, %v2755_v3  ;;  %v3936_v37 = vld [vmem:[%s4350_s11 + $0x18] sm:$0xff] }
 0x37f   : > { %v3042_v36 = vadd.f32 %v3010_v1, %v2760_v39  ;;  %v3009_v4 = vmul.f32 %v2977_v42, %v2755_v3 }
 0x381   : > { %v3074_v5 = vmul.f32 0.7978846, %v3042_v36  ;;  %v3041_v23 = vadd.f32 %v3009_v4, %v2755_v3  ;;  %v3937_v4 = vld [vmem:[%s4350_s11 + $0x10] sm:$0xff] }
 0x383   : > { %3867 = vtanh.f32 %v3074_v5  ;;  %v3073_v35 = vmul.f32 0.7978846, %v3041_v23 }
 0x384   : > { %v3683_v7 = vpop.f32.mrf.mxu1 }
 0x385   : > { %v2770_v15 = vadd.f32 %v3683_v7, %v6276_v17  ;;  %3869 = vtanh.f32 %v3073_v35 }
 0x386   : > { %v2764_v18 = vpop.f32.mrf.mxu1 }
 0x387   : > { %v2948_v54 = vmul.f32 0.044715, %v2770_v15  ;;  %v2765_v13 = vadd.f32 %v6276_v17, %v2764_v18  ;;  %v2916_v33 = vmul.f32 0.5, %v2770_v15 }
 0x389   : > { %v2980_v9 = vmul.f32 %v2948_v54, %v2770_v15  ;;  %v2947_v25 = vmul.f32 0.044715, %v2765_v13  ;;  %v2915_v39 = vmul.f32 0.5, %v2765_v13 }
 0x38b   : > { %v3012_v12 = vmul.f32 %v2980_v9, %v2770_v15  ;;  %v2979_v56 = vmul.f32 %v2947_v25, %v2765_v13 }
 0x38d   : > { %v3044_v43 = vadd.f32 %v3012_v12, %v2770_v15  ;;  %v3011_v44 = vmul.f32 %v2979_v56, %v2765_v13 }
 0x38f   : > { %v3076_v52 = vmul.f32 0.7978846, %v3044_v43  ;;  %v3043_v30 = vadd.f32 %v3011_v44, %v2765_v13 }
 0x390   : > { %v3686_v55 = vpop.f32.mrf.mxu1  ;;  %v3868_v20 = vpop.eup %3867 }
 0x391   : > { %v6283_v28 = vadd.f32 %v3686_v55, %v6276_v17  ;;  %3871 = vtanh.f32 %v3076_v52  ;;  %v3075_v14 = vmul.f32 0.7978846, %v3043_v30  ;;  %v3138_v59 = vadd.f32 1.0, %v3868_v20 }
 0x392   : > { %v2774_v34 = vpop.f32.mrf.mxu1  ;;  %v3870_v51 = vpop.eup %3869 }
 0x393   : > { %v2950_v45 = vmul.f32 0.044715, %v6283_v28  ;;  %v6287_v63 = vadd.f32 %v6276_v17, %v2774_v34  ;;  %3873 = vtanh.f32 %v3075_v14  ;;  %v3170_v10 = vmul.f32 %v3138_v59, %v2914_v38  ;;  %v3938_v34 = vld [vmem:[%s4350_s11 + $0x28] sm:$0xff] }
 0x394   : > { %v3137_v48 = vadd.f32 1.0, %v3870_v51  ;;  %v2918_v9 = vmul.f32 0.5, %v6283_v28 }
 0x395   : > { %v2982_v32 = vmul.f32 %v2950_v45, %v6283_v28  ;;  %v2949_v27 = vmul.f32 0.044715, %v6287_v63  ;;  %v3202_v26 = vadd.f32 %v3934_v49, %v3170_v10  ;;  %v2917_v55 = vmul.f32 0.5, %v6287_v63  ;;  %v3939_v10 = vld [vmem:[%s4350_s11 + $0x20] sm:$0xff] }
 0x396   : > { %v3169_v53 = vmul.f32 %v3137_v48, %v2913_v0 }
 0x397   : > { %v3014_v24 = vmul.f32 %v2982_v32, %v6283_v28  ;;  %v2981_v16 = vmul.f32 %v2949_v27, %v6287_v63  ;;  %3234 = vst [vmem:[%s6296_s26 + $0x8] sm:$0xff] %v3202_v26 }
 0x398   : > { %v3201_v61 = vadd.f32 %v3935_v47, %v3169_v53 }
 0x399   : > { %v3046_v41 = vadd.f32 %v3014_v24, %v6283_v28  ;;  %v3013_v29 = vmul.f32 %v2981_v16, %v6287_v63 }
 0x39a   : > { %3233 = vst [vmem:[%s6296_s26] sm:$0xff] %v3201_v61 }
 0x39b   : > { %v3078_v22 = vmul.f32 0.7978846, %v3046_v41  ;;  %v3045_v40 = vadd.f32 %v3013_v29, %v6287_v63 }
 0x39d   : > { %3875 = vtanh.f32 %v3078_v22  ;;  %v3077_v58 = vmul.f32 0.7978846, %v3045_v40 }
 0x39e   : > { %v3872_v11 = vpop.eup %3871 }
 0x39f   : > { %v3689_v6 = vpop.f32.mrf.mxu1  ;;  %v3140_v57 = vadd.f32 1.0, %v3872_v11  ;;  %3877 = vtanh.f32 %v3077_v58 }
 0x3a0   : > { %v6305_v50 = vadd.f32 %v3689_v6, %v6276_v17  ;;  %v3874_v46 = vpop.eup %3873 }
 0x3a1   : > { %v2784_v19 = vpop.f32.mrf.mxu1  ;;  %v3172_v8 = vmul.f32 %v3140_v57, %v2916_v33  ;;  %v3139_v31 = vadd.f32 1.0, %v3874_v46  ;;  %v3940_v46 = vld [vmem:[%s4350_s11 + $0x38] sm:$0xff] }
 0x3a2   : > { %v2952_v60 = vmul.f32 0.044715, %v6305_v50  ;;  %v6309_v21 = vadd.f32 %v6276_v17, %v2784_v19  ;;  %v2920_v41 = vmul.f32 0.5, %v6305_v50 }
 0x3a3   : > { %v3204_v2 = vadd.f32 %v3936_v37, %v3172_v8  ;;  %v3171_v1 = vmul.f32 %v3139_v31, %v2915_v39  ;;  %v3941_v31 = vld [vmem:[%s4350_s11 + $0x30] sm:$0xff] }
 0x3a4   : > { %v2984_v62 = vmul.f32 %v2952_v60, %v6305_v50  ;;  %v2951_v3 = vmul.f32 0.044715, %v6309_v21  ;;  %v2919_v11 = vmul.f32 0.5, %v6309_v21 }
 0x3a5   : > { %3236 = vst [vmem:[%s6296_s26 + $0x18] sm:$0xff] %v3204_v2  ;;  %v3203_v5 = vadd.f32 %v3937_v4, %v3171_v1 }
 0x3a6   : > { %v3016_v42 = vmul.f32 %v2984_v62, %v6305_v50  ;;  %v2983_v36 = vmul.f32 %v2951_v3, %v6309_v21 }
 0x3a7   : > { %3235 = vst [vmem:[%s6296_s26 + $0x10] sm:$0xff] %v3203_v5 }
 0x3a8   : > { %v3048_v23 = vadd.f32 %v3016_v42, %v6305_v50  ;;  %v3015_v35 = vmul.f32 %v2983_v36, %v6309_v21 }
 0x3aa   : > { %v3080_v7 = vmul.f32 0.7978846, %v3048_v23  ;;  %v3047_v15 = vadd.f32 %v3015_v35, %v6309_v21  ;;  %v3876_v54 = vpop.eup %3875 }
 0x3ab   : > { %v3692_v18 = vpop.f32.mrf.mxu1  ;;  %v3142_v25 = vadd.f32 1.0, %v3876_v54 }
 0x3ac   : > { %v6323_v13 = vadd.f32 %v3692_v18, %v6276_v17  ;;  %3879 = vtanh.f32 %v3080_v7  ;;  %v3079_v12 = vmul.f32 0.7978846, %v3047_v15  ;;  %v3878_v52 = vpop.eup %3877 }
 0x3ad   : > { %v2794_v56 = vpop.f32.mrf.mxu1  ;;  %v3174_v30 = vmul.f32 %v3142_v25, %v2918_v9  ;;  %v3141_v20 = vadd.f32 1.0, %v3878_v52 }
 0x3ae   : > { %v2954_v43 = vmul.f32 0.044715, %v6323_v13  ;;  %v6328_v44 = vadd.f32 %v6276_v17, %v2794_v56  ;;  %3881 = vtanh.f32 %v3079_v12  ;;  %v2922_v4 = vmul.f32 0.5, %v6323_v13 }
 0x3af   : > { %v3206_v38 = vadd.f32 %v3938_v34, %v3174_v30  ;;  %v3173_v59 = vmul.f32 %v3141_v20, %v2917_v55  ;;  %v3943_v20 = vld [vmem:[%s4350_s11 + $0x40] sm:$0xff] }
 0x3b0   : > { %v2986_v28 = vmul.f32 %v2954_v43, %v6323_v13  ;;  %v2953_v14 = vmul.f32 0.044715, %v6328_v44  ;;  %v2921_v9 = vmul.f32 0.5, %v6328_v44 }
 0x3b1   : > { %3238 = vst [vmem:[%s6296_s26 + $0x28] sm:$0xff] %v3206_v38  ;;  %v3205_v0 = vadd.f32 %v3939_v10, %v3173_v59 }
 0x3b2   : > { %v3018_v45 = vmul.f32 %v2986_v28, %v6323_v13  ;;  %v2985_v51 = vmul.f32 %v2953_v14, %v6328_v44 }
 0x3b3   : > { %3237 = vst [vmem:[%s6296_s26 + $0x20] sm:$0xff] %v3205_v0 }
 0x3b4   : > { %v3050_v48 = vadd.f32 %v3018_v45, %v6323_v13  ;;  %v3017_v32 = vmul.f32 %v2985_v51, %v6328_v44  ;;  %v3942_v13 = vld [vmem:[%s4350_s11 + $0x48] sm:$0xff] }
 0x3b5   : > { %v3661_v53 = vpop.f32.mrf.mxu0 }
 0x3b6   : > { %v3082_v63 = vmul.f32 0.7978846, %v3050_v48  ;;  %v3049_v27 = vadd.f32 %v3017_v32, %v6328_v44 }
 0x3b7   : > { %v811_v61 = vpop.f32.mrf.mxu0 }
 0x3b8   : > { %3883 = vtanh.f32 %v3082_v63  ;;  %v3081_v49 = vmul.f32 0.7978846, %v3049_v27 }
 0x3b9   : > { %v3695_v26 = vpop.f32.mrf.mxu1  ;;  %v3880_v16 = vpop.eup %3879 }
 0x3ba   : > { %v6343_v24 = vadd.f32 %v3695_v26, %v6276_v17  ;;  %3885 = vtanh.f32 %v3081_v49  ;;  %v3144_v29 = vadd.f32 1.0, %v3880_v16 }
 0x3bb   : > { %v2804_v47 = vpop.f32.mrf.mxu1  ;;  %v3882_v58 = vpop.eup %3881 }
 0x3bc   : > { %v2956_v22 = vmul.f32 0.044715, %v6343_v24  ;;  %v6348_v40 = vadd.f32 %v6276_v17, %v2804_v47  ;;  %v3176_v6 = vmul.f32 %v3144_v29, %v2920_v41  ;;  %v3143_v33 = vadd.f32 1.0, %v3882_v58  ;;  %v3944_v41 = vld [vmem:[%s4350_s11 + $0x58] sm:$0xff] }
 0x3bd   : > { %v2924_v48 = vmul.f32 0.5, %v6343_v24 }
 0x3be   : > { %v2988_v57 = vmul.f32 %v2956_v22, %v6343_v24  ;;  %v2955_v19 = vmul.f32 0.044715, %v6348_v40  ;;  %v3208_v60 = vadd.f32 %v3940_v46, %v3176_v6  ;;  %v3175_v50 = vmul.f32 %v3143_v33, %v2919_v11  ;;  %v3945_v11 = vld [vmem:[%s4350_s11 + $0x50] sm:$0xff] }
 0x3bf   : > { %v2923_v16 = vmul.f32 0.5, %v6348_v40 }
 0x3c0   : > { %v3020_v8 = vmul.f32 %v2988_v57, %v6343_v24  ;;  %v2987_v39 = vmul.f32 %v2955_v19, %v6348_v40  ;;  %3240 = vst [vmem:[%s6296_s26 + $0x38] sm:$0xff] %v3208_v60  ;;  %v3207_v62 = vadd.f32 %v3941_v31, %v3175_v50 }
 0x3c2   : > { %v3052_v3 = vadd.f32 %v3020_v8, %v6343_v24  ;;  %v3019_v37 = vmul.f32 %v2987_v39, %v6348_v40  ;;  %3239 = vst [vmem:[%s6296_s26 + $0x30] sm:$0xff] %v3207_v62 }
 0x3c4   : > { %v3084_v21 = vmul.f32 0.7978846, %v3052_v3  ;;  %v3051_v2 = vadd.f32 %v3019_v37, %v6348_v40 }
 0x3c5   : > { %v3698_v1 = vpop.f32.mrf.mxu1  ;;  %v3884_v42 = vpop.eup %3883 }
 0x3c6   : > { %3887 = vtanh.f32 %v3084_v21  ;;  %v2820_v36 = vadd.f32 %v3698_v1, %v6276_v17  ;;  %v3146_v5 = vadd.f32 1.0, %v3884_v42  ;;  %v3083_v23 = vmul.f32 0.7978846, %v3051_v2 }
 0x3c7   : > { %v2814_v35 = vpop.f32.mrf.mxu1  ;;  %v3886_v7 = vpop.eup %3885 }
 0x3c8   : > { %v2958_v15 = vmul.f32 0.044715, %v2820_v36  ;;  %v6365_v18 = vadd.f32 %v6276_v17, %v2814_v35  ;;  %v3178_v54 = vmul.f32 %v3146_v5, %v2922_v4  ;;  %v3145_v25 = vadd.f32 1.0, %v3886_v7 }
 0x3c9   : > { %3889 = vtanh.f32 %v3083_v23  ;;  %v2926_v39 = vmul.f32 0.5, %v2820_v36  ;;  %v3946_v23 = vld [vmem:[%s4350_s11 + $0x68] sm:$0xff] }
 0x3ca   : > { %v2990_v12 = vmul.f32 %v2958_v15, %v2820_v36  ;;  %v2957_v56 = vmul.f32 0.044715, %v6365_v18  ;;  %v3210_v43 = vadd.f32 %v3942_v13, %v3178_v54  ;;  %v3177_v52 = vmul.f32 %v3145_v25, %v2921_v9  ;;  %v3947_v54 = vld [vmem:[%s4350_s11 + $0x60] sm:$0xff] }
 0x3cb   : > { %v2925_v1 = vmul.f32 0.5, %v6365_v18 }
 0x3cc   : > { %v3022_v30 = vmul.f32 %v2990_v12, %v2820_v36  ;;  %v2989_v55 = vmul.f32 %v2957_v56, %v6365_v18  ;;  %3242 = vst [vmem:[%s6296_s26 + $0x48] sm:$0xff] %v3210_v43  ;;  %v3209_v28 = vadd.f32 %v3943_v20, %v3177_v52 }
 0x3ce   : > { %v3054_v14 = vadd.f32 %v3022_v30, %v2820_v36  ;;  %v3021_v34 = vmul.f32 %v2989_v55, %v6365_v18  ;;  %3241 = vst [vmem:[%s6296_s26 + $0x40] sm:$0xff] %v3209_v28 }
 0x3d0   : > { %v3086_v38 = vmul.f32 0.7978846, %v3054_v14  ;;  %v3053_v44 = vadd.f32 %v3021_v34, %v6365_v18 }
 0x3d2   : > { %v3701_v59 = vpop.f32.mrf.mxu1  ;;  %3891 = vtanh.f32 %v3086_v38  ;;  %v3085_v45 = vmul.f32 0.7978846, %v3053_v44 }
 0x3d3   : > { %v2830_v51 = vadd.f32 %v3701_v59, %v6276_v17  ;;  %v3888_v10 = vpop.eup %3887 }
 0x3d4   : > { %v2824_v0 = vpop.f32.mrf.mxu1  ;;  %v3148_v32 = vadd.f32 1.0, %v3888_v10  ;;  %3893 = vtanh.f32 %v3085_v45  ;;  %v3948_v10 = vld [vmem:[%s4350_s11 + $0x78] sm:$0xff] }
 0x3d5   : > { %v2960_v63 = vmul.f32 0.044715, %v2830_v51  ;;  %v6379_v27 = vadd.f32 %v6276_v17, %v2824_v0  ;;  %v2928_v30 = vmul.f32 0.5, %v2830_v51 }
 0x3d6   : > { %v3890_v49 = vpop.eup %3889  ;;  %v3180_v26 = vmul.f32 %v3148_v32, %v2924_v48 }
 0x3d7   : > { %v2992_v53 = vmul.f32 %v2960_v63, %v2830_v51  ;;  %v3147_v47 = vadd.f32 1.0, %v3890_v49  ;;  %v2959_v61 = vmul.f32 0.044715, %v6379_v27  ;;  %v2927_v59 = vmul.f32 0.5, %v6379_v27 }
 0x3d8   : > { %v3212_v29 = vadd.f32 %v3944_v41, %v3180_v26  ;;  %v3949_v26 = vld [vmem:[%s4350_s11 + $0x70] sm:$0xff] }
 0x3d9   : > { %v3024_v24 = vmul.f32 %v2992_v53, %v2830_v51  ;;  %v3179_v22 = vmul.f32 %v3147_v47, %v2923_v16  ;;  %v2991_v58 = vmul.f32 %v2959_v61, %v6379_v27 }
 0x3da   : > { %3244 = vst [vmem:[%s6296_s26 + $0x58] sm:$0xff] %v3212_v29 }
 0x3db   : > { %v3056_v6 = vadd.f32 %v3024_v24, %v2830_v51  ;;  %v3211_v33 = vadd.f32 %v3945_v11, %v3179_v22  ;;  %v3023_v57 = vmul.f32 %v2991_v58, %v6379_v27 }
 0x3dd   : > { %v3088_v19 = vmul.f32 0.7978846, %v3056_v6  ;;  %3243 = vst [vmem:[%s6296_s26 + $0x50] sm:$0xff] %v3211_v33  ;;  %v3055_v46 = vadd.f32 %v3023_v57, %v6379_v27 }
 0x3de   : > { %v3704_v40 = vpop.f32.mrf.mxu1 }
 0x3df   : > { %3895 = vtanh.f32 %v3088_v19  ;;  %v3892_v60 = vpop.eup %3891  ;;  %v3087_v50 = vmul.f32 0.7978846, %v3055_v46  ;;  %v2840_v8 = vadd.f32 %v3704_v40, %v6276_v17 }
 0x3e0   : > { %v3150_v31 = vadd.f32 1.0, %v3892_v60  ;;  %v2834_v62 = vpop.f32.mrf.mxu1 }
 0x3e1   : > { %v3894_v3 = vpop.eup %3893  ;;  %3897 = vtanh.f32 %v3087_v50  ;;  %v2962_v37 = vmul.f32 0.044715, %v2840_v8  ;;  %v2835_v21 = vadd.f32 %v6276_v17, %v2834_v62  ;;  %v2930_v58 = vmul.f32 0.5, %v2840_v8 }
 0x3e2   : > { %v3182_v2 = vmul.f32 %v3150_v31, %v2926_v39  ;;  %v3149_v42 = vadd.f32 1.0, %v3894_v3  ;;  %v3950_v31 = vld [vmem:[%s4350_s11 + $0x88] sm:$0xff] }
 0x3e3   : > { %v2994_v4 = vmul.f32 %v2962_v37, %v2840_v8  ;;  %v2961_v5 = vmul.f32 0.044715, %v2835_v21  ;;  %v2929_v40 = vmul.f32 0.5, %v2835_v21 }
 0x3e4   : > { %v3214_v35 = vadd.f32 %v3946_v23, %v3182_v2  ;;  %v3181_v7 = vmul.f32 %v3149_v42, %v2925_v1  ;;  %v3951_v2 = vld [vmem:[%s4350_s11 + $0x80] sm:$0xff] }
 0x3e5   : > { %v3026_v36 = vmul.f32 %v2994_v4, %v2840_v8  ;;  %v2993_v15 = vmul.f32 %v2961_v5, %v2835_v21 }
 0x3e6   : > { %3246 = vst [vmem:[%s6296_s26 + $0x68] sm:$0xff] %v3214_v35  ;;  %v3213_v9 = vadd.f32 %v3947_v54, %v3181_v7 }
 0x3e7   : > { %v3058_v25 = vadd.f32 %v3026_v36, %v2840_v8  ;;  %v3025_v12 = vmul.f32 %v2993_v15, %v2835_v21 }
 0x3e8   : > { %3245 = vst [vmem:[%s6296_s26 + $0x60] sm:$0xff] %v3213_v9 }
 0x3e9   : > { %v3090_v56 = vmul.f32 0.7978846, %v3058_v25  ;;  %v3057_v13 = vadd.f32 %v3025_v12, %v2835_v21 }
 0x3eb   : > { %3899 = vtanh.f32 %v3090_v56  ;;  %v3089_v18 = vmul.f32 0.7978846, %v3057_v13  ;;  %v3707_v52 = vpop.f32.mrf.mxu1 }
 0x3ec   : > { %v3896_v43 = vpop.eup %3895  ;;  %v2850_v20 = vadd.f32 %v3707_v52, %v6276_v17  ;;  %v3952_v52 = vld [vmem:[%s4350_s11 + $0x98] sm:$0xff] }
 0x3ed   : > { %v3152_v55 = vadd.f32 1.0, %v3896_v43  ;;  %3901 = vtanh.f32 %v3089_v18  ;;  %v2844_v28 = vpop.f32.mrf.mxu1 }
 0x3ee   : > { %v3898_v14 = vpop.eup %3897  ;;  %v2964_v38 = vmul.f32 0.044715, %v2850_v20  ;;  %v2845_v44 = vadd.f32 %v6276_v17, %v2844_v28  ;;  %v2932_v36 = vmul.f32 0.5, %v2850_v20 }
 0x3ef   : > { %v3184_v34 = vmul.f32 %v3152_v55, %v2928_v30  ;;  %v3151_v45 = vadd.f32 1.0, %v3898_v14  ;;  %v3953_v14 = vld [vmem:[%s4350_s11 + $0x90] sm:$0xff] }
 0x3f0   : > { %v2996_v48 = vmul.f32 %v2964_v38, %v2850_v20  ;;  %v2963_v51 = vmul.f32 0.044715, %v2845_v44  ;;  %v2931_v56 = vmul.f32 0.5, %v2845_v44 }
 0x3f1   : > { %v3216_v0 = vadd.f32 %v3948_v10, %v3184_v34  ;;  %v3183_v32 = vmul.f32 %v3151_v45, %v2927_v59 }
 0x3f2   : > { %v3028_v63 = vmul.f32 %v2996_v48, %v2850_v20  ;;  %v2995_v49 = vmul.f32 %v2963_v51, %v2845_v44 }
 0x3f3   : > { %3248 = vst [vmem:[%s6296_s26 + $0x78] sm:$0xff] %v3216_v0  ;;  %v3215_v53 = vadd.f32 %v3949_v26, %v3183_v32 }
 0x3f4   : > { %v3060_v16 = vadd.f32 %v3028_v63, %v2850_v20  ;;  %v3027_v47 = vmul.f32 %v2995_v49, %v2845_v44 }
 0x3f5   : > { %3247 = vst [vmem:[%s6296_s26 + $0x70] sm:$0xff] %v3215_v53 }
 0x3f6   : > { %v3092_v61 = vmul.f32 0.7978846, %v3060_v16  ;;  %v3059_v41 = vadd.f32 %v3027_v47, %v2845_v44 }
 0x3f7   : > { %v3710_v29 = vpop.f32.mrf.mxu1 }
 0x3f8   : > { %v3900_v24 = vpop.eup %3899  ;;  %3903 = vtanh.f32 %v3092_v61  ;;  %v3091_v27 = vmul.f32 0.7978846, %v3059_v41  ;;  %v2860_v22 = vadd.f32 %v3710_v29, %v6276_v17 }
 0x3f9   : > { %v3154_v6 = vadd.f32 1.0, %v3900_v24  ;;  %v2854_v11 = vpop.f32.mrf.mxu1 }
 0x3fa   : > { %v3902_v33 = vpop.eup %3901  ;;  %3905 = vtanh.f32 %v3091_v27  ;;  %v2966_v57 = vmul.f32 0.044715, %v2860_v22  ;;  %v2855_v19 = vadd.f32 %v6276_v17, %v2854_v11  ;;  %v2934_v51 = vmul.f32 0.5, %v2860_v22  ;;  %v3954_v27 = vld [vmem:[%s4350_s11 + $0xa8] sm:$0xff] }
 0x3fb   : > { %v3186_v46 = vmul.f32 %v3154_v6, %v2930_v58  ;;  %v3153_v60 = vadd.f32 1.0, %v3902_v33  ;;  %v3955_v33 = vld [vmem:[%s4350_s11 + $0xa0] sm:$0xff] }
 0x3fc   : > { %v2998_v50 = vmul.f32 %v2966_v57, %v2860_v22  ;;  %v2965_v39 = vmul.f32 0.044715, %v2855_v19  ;;  %v2933_v47 = vmul.f32 0.5, %v2855_v19 }
 0x3fd   : > { %v3218_v62 = vadd.f32 %v3950_v31, %v3186_v46  ;;  %v3185_v3 = vmul.f32 %v3153_v60, %v2929_v40 }
 0x3fe   : > { %v3030_v37 = vmul.f32 %v2998_v50, %v2860_v22  ;;  %v2997_v8 = vmul.f32 %v2965_v39, %v2855_v19 }
 0x3ff   : > { %3250 = vst [vmem:[%s6296_s26 + $0x88] sm:$0xff] %v3218_v62  ;;  %v3217_v1 = vadd.f32 %v3951_v2, %v3185_v3 }
 0x400   : > { %v3062_v42 = vadd.f32 %v3030_v37, %v2860_v22  ;;  %v3029_v4 = vmul.f32 %v2997_v8, %v2855_v19 }
 0x401   : > { %3249 = vst [vmem:[%s6296_s26 + $0x80] sm:$0xff] %v3217_v1 }
 0x402   : > { %v3094_v5 = vmul.f32 0.7978846, %v3062_v42  ;;  %v3061_v23 = vadd.f32 %v3029_v4, %v2855_v19 }
 0x404   : > { %3907 = vtanh.f32 %v3094_v5  ;;  %v3093_v35 = vmul.f32 0.7978846, %v3061_v23 }
 0x405   : > { %v3904_v21 = vpop.eup %3903  ;;  %v3713_v7 = vpop.f32.mrf.mxu1 }
 0x406   : > { %v3156_v15 = vadd.f32 1.0, %v3904_v21  ;;  %3909 = vtanh.f32 %v3093_v35  ;;  %v2870_v54 = vadd.f32 %v3713_v7, %v6276_v17 }
 0x407   : > { %v3906_v9 = vpop.eup %3905  ;;  %v2864_v25 = vpop.f32.mrf.mxu1 }
 0x408   : > { %v3188_v12 = vmul.f32 %v3156_v15, %v2932_v36  ;;  %v3155_v13 = vadd.f32 1.0, %v3906_v9  ;;  %v2968_v43 = vmul.f32 0.044715, %v2870_v54  ;;  %v2865_v18 = vadd.f32 %v6276_v17, %v2864_v25  ;;  %v3956_v15 = vld [vmem:[%s4350_s11 + $0xb8] sm:$0xff] }
 0x409   : > { %v2936_v8 = vmul.f32 0.5, %v2870_v54 }
 0x40a   : > { %v3220_v30 = vadd.f32 %v3952_v52, %v3188_v12  ;;  %v3187_v55 = vmul.f32 %v3155_v13, %v2931_v56  ;;  %v3000_v28 = vmul.f32 %v2968_v43, %v2870_v54  ;;  %v2967_v20 = vmul.f32 0.044715, %v2865_v18  ;;  %v3957_v56 = vld [vmem:[%s4350_s11 + $0xb0] sm:$0xff] }
 0x40b   : > { %v2935_v35 = vmul.f32 0.5, %v2865_v18 }
 0x40c   : > { %3252 = vst [vmem:[%s6296_s26 + $0x98] sm:$0xff] %v3220_v30  ;;  %v3219_v34 = vadd.f32 %v3953_v14, %v3187_v55  ;;  %v3032_v38 = vmul.f32 %v3000_v28, %v2870_v54  ;;  %v2999_v59 = vmul.f32 %v2967_v20, %v2865_v18 }
 0x40e   : > { %3251 = vst [vmem:[%s6296_s26 + $0x90] sm:$0xff] %v3219_v34  ;;  %v3064_v45 = vadd.f32 %v3032_v38, %v2870_v54  ;;  %v3031_v10 = vmul.f32 %v2999_v59, %v2865_v18 }
 0x410   : > { %v3096_v0 = vmul.f32 0.7978846, %v3064_v45  ;;  %v3063_v44 = vadd.f32 %v3031_v10, %v2865_v18 }
 0x411   : > { %v3908_v48 = vpop.eup %3907 }
 0x412   : > { %v3158_v32 = vadd.f32 1.0, %v3908_v48  ;;  %3911 = vtanh.f32 %v3096_v0  ;;  %v3716_v63 = vpop.f32.mrf.mxu1  ;;  %v3095_v26 = vmul.f32 0.7978846, %v3063_v44 }
 0x413   : > { %v3910_v49 = vpop.eup %3909  ;;  %v2880_v53 = vadd.f32 %v3716_v63, %v6276_v17 }
 0x414   : > { %v3190_v16 = vmul.f32 %v3158_v32, %v2934_v51  ;;  %v3157_v61 = vadd.f32 1.0, %v3910_v49  ;;  %v2874_v41 = vpop.f32.mrf.mxu1  ;;  %3913 = vtanh.f32 %v3095_v26  ;;  %v3958_v49 = vld [vmem:[%s4350_s11 + $0xc8] sm:$0xff] }
 0x415   : > { %v2970_v29 = vmul.f32 0.044715, %v2880_v53  ;;  %v2875_v24 = vadd.f32 %v6276_v17, %v2874_v41  ;;  %v2938_v34 = vmul.f32 0.5, %v2880_v53 }
 0x416   : > { %v3222_v22 = vadd.f32 %v3954_v27, %v3190_v16  ;;  %v3189_v58 = vmul.f32 %v3157_v61, %v2933_v47  ;;  %v3959_v61 = vld [vmem:[%s4350_s11 + $0xc0] sm:$0xff] }
 0x417   : > { %v3002_v6 = vmul.f32 %v2970_v29, %v2880_v53  ;;  %v2969_v11 = vmul.f32 0.044715, %v2875_v24  ;;  %v2937_v44 = vmul.f32 0.5, %v2875_v24 }
 0x418   : > { %3254 = vst [vmem:[%s6296_s26 + $0xa8] sm:$0xff] %v3222_v22  ;;  %v3221_v57 = vadd.f32 %v3955_v33, %v3189_v58 }
 0x419   : > { %v3034_v46 = vmul.f32 %v3002_v6, %v2880_v53  ;;  %v3001_v40 = vmul.f32 %v2969_v11, %v2875_v24 }
 0x41a   : > { %3253 = vst [vmem:[%s6296_s26 + $0xa0] sm:$0xff] %v3221_v57 }
 0x41b   : > { %v3066_v60 = vadd.f32 %v3034_v46, %v2880_v53  ;;  %v3033_v19 = vmul.f32 %v3001_v40, %v2875_v24 }
 0x41d   : > { %v3098_v50 = vmul.f32 0.7978846, %v3066_v60  ;;  %v3065_v39 = vadd.f32 %v3033_v19, %v2875_v24 }
 0x41e   : > { %v3719_v31 = vpop.f32.mrf.mxu1 }
 0x41f   : > { %v3912_v62 = vpop.eup %3911  ;;  %3915 = vtanh.f32 %v3098_v50  ;;  %v3097_v3 = vmul.f32 0.7978846, %v3065_v39  ;;  %v2890_v37 = vadd.f32 %v3719_v31, %v6276_v17 }
 0x420   : > { %v3160_v2 = vadd.f32 1.0, %v3912_v62  ;;  %v2884_v1 = vpop.f32.mrf.mxu1 }
 0x421   : > { %3917 = vtanh.f32 %v3097_v3  ;;  %v2972_v42 = vmul.f32 0.044715, %v2890_v37  ;;  %v6424_v4 = vadd.f32 %v6276_v17, %v2884_v1  ;;  %v3914_v5 = vpop.eup %3913  ;;  %v2940_v46 = vmul.f32 0.5, %v2890_v37 }
 0x422   : > { %v3192_v23 = vmul.f32 %v3160_v2, %v2936_v8  ;;  %v3159_v21 = vadd.f32 1.0, %v3914_v5  ;;  %v3960_v2 = vld [vmem:[%s4350_s11 + $0xd8] sm:$0xff] }
 0x423   : > { %v3004_v7 = vmul.f32 %v2972_v42, %v2890_v37  ;;  %v2971_v36 = vmul.f32 0.044715, %v6424_v4  ;;  %v2939_v31 = vmul.f32 0.5, %v6424_v4 }
 0x424   : > { %v3224_v9 = vadd.f32 %v3956_v15, %v3192_v23  ;;  %v3191_v54 = vmul.f32 %v3159_v21, %v2935_v35  ;;  %v3961_v23 = vld [vmem:[%s4350_s11 + $0xd0] sm:$0xff] }
 0x425   : > { %v3036_v25 = vmul.f32 %v3004_v7, %v2890_v37  ;;  %v3003_v12 = vmul.f32 %v2971_v36, %v6424_v4 }
 0x426   : > { %3256 = vst [vmem:[%s6296_s26 + $0xb8] sm:$0xff] %v3224_v9  ;;  %v3223_v13 = vadd.f32 %v3957_v56, %v3191_v54 }
 0x427   : > { %v3068_v43 = vadd.f32 %v3036_v25, %v2890_v37  ;;  %v3035_v52 = vmul.f32 %v3003_v12, %v6424_v4 }
 0x428   : > { %3255 = vst [vmem:[%s6296_s26 + $0xb0] sm:$0xff] %v3223_v13 }
 0x429   : > { %v3100_v30 = vmul.f32 0.7978846, %v3068_v43  ;;  %v3067_v18 = vadd.f32 %v3035_v52, %v6424_v4  ;;  %v3962_v43 = vld [vmem:[%s4350_s11 + $0xe8] sm:$0xff] }
 0x42b   : > { %3919 = vtanh.f32 %v3100_v30  ;;  %v3099_v55 = vmul.f32 0.7978846, %v3067_v18  ;;  %v3722_v28 = vpop.f32.mrf.mxu1  ;;  %v3963_v18 = vld [vmem:[%s4350_s11 + $0xe0] sm:$0xff] }
 0x42c   : > { %v3916_v20 = vpop.eup %3915  ;;  %v2900_v14 = vadd.f32 %v3722_v28, %v6276_v17 }
 0x42d   : > { %v3162_v38 = vadd.f32 1.0, %v3916_v20  ;;  %3921 = vtanh.f32 %v3099_v55  ;;  %v2894_v59 = vpop.f32.mrf.mxu1 }
 0x42e   : > { %v3918_v45 = vpop.eup %3917  ;;  %v2974_v10 = vmul.f32 0.044715, %v2900_v14  ;;  %v2895_v0 = vadd.f32 %v6276_v17, %v2894_v59  ;;  %v2942_v9 = vmul.f32 0.5, %v2900_v14 }
 0x42f   : > { %v3194_v48 = vmul.f32 %v3162_v38, %v2938_v34  ;;  %v3161_v51 = vadd.f32 1.0, %v3918_v45 }
 0x430   : > { %v3006_v32 = vmul.f32 %v2974_v10, %v2900_v14  ;;  %v2973_v63 = vmul.f32 0.044715, %v2895_v0  ;;  %v2941_v56 = vmul.f32 0.5, %v2895_v0  ;;  %v3964_v10 = vld [vmem:[%s4350_s11 + $0xf8] sm:$0xff] }
 0x431   : > { %v3226_v26 = vadd.f32 %v3958_v49, %v3194_v48  ;;  %v3193_v16 = vmul.f32 %v3161_v51, %v2937_v44  ;;  %v3965_v44 = vld [vmem:[%s4350_s11 + $0xf0] sm:$0xff] }
 0x432   : > { %v3038_v47 = vmul.f32 %v3006_v32, %v2900_v14  ;;  %v3005_v53 = vmul.f32 %v2973_v63, %v2895_v0 }
 0x433   : > { %3258 = vst [vmem:[%s6296_s26 + $0xc8] sm:$0xff] %v3226_v26  ;;  %v3225_v41 = vadd.f32 %v3959_v61, %v3193_v16 }
 0x434   : > { %v3070_v29 = vadd.f32 %v3038_v47, %v2900_v14  ;;  %v3037_v27 = vmul.f32 %v3005_v53, %v2895_v0 }
 0x435   : > { %3257 = vst [vmem:[%s6296_s26 + $0xc0] sm:$0xff] %v3225_v41 }
 0x436   : > { %v3102_v22 = vmul.f32 0.7978846, %v3070_v29  ;;  %v3069_v58 = vadd.f32 %v3037_v27, %v2895_v0  ;;  %v3725_v6 = vpop.f32.mrf.mxu1 }
 0x437   : > { %v2910_v11 = vadd.f32 %v3725_v6, %v6276_v17 }
 0x438   : > { %v3920_v24 = vpop.eup %3919  ;;  %3923 = vtanh.f32 %v3102_v22  ;;  %v3101_v33 = vmul.f32 0.7978846, %v3069_v58  ;;  %v2904_v57 = vpop.f32.mrf.mxu1 }
 0x439   : > { %v3164_v40 = vadd.f32 1.0, %v3920_v24  ;;  %v2976_v60 = vmul.f32 0.044715, %v2910_v11  ;;  %v2905_v19 = vadd.f32 %v6276_v17, %v2904_v57  ;;  %v2944_v20 = vmul.f32 0.5, %v2910_v11 }
 0x43a   : > { %v3922_v50 = vpop.eup %3921  ;;  %3925 = vtanh.f32 %v3101_v33 }
 0x43b   : > { %v3196_v39 = vmul.f32 %v3164_v40, %v2940_v46  ;;  %v3163_v62 = vadd.f32 1.0, %v3922_v50  ;;  %v3008_v3 = vmul.f32 %v2976_v60, %v2910_v11  ;;  %v2975_v8 = vmul.f32 0.044715, %v2905_v19 }
 0x43c   : > { %v2943_v59 = vmul.f32 0.5, %v2905_v19 }
 0x43d   : > { %v3228_v1 = vadd.f32 %v3960_v2, %v3196_v39  ;;  %v3195_v42 = vmul.f32 %v3163_v62, %v2939_v31  ;;  %v3040_v5 = vmul.f32 %v3008_v3, %v2910_v11  ;;  %v3007_v37 = vmul.f32 %v2975_v8, %v2905_v19 }
 0x43f   : > { %3260 = vst [vmem:[%s6296_s26 + $0xd8] sm:$0xff] %v3228_v1  ;;  %v3227_v35 = vadd.f32 %v3961_v23, %v3195_v42  ;;  %v3072_v21 = vadd.f32 %v3040_v5, %v2910_v11  ;;  %v3039_v17 = vmul.f32 %v3007_v37, %v2905_v19 }
 0x441   : > { %3259 = vst [vmem:[%s6296_s26 + $0xd0] sm:$0xff] %v3227_v35  ;;  %v3104_v7 = vmul.f32 0.7978846, %v3072_v21  ;;  %v3071_v36 = vadd.f32 %v3039_v17, %v2905_v19 }
 0x443   : > { %3927 = vtanh.f32 %v3104_v7  ;;  %v3103_v4 = vmul.f32 0.7978846, %v3071_v36 }
 0x445   : > { %v3924_v15 = vpop.eup %3923  ;;  %3929 = vtanh.f32 %v3103_v4 }
 0x446   : > { %v3166_v54 = vadd.f32 1.0, %v3924_v15 }
 0x447   : > { %v3926_v25 = vpop.eup %3925 }
 0x448   : > { %v3198_v12 = vmul.f32 %v3166_v54, %v2942_v9  ;;  %v3165_v13 = vadd.f32 1.0, %v3926_v25 }
 0x44a   : > { %v3230_v52 = vadd.f32 %v3962_v43, %v3198_v12  ;;  %v3197_v30 = vmul.f32 %v3165_v13, %v2941_v56 }
 0x44c   : > { %3262 = vst [vmem:[%s6296_s26 + $0xe8] sm:$0xff] %v3230_v52  ;;  %v3229_v55 = vadd.f32 %v3963_v18, %v3197_v30 }
 0x44e   : > { %3261 = vst [vmem:[%s6296_s26 + $0xe0] sm:$0xff] %v3229_v55 }
 0x450   : > { %v3928_v28 = vpop.eup %3927 }
 0x451   : > { %v3168_v14 = vadd.f32 1.0, %v3928_v28 }
 0x452   : > { %v3930_v34 = vpop.eup %3929 }
 0x453   : > { %v3200_v38 = vmul.f32 %v3168_v14, %v2944_v20  ;;  %v3167_v45 = vadd.f32 1.0, %v3930_v34 }
 0x455   : > { %v3232_v0 = vadd.f32 %v3964_v10, %v3200_v38  ;;  %v3199_v48 = vmul.f32 %v3167_v45, %v2943_v59 }
 0x457   : > { %3264 = vst [vmem:[%s6296_s26 + $0xf8] sm:$0xff] %v3232_v0  ;;  %v3231_v51 = vadd.f32 %v3965_v44, %v3199_v48 }
 0x459   : > { %3263 = vst [vmem:[%s6296_s26 + $0xf0] sm:$0xff] %v3231_v51 }
 0x45a   : > { %4063 = shalt.err (!%p4060_p4)
}
 0x45b   : > { %s4064_s11 = scalar_lea.hbm %s6458_s15, 4096  ;;  %s4068_s16 = scalar_lea.hbm %s6823_s22, 8192 }
 0x45c   : > { %p4065_p5 = scmp.ne.s32.totalorder %s6458_s15, %s4064_s11  ;;  %p4069_p10 = scmp.lt.s32.totalorder %s6458_s15, %s6823_s22 }
 0x45d   : > { %p4070_p13 = scmp.lt.s32.totalorder %s4068_s16, %s4064_s11 }
 0x45e   : > { %p4066_p6 = pnand %p4065_p5, %p4255_p9 }
 0x45f   : > { %p4071_p8 = por %p4070_p13, %p4069_p10 }
 0x460   : > { %p4067_p7 = pneg %p4066_p6 }
 0x462   : > { %p4072_p12 = pnand %p4071_p8, %p4067_p7 }
 0x464   : > { %4075 = shalt.err (!%p4072_p12)
}
 0x465   : > { %s4143_s30 = smov 128   ;;  %s4144_s26 = smov 8  }
 0x466   : > { %3732 = dma.vmem_to_hbm [thread:$0]  (%p4255_p9), %s6460_s10, 4096, %s6458_s15, %s3266_s19, %s4143_s30, %s4143_s30, %s4144_s26  }
 0x467 PF: > { %s6824_s28 = sld [smem:[#allocation12_spill]] }
 0x468   : > { %s6826_s24 = sld [smem:[#allocation16_spill]] }
 0x46d   : > { %s3297_s23 = sand.u32 1, %s6824_s28  }
 0x46e   : > { %p6827_p0 = scmp.ge.s32.totalorder %s6826_s24, 2  ;;  %s3298_s21 = scalar_lea.sflag [#allocation4], %s3297_s23 }
 0x470   : > { %p3745_p1 = pnand %p6827_p0, %p4262_p11 }
 0x472   : > { %p3746_p3 = pneg %p3745_p1 }
 0x474   : > { %4109 = dma.done.wait (%p3746_p3), %s3298_s21, 4096  }
 0x475   : > { %4111 = vsyncadd (%p3746_p3), %s3298_s21, 4294963200  ;;  %s29_s18 = sadd.s32 1, %s6826_s24   ;;  %s6828_s12 = sld [smem:[#allocation13_spill]] }
 0x476   : > { %p26_p2 = scmp.ge.s32.totalorder %s29_s18, 4   ;;  %s6829_s15 = sld [smem:[#allocation19_spill]] }
 0x477   : > { %s6830_s16 = sld [smem:[#allocation15_spill]]  ;;  %s6832_s13 = smov %s4118_s14 }
 0x478   : > { %s6831_s17 = sld [smem:[#allocation17_spill]]  ;;  %28 = sbr.rel (!%p26_p2) target bundleno = 12 (0xc), region = 129 }
 0x47b   : > { %s6833_s14 = smov %s6828_s12 }
 0x47d   :  { %3303 = vsyncpa [#allocation3], 1 }
 0x47e   :  { %3305 = vsyncpa [#allocation3 + $0x1], 1 }
 0x47f   :  { %3306 = vsyncpa [#allocation6], 1 }
 0x480   :  { %3308 = vsyncpa [#allocation6 + $0x1], 1 }
 0x481   :  { %3309 = vsyncpa [#allocation4], 1 }
 0x482   :  { %3311 = vsyncpa [#allocation4 + $0x1], 1 }

</bundles_post_ra>
